<compile_context>
chip_gen: v7x
topology: tpu7x:2x2x1
jax: 0.10.0
libtpu: 0.0.40
codegen_flags: <defaults>
</compile_context>

<pallas_src>
import functools

import numpy as np
import jax
import jax.numpy as jnp
from jax.experimental import pallas as pl
from jax.experimental.pallas import tpu as pltpu


# ----------------------------------------------------------------------------
# Static tables (match the torch module's __init__ buffers)
# ----------------------------------------------------------------------------
def _make_relative_position_index(Wh, Ww):
    coords_h = np.arange(Wh)
    coords_w = np.arange(Ww)
    coords = np.stack(np.meshgrid(coords_h, coords_w, indexing="ij"))      # (2, Wh, Ww)
    coords_flat = coords.reshape(2, -1)                                    # (2, N)
    rel = coords_flat[:, :, None] - coords_flat[:, None, :]                # (2, N, N)
    rel = rel.transpose(1, 2, 0).astype(np.int64)                          # (N, N, 2)
    rel[:, :, 0] += Wh - 1
    rel[:, :, 1] += Ww - 1
    rel[:, :, 0] *= 2 * Ww - 1
    return rel.sum(-1)                                                     # (N, N)


def _make_shift_attn_mask(H, W, Wh, Ww, shift):
    img_mask = np.zeros((H, W), np.float32)
    h_slices = (slice(0, -Wh), slice(-Wh, -shift), slice(-shift, None))
    w_slices = (slice(0, -Ww), slice(-Ww, -shift), slice(-shift, None))
    cnt = 0
    for hs in h_slices:
        for ws in w_slices:
            img_mask[hs, ws] = cnt
            cnt += 1
    r1, r2 = H // Wh, W // Ww
    mw = img_mask.reshape(r1, Wh, r2, Ww).transpose(0, 2, 1, 3).reshape(r1 * r2, Wh * Ww)
    attn_mask = mw[:, None, :] - mw[:, :, None]      # unsqueeze(1) - unsqueeze(2)
    attn_mask = np.where(attn_mask != 0, -100.0, 0.0).astype(np.float32)
    return attn_mask                                                       # (nW, N, N)


def _pick_window_chunk(nW, pack, B, max_chunk=16):
    """Largest chunk (multiple of `pack`, divisor of nW, <= max_chunk) that still
    leaves >= 4 grid steps for the pipeline / megacore; otherwise the largest
    valid chunk (fewest steps)."""
    cands = [c for c in range(pack, min(nW, max_chunk) + 1, pack) if nW % c == 0]
    good = [c for c in cands if B * (nW // c) >= 4]
    return max(good) if good else max(cands)


# ----------------------------------------------------------------------------
# Pallas kernel: fused windowed attention for one chunk of windows
# ----------------------------------------------------------------------------
def _swin_attn_kernel(x_ref, wqkv_ref, bqkv_ref, wout_ref, bout_ref, bm_ref,
                      o_ref, *, heads, scale, pack):
    WCHUNK, N, C = x_ref.shape
    hd = C // heads
    P = WCHUNK // pack          # packed window groups in this chunk
    M = pack * N                # packed query/key length -> 128-lane score tiles
    T = WCHUNK * N              # tokens in this chunk

    # Fused qkv projection: one wide MXU matmul over all chunk tokens (K = C).
    x2 = x_ref[...].reshape(T, C)
    qkv = (jnp.dot(x2, wqkv_ref[...], preferred_element_type=jnp.float32)
           + bqkv_ref[...].astype(jnp.float32))                     # (T, 3C) f32

    # Per-head attention, batched over packed window groups; q/k/v sliced
    # directly from qkv (no full-width copies).
    head_outs = []
    for h in range(heads):
        qh = qkv[:, h * hd:(h + 1) * hd].reshape(P, M, hd) * scale
        kh = qkv[:, C + h * hd:C + (h + 1) * hd].reshape(P, M, hd)
        vh = qkv[:, 2 * C + h * hd:2 * C + (h + 1) * hd].reshape(P, M, hd)

        s = jnp.einsum("pmd,pnd->pmn", qh, kh,
                       preferred_element_type=jnp.float32)          # (P, M, M)
        s = s + bm_ref[h]               # rel-pos bias + shift mask + pair block mask
        s = s - jnp.max(s, axis=-1, keepdims=True)
        p = jnp.exp(s)
        p = p * pl.reciprocal(jnp.sum(p, axis=-1, keepdims=True), approx=True)
        oh = jnp.einsum("pmn,pnd->pmd", p, vh,
                        preferred_element_type=jnp.float32)         # (P, M, hd)
        head_outs.append(oh.reshape(T, hd))

    # Merge heads into a (T, C) slab and do ONE output projection (K = C).
    o_cat = jnp.concatenate(head_outs, axis=-1)
    y = (jnp.dot(o_cat, wout_ref[...], preferred_element_type=jnp.float32)
         + bout_ref[...].astype(jnp.float32))
    o_ref[...] = y.reshape(WCHUNK, N, C).astype(o_ref.dtype)


# ----------------------------------------------------------------------------
# Wrapper: roll + window partition (layout plumbing) + pallas_call
# ----------------------------------------------------------------------------
def shift_window_attention(x, params, *, heads, window_size, shift_size,
                           window_chunk=None):
    B, C, H, W = x.shape
    Wh, Ww = window_size
    assert H % Wh == 0 and W % Ww == 0
    assert 0 < shift_size < min(Wh, Ww)
    assert C % heads == 0
    r1, r2 = H // Wh, W // Ww
    nW, N = r1 * r2, Wh * Ww
    scale = (C // heads) ** (-0.5)

    # Pack pairs of windows into one lane-dense score tile when possible.
    pack = 2 if nW % 2 == 0 else 1
    M = pack * N
    G = nW // pack                                   # total packed groups

    if window_chunk is None:
        window_chunk = _pick_window_chunk(nW, pack, B)
    assert window_chunk % pack == 0 and nW % window_chunk == 0
    nchunks = nW // window_chunk
    P = window_chunk // pack                         # packed groups per grid step

    # cyclic shift + window partition (layout plumbing):
    # b c (r1 h1) (r2 w1) -> (b r1 r2) (h1 w1) c
    xs = jnp.roll(x, shift=(-shift_size, -shift_size), axis=(2, 3))
    xw = xs.reshape(B, C, r1, Wh, r2, Ww).transpose(0, 2, 4, 3, 5, 1).reshape(B * nW, N, C)

    # relative position bias (parameter gather) + shift mask, pre-combined and
    # packed block-diagonally so the kernel does a single add per head.
    rel_idx = jnp.asarray(_make_relative_position_index(Wh, Ww))
    bias = params["rpb_table"][rel_idx.reshape(-1)].reshape(N, N, heads)
    bias = bias.transpose(2, 0, 1).astype(jnp.float32)                   # (heads, N, N)
    mask = jnp.asarray(_make_shift_attn_mask(H, W, Wh, Ww, shift_size))  # (nW, N, N)
    comb = bias[None] + mask[:, None]                                    # (nW, heads, N, N)
    comb = comb.reshape(G, pack, heads, N, N)
    bm = jnp.full((G, heads, M, M), -1e9, jnp.float32)   # cross-window pairs blocked
    for p_i in range(pack):
        bm = bm.at[:, :, p_i * N:(p_i + 1) * N, p_i * N:(p_i + 1) * N].set(comb[:, p_i])
    bm = bm.transpose(1, 0, 2, 3)                                        # (heads, G, M, M)

    kernel = functools.partial(_swin_attn_kernel, heads=heads, scale=scale, pack=pack)

    def const_spec(a):
        # grid-invariant operand: full-array block, constant index_map
        return pl.BlockSpec(a.shape, lambda i, j: (0,) * a.ndim)

    out_w = pl.pallas_call(
        kernel,
        out_shape=jax.ShapeDtypeStruct((B * nW, N, C), x.dtype),
        grid_spec=pltpu.PrefetchScalarGridSpec(
            num_scalar_prefetch=0,
            grid=(B, nchunks),
            in_specs=[
                pl.BlockSpec((window_chunk, N, C),
                             lambda i, j: (i * nchunks + j, 0, 0)),
                const_spec(params["wqkv"]),
                const_spec(params["bqkv"]),
                const_spec(params["wout"]),
                const_spec(params["bout"]),
                pl.BlockSpec((heads, P, M, M), lambda i, j: (0, j, 0, 0)),
            ],
            out_specs=pl.BlockSpec((window_chunk, N, C),
                                   lambda i, j: (i * nchunks + j, 0, 0)),
        ),
        compiler_params=pltpu.CompilerParams(
            dimension_semantics=("parallel", "parallel"),
            vmem_limit_bytes=64 * 1024 * 1024),
    )(xw, params["wqkv"], params["bqkv"], params["wout"], params["bout"], bm)

    # reverse window partition + reverse cyclic shift
    out = out_w.reshape(B, r1, r2, Wh, Ww, C).transpose(0, 5, 1, 3, 2, 4).reshape(B, C, H, W)
    return jnp.roll(out, shift=(shift_size, shift_size), axis=(2, 3))


# ----------------------------------------------------------------------------
# Pure-JAX reference (mirrors the torch forward) + synthetic params
# ----------------------------------------------------------------------------
def shift_window_attention_ref(x, params, *, heads, window_size, shift_size):
    B, C, H, W = x.shape
    Wh, Ww = window_size
    r1, r2 = H // Wh, W // Ww
    nW, N = r1 * r2, Wh * Ww
    hd = C // heads
    scale = hd ** (-0.5)

    xs = jnp.roll(x, shift=(-shift_size, -shift_size), axis=(2, 3))
    xw = xs.reshape(B, C, r1, Wh, r2, Ww).transpose(0, 2, 4, 3, 5, 1).reshape(B * nW, N, C)

    qkv = xw @ params["wqkv"] + params["bqkv"]
    q, k, v = jnp.split(qkv, 3, axis=-1)
    q = q * scale

    def split_heads(t):
        return t.reshape(B * nW, N, heads, hd).transpose(0, 2, 1, 3)

    q, k, v = map(split_heads, (q, k, v))
    attn = jnp.einsum("bhmc,bhnc->bhmn", q, k)

    rel_idx = jnp.asarray(_make_relative_position_index(Wh, Ww))
    bias = params["rpb_table"][rel_idx.reshape(-1)].reshape(N, N, heads).transpose(2, 0, 1)
    attn = attn + bias[None]

    mask = jnp.asarray(_make_shift_attn_mask(H, W, Wh, Ww, shift_size))
    attn = attn.reshape(B, nW, heads, N, N) + mask.reshape(1, nW, 1, N, N)
    attn = jax.nn.softmax(attn.reshape(B * nW, heads, N, N), axis=-1)

    out = jnp.einsum("bhmn,bhnc->bhmc", attn, v)
    out = out.transpose(0, 2, 1, 3).reshape(B * nW, N, C)
    out = out @ params["wout"] + params["bout"]

    out = out.reshape(B, r1, r2, Wh, Ww, C).transpose(0, 5, 1, 3, 2, 4).reshape(B, C, H, W)
    return jnp.roll(out, shift=(shift_size, shift_size), axis=(2, 3))


def init_params(key, dim, heads, window_size):
    Wh, Ww = window_size
    ks = jax.random.split(key, 5)
    # (in, out) layout so forward is x @ W + b
    wqkv = jax.random.normal(ks[0], (dim, 3 * dim), jnp.float32) * 0.05
    bqkv = jax.random.normal(ks[1], (1, 3 * dim), jnp.float32) * 0.02
    wout = jax.random.normal(ks[2], (dim, dim), jnp.float32) * 0.05
    bout = jax.random.normal(ks[3], (1, dim), jnp.float32) * 0.02
    rpb = jax.random.normal(ks[4], ((2 * Wh - 1) * (2 * Ww - 1), heads), jnp.float32) * 0.01
    return {"wqkv": wqkv, "bqkv": bqkv, "wout": wout, "bout": bout, "rpb_table": rpb}


if __name__ == "__main__":
    B, C, H, W = 2, 32, 16, 16
    heads, window, shift = 4, (8, 8), 4

    key = jax.random.PRNGKey(0)
    kx, kp = jax.random.split(key)
    x = jax.random.normal(kx, (B, C, H, W), jnp.float32)
    params = init_params(kp, C, heads, window)

    out = shift_window_attention(x, params, heads=heads,
                                 window_size=window, shift_size=shift)
    out = jax.block_until_ready(out)

    ref = shift_window_attention_ref(x, params, heads=heads,
                                     window_size=window, shift_size=shift)
    assert out.shape == (B, C, H, W)
    # tolerance loosened slightly vs exact math: softmax denominator uses the
    # EUP approximate reciprocal (pl.reciprocal(approx=True))
    assert jnp.allclose(out, ref, atol=5e-3, rtol=5e-3), \
        float(jnp.max(jnp.abs(out - ref)))

    print("KERNEL_OK")
</pallas_src>

<mosaic_0001>
module attributes {stable_mosaic.version = 11 : i64} {
  func.func @_swin_attn_kernel(%arg0: i32, %arg1: i32, %arg2: memref<2x64x32xf32, #tpu.memory_space<vmem>>, %arg3: memref<32x96xf32, #tpu.memory_space<vmem>>, %arg4: memref<1x96xf32, #tpu.memory_space<vmem>>, %arg5: memref<32x32xf32, #tpu.memory_space<vmem>>, %arg6: memref<1x32xf32, #tpu.memory_space<vmem>>, %arg7: memref<4x1x128x128xf32, #tpu.memory_space<vmem>>, %arg8: memref<2x64x32xf32, #tpu.memory_space<vmem>>) attributes {dimension_semantics = [#tpu.dimension_semantics<parallel>, #tpu.dimension_semantics<parallel>], iteration_bounds = array<i64: 2, 2>, scalar_prefetch = 0 : i64, scratch_operands = 0 : i64, tpu.core_type = #tpu.core_type<tc>, window_params = [{transform_indices = @transform_0, window_bounds = array<i64: 2, 64, 32>}, {pipeline_mode = #tpu.pipeline_mode<synchronous>, transform_indices = @transform_1, window_bounds = array<i64: 32, 96>}, {pipeline_mode = #tpu.pipeline_mode<synchronous>, transform_indices = @transform_2, window_bounds = array<i64: 1, 96>}, {pipeline_mode = #tpu.pipeline_mode<synchronous>, transform_indices = @transform_3, window_bounds = array<i64: 32, 32>}, {pipeline_mode = #tpu.pipeline_mode<synchronous>, transform_indices = @transform_4, window_bounds = array<i64: 1, 32>}, {transform_indices = @transform_5, window_bounds = array<i64: 4, 1, 128, 128>}, {transform_indices = @transform_6, window_bounds = array<i64: 2, 64, 32>}]} {
    %c0 = arith.constant 0 : index
    %c0_0 = arith.constant 0 : index
    %c0_1 = arith.constant 0 : index
    %0 = vector.load %arg2[%c0, %c0_0, %c0_1] : memref<2x64x32xf32, #tpu.memory_space<vmem>>, vector<2x64x32xf32>
    %1 = vector.shape_cast %0 : vector<2x64x32xf32> to vector<128x32xf32>
    %c0_2 = arith.constant 0 : index
    %c0_3 = arith.constant 0 : index
    %2 = vector.load %arg3[%c0_2, %c0_3] : memref<32x96xf32, #tpu.memory_space<vmem>>, vector<32x96xf32>
    %cst = arith.constant dense<0.000000e+00> : vector<128x96xf32>
    %3 = tpu.matmul %1, %2, %cst {dimension_numbers = #tpu.dot_dimension_numbers<[1], [0], [0], [1], [0, 0, 1, 1], [], []>} : vector<128x32xf32>, vector<32x96xf32>, vector<128x96xf32> -> vector<128x96xf32>
    %c0_4 = arith.constant 0 : index
    %c0_5 = arith.constant 0 : index
    %4 = vector.load %arg4[%c0_4, %c0_5] : memref<1x96xf32, #tpu.memory_space<vmem>>, vector<1x96xf32>
    %5 = vector.broadcast %4 : vector<1x96xf32> to vector<128x96xf32>
    %6 = arith.addf %3, %5 : vector<128x96xf32>
    %7 = vector.extract_strided_slice %6 {offsets = [0, 0], sizes = [128, 8], strides = [1, 1]} : vector<128x96xf32> to vector<128x8xf32>
    %8 = vector.shape_cast %7 : vector<128x8xf32> to vector<1x128x8xf32>
    %cst_6 = arith.constant 0.353553385 : f32
    %9 = vector.broadcast %cst_6 : f32 to vector<1x128x8xf32>
    %10 = arith.mulf %8, %9 : vector<1x128x8xf32>
    %11 = vector.extract_strided_slice %6 {offsets = [0, 32], sizes = [128, 8], strides = [1, 1]} : vector<128x96xf32> to vector<128x8xf32>
    %12 = vector.shape_cast %11 : vector<128x8xf32> to vector<1x128x8xf32>
    %13 = vector.extract_strided_slice %6 {offsets = [0, 64], sizes = [128, 8], strides = [1, 1]} : vector<128x96xf32> to vector<128x8xf32>
    %14 = vector.shape_cast %13 : vector<128x8xf32> to vector<1x128x8xf32>
    "tpu.trace_start"() <{level = 10 : i32, message = "pmd,pnd->pmn"}> : () -> ()
    %cst_7 = arith.constant dense<0.000000e+00> : vector<1x128x128xf32>
    %15 = tpu.matmul %10, %12, %cst_7 {dimension_numbers = #tpu.dot_dimension_numbers<[2], [2], [1], [1], [0, 0, 0, 1, 1, 1], [0], [0]>} : vector<1x128x8xf32>, vector<1x128x8xf32>, vector<1x128x128xf32> -> vector<1x128x128xf32>
    "tpu.trace_stop"() : () -> ()
    %c0_8 = arith.constant 0 : index
    %c0_9 = arith.constant 0 : index
    %c0_10 = arith.constant 0 : index
    %c0_11 = arith.constant 0 : index
    %16 = vector.load %arg7[%c0_8, %c0_9, %c0_10, %c0_11] : memref<4x1x128x128xf32, #tpu.memory_space<vmem>>, vector<1x1x128x128xf32>
    %17 = vector.shape_cast %16 : vector<1x1x128x128xf32> to vector<1x128x128xf32>
    %18 = arith.addf %15, %17 : vector<1x128x128xf32>
    %cst_12 = arith.constant dense<0xFF800000> : vector<1x128xf32>
    %19 = vector.multi_reduction <maximumf>, %18, %cst_12 [2] : vector<1x128x128xf32> to vector<1x128xf32>
    %20 = vector.shape_cast %19 : vector<1x128xf32> to vector<1x128x1xf32>
    %21 = vector.broadcast %20 : vector<1x128x1xf32> to vector<1x128x128xf32>
    %22 = arith.subf %18, %21 : vector<1x128x128xf32>
    %23 = math.exp %22 : vector<1x128x128xf32>
    %cst_13 = arith.constant dense<0.000000e+00> : vector<1x128xf32>
    %24 = vector.multi_reduction <add>, %23, %cst_13 [2] : vector<1x128x128xf32> to vector<1x128xf32>
    %25 = vector.shape_cast %24 : vector<1x128xf32> to vector<1x128x1xf32>
    %26 = tpu.reciprocal %25 {approx = true} : vector<1x128x1xf32> -> vector<1x128x1xf32>
    %27 = vector.broadcast %26 : vector<1x128x1xf32> to vector<1x128x128xf32>
    %28 = arith.mulf %23, %27 : vector<1x128x128xf32>
    "tpu.trace_start"() <{level = 10 : i32, message = "pmn,pnd->pmd"}> : () -> ()
    %cst_14 = arith.constant dense<0.000000e+00> : vector<1x128x8xf32>
    %29 = tpu.matmul %28, %14, %cst_14 {dimension_numbers = #tpu.dot_dimension_numbers<[2], [1], [1], [2], [0, 0, 0, 1, 1, 2], [0], [0]>} : vector<1x128x128xf32>, vector<1x128x8xf32>, vector<1x128x8xf32> -> vector<1x128x8xf32>
    "tpu.trace_stop"() : () -> ()
    %30 = vector.shape_cast %29 : vector<1x128x8xf32> to vector<128x8xf32>
    %31 = vector.extract_strided_slice %6 {offsets = [0, 8], sizes = [128, 8], strides = [1, 1]} : vector<128x96xf32> to vector<128x8xf32>
    %32 = vector.shape_cast %31 : vector<128x8xf32> to vector<1x128x8xf32>
    %cst_15 = arith.constant 0.353553385 : f32
    %33 = vector.broadcast %cst_15 : f32 to vector<1x128x8xf32>
    %34 = arith.mulf %32, %33 : vector<1x128x8xf32>
    %35 = vector.extract_strided_slice %6 {offsets = [0, 40], sizes = [128, 8], strides = [1, 1]} : vector<128x96xf32> to vector<128x8xf32>
    %36 = vector.shape_cast %35 : vector<128x8xf32> to vector<1x128x8xf32>
    %37 = vector.extract_strided_slice %6 {offsets = [0, 72], sizes = [128, 8], strides = [1, 1]} : vector<128x96xf32> to vector<128x8xf32>
    %38 = vector.shape_cast %37 : vector<128x8xf32> to vector<1x128x8xf32>
    "tpu.trace_start"() <{level = 10 : i32, message = "pmd,pnd->pmn"}> : () -> ()
    %cst_16 = arith.constant dense<0.000000e+00> : vector<1x128x128xf32>
    %39 = tpu.matmul %34, %36, %cst_16 {dimension_numbers = #tpu.dot_dimension_numbers<[2], [2], [1], [1], [0, 0, 0, 1, 1, 1], [0], [0]>} : vector<1x128x8xf32>, vector<1x128x8xf32>, vector<1x128x128xf32> -> vector<1x128x128xf32>
    "tpu.trace_stop"() : () -> ()
    %c1 = arith.constant 1 : index
    %c0_17 = arith.constant 0 : index
    %c0_18 = arith.constant 0 : index
    %c0_19 = arith.constant 0 : index
    %40 = vector.load %arg7[%c1, %c0_17, %c0_18, %c0_19] : memref<4x1x128x128xf32, #tpu.memory_space<vmem>>, vector<1x1x128x128xf32>
    %41 = vector.shape_cast %40 : vector<1x1x128x128xf32> to vector<1x128x128xf32>
    %42 = arith.addf %39, %41 : vector<1x128x128xf32>
    %cst_20 = arith.constant dense<0xFF800000> : vector<1x128xf32>
    %43 = vector.multi_reduction <maximumf>, %42, %cst_20 [2] : vector<1x128x128xf32> to vector<1x128xf32>
    %44 = vector.shape_cast %43 : vector<1x128xf32> to vector<1x128x1xf32>
    %45 = vector.broadcast %44 : vector<1x128x1xf32> to vector<1x128x128xf32>
    %46 = arith.subf %42, %45 : vector<1x128x128xf32>
    %47 = math.exp %46 : vector<1x128x128xf32>
    %cst_21 = arith.constant dense<0.000000e+00> : vector<1x128xf32>
    %48 = vector.multi_reduction <add>, %47, %cst_21 [2] : vector<1x128x128xf32> to vector<1x128xf32>
    %49 = vector.shape_cast %48 : vector<1x128xf32> to vector<1x128x1xf32>
    %50 = tpu.reciprocal %49 {approx = true} : vector<1x128x1xf32> -> vector<1x128x1xf32>
    %51 = vector.broadcast %50 : vector<1x128x1xf32> to vector<1x128x128xf32>
    %52 = arith.mulf %47, %51 : vector<1x128x128xf32>
    "tpu.trace_start"() <{level = 10 : i32, message = "pmn,pnd->pmd"}> : () -> ()
    %cst_22 = arith.constant dense<0.000000e+00> : vector<1x128x8xf32>
    %53 = tpu.matmul %52, %38, %cst_22 {dimension_numbers = #tpu.dot_dimension_numbers<[2], [1], [1], [2], [0, 0, 0, 1, 1, 2], [0], [0]>} : vector<1x128x128xf32>, vector<1x128x8xf32>, vector<1x128x8xf32> -> vector<1x128x8xf32>
    "tpu.trace_stop"() : () -> ()
    %54 = vector.shape_cast %53 : vector<1x128x8xf32> to vector<128x8xf32>
    %55 = vector.extract_strided_slice %6 {offsets = [0, 16], sizes = [128, 8], strides = [1, 1]} : vector<128x96xf32> to vector<128x8xf32>
    %56 = vector.shape_cast %55 : vector<128x8xf32> to vector<1x128x8xf32>
    %cst_23 = arith.constant 0.353553385 : f32
    %57 = vector.broadcast %cst_23 : f32 to vector<1x128x8xf32>
    %58 = arith.mulf %56, %57 : vector<1x128x8xf32>
    %59 = vector.extract_strided_slice %6 {offsets = [0, 48], sizes = [128, 8], strides = [1, 1]} : vector<128x96xf32> to vector<128x8xf32>
    %60 = vector.shape_cast %59 : vector<128x8xf32> to vector<1x128x8xf32>
    %61 = vector.extract_strided_slice %6 {offsets = [0, 80], sizes = [128, 8], strides = [1, 1]} : vector<128x96xf32> to vector<128x8xf32>
    %62 = vector.shape_cast %61 : vector<128x8xf32> to vector<1x128x8xf32>
    "tpu.trace_start"() <{level = 10 : i32, message = "pmd,pnd->pmn"}> : () -> ()
    %cst_24 = arith.constant dense<0.000000e+00> : vector<1x128x128xf32>
    %63 = tpu.matmul %58, %60, %cst_24 {dimension_numbers = #tpu.dot_dimension_numbers<[2], [2], [1], [1], [0, 0, 0, 1, 1, 1], [0], [0]>} : vector<1x128x8xf32>, vector<1x128x8xf32>, vector<1x128x128xf32> -> vector<1x128x128xf32>
    "tpu.trace_stop"() : () -> ()
    %c2 = arith.constant 2 : index
    %c0_25 = arith.constant 0 : index
    %c0_26 = arith.constant 0 : index
    %c0_27 = arith.constant 0 : index
    %64 = vector.load %arg7[%c2, %c0_25, %c0_26, %c0_27] : memref<4x1x128x128xf32, #tpu.memory_space<vmem>>, vector<1x1x128x128xf32>
    %65 = vector.shape_cast %64 : vector<1x1x128x128xf32> to vector<1x128x128xf32>
    %66 = arith.addf %63, %65 : vector<1x128x128xf32>
    %cst_28 = arith.constant dense<0xFF800000> : vector<1x128xf32>
    %67 = vector.multi_reduction <maximumf>, %66, %cst_28 [2] : vector<1x128x128xf32> to vector<1x128xf32>
    %68 = vector.shape_cast %67 : vector<1x128xf32> to vector<1x128x1xf32>
    %69 = vector.broadcast %68 : vector<1x128x1xf32> to vector<1x128x128xf32>
    %70 = arith.subf %66, %69 : vector<1x128x128xf32>
    %71 = math.exp %70 : vector<1x128x128xf32>
    %cst_29 = arith.constant dense<0.000000e+00> : vector<1x128xf32>
    %72 = vector.multi_reduction <add>, %71, %cst_29 [2] : vector<1x128x128xf32> to vector<1x128xf32>
    %73 = vector.shape_cast %72 : vector<1x128xf32> to vector<1x128x1xf32>
    %74 = tpu.reciprocal %73 {approx = true} : vector<1x128x1xf32> -> vector<1x128x1xf32>
    %75 = vector.broadcast %74 : vector<1x128x1xf32> to vector<1x128x128xf32>
    %76 = arith.mulf %71, %75 : vector<1x128x128xf32>
    "tpu.trace_start"() <{level = 10 : i32, message = "pmn,pnd->pmd"}> : () -> ()
    %cst_30 = arith.constant dense<0.000000e+00> : vector<1x128x8xf32>
    %77 = tpu.matmul %76, %62, %cst_30 {dimension_numbers = #tpu.dot_dimension_numbers<[2], [1], [1], [2], [0, 0, 0, 1, 1, 2], [0], [0]>} : vector<1x128x128xf32>, vector<1x128x8xf32>, vector<1x128x8xf32> -> vector<1x128x8xf32>
    "tpu.trace_stop"() : () -> ()
    %78 = vector.shape_cast %77 : vector<1x128x8xf32> to vector<128x8xf32>
    %79 = vector.extract_strided_slice %6 {offsets = [0, 24], sizes = [128, 8], strides = [1, 1]} : vector<128x96xf32> to vector<128x8xf32>
    %80 = vector.shape_cast %79 : vector<128x8xf32> to vector<1x128x8xf32>
    %cst_31 = arith.constant 0.353553385 : f32
    %81 = vector.broadcast %cst_31 : f32 to vector<1x128x8xf32>
    %82 = arith.mulf %80, %81 : vector<1x128x8xf32>
    %83 = vector.extract_strided_slice %6 {offsets = [0, 56], sizes = [128, 8], strides = [1, 1]} : vector<128x96xf32> to vector<128x8xf32>
    %84 = vector.shape_cast %83 : vector<128x8xf32> to vector<1x128x8xf32>
    %85 = vector.extract_strided_slice %6 {offsets = [0, 88], sizes = [128, 8], strides = [1, 1]} : vector<128x96xf32> to vector<128x8xf32>
    %86 = vector.shape_cast %85 : vector<128x8xf32> to vector<1x128x8xf32>
    "tpu.trace_start"() <{level = 10 : i32, message = "pmd,pnd->pmn"}> : () -> ()
    %cst_32 = arith.constant dense<0.000000e+00> : vector<1x128x128xf32>
    %87 = tpu.matmul %82, %84, %cst_32 {dimension_numbers = #tpu.dot_dimension_numbers<[2], [2], [1], [1], [0, 0, 0, 1, 1, 1], [0], [0]>} : vector<1x128x8xf32>, vector<1x128x8xf32>, vector<1x128x128xf32> -> vector<1x128x128xf32>
    "tpu.trace_stop"() : () -> ()
    %c3 = arith.constant 3 : index
    %c0_33 = arith.constant 0 : index
    %c0_34 = arith.constant 0 : index
    %c0_35 = arith.constant 0 : index
    %88 = vector.load %arg7[%c3, %c0_33, %c0_34, %c0_35] : memref<4x1x128x128xf32, #tpu.memory_space<vmem>>, vector<1x1x128x128xf32>
    %89 = vector.shape_cast %88 : vector<1x1x128x128xf32> to vector<1x128x128xf32>
    %90 = arith.addf %87, %89 : vector<1x128x128xf32>
    %cst_36 = arith.constant dense<0xFF800000> : vector<1x128xf32>
    %91 = vector.multi_reduction <maximumf>, %90, %cst_36 [2] : vector<1x128x128xf32> to vector<1x128xf32>
    %92 = vector.shape_cast %91 : vector<1x128xf32> to vector<1x128x1xf32>
    %93 = vector.broadcast %92 : vector<1x128x1xf32> to vector<1x128x128xf32>
    %94 = arith.subf %90, %93 : vector<1x128x128xf32>
    %95 = math.exp %94 : vector<1x128x128xf32>
    %cst_37 = arith.constant dense<0.000000e+00> : vector<1x128xf32>
    %96 = vector.multi_reduction <add>, %95, %cst_37 [2] : vector<1x128x128xf32> to vector<1x128xf32>
    %97 = vector.shape_cast %96 : vector<1x128xf32> to vector<1x128x1xf32>
    %98 = tpu.reciprocal %97 {approx = true} : vector<1x128x1xf32> -> vector<1x128x1xf32>
    %99 = vector.broadcast %98 : vector<1x128x1xf32> to vector<1x128x128xf32>
    %100 = arith.mulf %95, %99 : vector<1x128x128xf32>
    "tpu.trace_start"() <{level = 10 : i32, message = "pmn,pnd->pmd"}> : () -> ()
    %cst_38 = arith.constant dense<0.000000e+00> : vector<1x128x8xf32>
    %101 = tpu.matmul %100, %86, %cst_38 {dimension_numbers = #tpu.dot_dimension_numbers<[2], [1], [1], [2], [0, 0, 0, 1, 1, 2], [0], [0]>} : vector<1x128x128xf32>, vector<1x128x8xf32>, vector<1x128x8xf32> -> vector<1x128x8xf32>
    "tpu.trace_stop"() : () -> ()
    %102 = vector.shape_cast %101 : vector<1x128x8xf32> to vector<128x8xf32>
    %103 = tpu.concatenate %30, %54, %78, %102 in 1 : vector<128x8xf32>, vector<128x8xf32>, vector<128x8xf32>, vector<128x8xf32> -> vector<128x32xf32>
    %c0_39 = arith.constant 0 : index
    %c0_40 = arith.constant 0 : index
    %104 = vector.load %arg5[%c0_39, %c0_40] : memref<32x32xf32, #tpu.memory_space<vmem>>, vector<32x32xf32>
    %cst_41 = arith.constant dense<0.000000e+00> : vector<128x32xf32>
    %105 = tpu.matmul %103, %104, %cst_41 {dimension_numbers = #tpu.dot_dimension_numbers<[1], [0], [0], [1], [0, 0, 1, 1], [], []>} : vector<128x32xf32>, vector<32x32xf32>, vector<128x32xf32> -> vector<128x32xf32>
    %c0_42 = arith.constant 0 : index
    %c0_43 = arith.constant 0 : index
    %106 = vector.load %arg6[%c0_42, %c0_43] : memref<1x32xf32, #tpu.memory_space<vmem>>, vector<1x32xf32>
    %107 = vector.broadcast %106 : vector<1x32xf32> to vector<128x32xf32>
    %108 = arith.addf %105, %107 : vector<128x32xf32>
    %109 = vector.shape_cast %108 : vector<128x32xf32> to vector<2x64x32xf32>
    %c0_44 = arith.constant 0 : index
    %c0_45 = arith.constant 0 : index
    %c0_46 = arith.constant 0 : index
    %110 = vector.load %arg8[%c0_44, %c0_45, %c0_46] : memref<2x64x32xf32, #tpu.memory_space<vmem>>, vector<2x64x32xf32>
    tpu.vector_store %arg8[%c0_44, %c0_45, %c0_46], %109 {strides = array<i32>} : memref<2x64x32xf32, #tpu.memory_space<vmem>>, vector<2x64x32xf32>,
    return
  }
  func.func @transform_0(%arg0: i32, %arg1: i32) -> (i32, i32, i32) {
    %c2_i32 = arith.constant 2 : i32
    %0 = arith.muli %arg0, %c2_i32 : i32
    %1 = arith.addi %0, %arg1 : i32
    %c0_i32 = arith.constant 0 : i32
    %c0_i32_0 = arith.constant 0 : i32
    %c0_i32_1 = arith.constant 0 : i32
    return %1, %c0_i32, %c0_i32_0 : i32, i32, i32
  }
  func.func @transform_1(%arg0: i32, %arg1: i32) -> (i32, i32) {
    %c0_i32 = arith.constant 0 : i32
    %c0_i32_0 = arith.constant 0 : i32
    %c0_i32_1 = arith.constant 0 : i32
    return %c0_i32, %c0_i32_0 : i32, i32
  }
  func.func @transform_2(%arg0: i32, %arg1: i32) -> (i32, i32) {
    %c0_i32 = arith.constant 0 : i32
    %c0_i32_0 = arith.constant 0 : i32
    %c0_i32_1 = arith.constant 0 : i32
    return %c0_i32, %c0_i32_0 : i32, i32
  }
  func.func @transform_3(%arg0: i32, %arg1: i32) -> (i32, i32) {
    %c0_i32 = arith.constant 0 : i32
    %c0_i32_0 = arith.constant 0 : i32
    %c0_i32_1 = arith.constant 0 : i32
    return %c0_i32, %c0_i32_0 : i32, i32
  }
  func.func @transform_4(%arg0: i32, %arg1: i32) -> (i32, i32) {
    %c0_i32 = arith.constant 0 : i32
    %c0_i32_0 = arith.constant 0 : i32
    %c0_i32_1 = arith.constant 0 : i32
    return %c0_i32, %c0_i32_0 : i32, i32
  }
  func.func @transform_5(%arg0: i32, %arg1: i32) -> (i32, i32, i32, i32) {
    %c0_i32 = arith.constant 0 : i32
    %c0_i32_0 = arith.constant 0 : i32
    %c0_i32_1 = arith.constant 0 : i32
    %c0_i32_2 = arith.constant 0 : i32
    return %c0_i32, %arg1, %c0_i32_0, %c0_i32_1 : i32, i32, i32, i32
  }
  func.func @transform_6(%arg0: i32, %arg1: i32) -> (i32, i32, i32) {
    %c2_i32 = arith.constant 2 : i32
    %0 = arith.muli %arg0, %c2_i32 : i32
    %1 = arith.addi %0, %arg1 : i32
    %c0_i32 = arith.constant 0 : i32
    %c0_i32_0 = arith.constant 0 : i32
    %c0_i32_1 = arith.constant 0 : i32
    return %1, %c0_i32, %c0_i32_0 : i32, i32, i32
  }
}

</mosaic_0001>

<bundles_post_ra>
// kernel: tpu_custom_call.1
= control target key start
LH: loop header
LB: loop body
LE: loop exit
PB: predicated region body
PF: predicated region fallthrough
CT: control target
= control target key end

     0   :  { %s8248_s0 = inlined_call_operand.hbm [shape: f32[8,64,32], index: 0, kind: input, shape index: {}]   ;;  %s8249_s1 = inlined_call_operand.hbm [shape: f32[32,96], index: 1, kind: input, shape index: {}]   ;;  %s8250_s2 = inlined_call_operand.hbm [shape: f32[1,96], index: 2, kind: input, shape index: {}]   ;;  %s8251_s3 = inlined_call_operand.hbm [shape: f32[32,32], index: 3, kind: input, shape index: {}]   ;;  %s8252_s4 = inlined_call_operand.hbm [shape: f32[1,32], index: 4, kind: input, shape index: {}]   ;;  %s8253_s5 = inlined_call_operand.hbm [shape: f32[4,2,128,128], index: 5, kind: input, shape index: {}]   ;;  %s8254_s6 = inlined_call_operand.hbm [shape: f32[8,64,32], index: 6, kind: output, shape index: {}]  }
   0x1   :  { %8281 = sst [smem:[#allocation62_spill]] %s8249_s1 }
   0x2   :  { %8282 = sst [smem:[#allocation63_spill]] %s8254_s6 }
   0x3   :  { %11 = vsyncpa [#allocation3], 0 }
   0x4   :  { %13 = vsyncpa [#allocation3 + $0x1], 0 }
   0x5   :  { %14 = vsyncpa [#allocation6], 0 }
   0x6   :  { %15 = vsyncpa [#allocation9], 0 }
   0x7   :  { %16 = vsyncpa [#allocation12], 0 }
   0x8   :  { %18 = vsyncpa [#allocation12 + $0x1], 0 }
   0x9   :  { %19 = vsyncpa [#allocation4], 0 }
   0xa   :  { %21 = vsyncpa [#allocation4 + $0x1], 0  ;;  %s6293_s21 = smov 0   ;;  %s6295_s22 = smov 0  }
   0xb   :  { %s6297_s23 = smov 0   ;;  %s6299_s24 = smov 0  }
   0xc   :  { %s6301_s25 = smov 0   ;;  %s6303_s26 = smov 0  }
   0xd   :  { %s6305_s27 = smov 0   ;;  %s6307_s28 = smov 0  }
   0xe   :  { %s6309_s29 = smov 0   ;;  %s6311_s30 = smov 0  }
   0xf   :  { %s6313_s7 = smov 0  }
  0x10 LB: > { %8283 = sst [smem:[#allocation22_spill]] %s6189_s22  ;;  %s8255_s8 = sadd.s32 4294967295, %s6225_s7   ;;  %s6225_s7 = sphi %s6313_s7, %s27_s7   ;;  %s6221_s30 = sphi %s6311_s30, %s8398_s30   ;;  %s6217_s29 = sphi %s6309_s29, %s8397_s29   ;;  %s6213_s28 = sphi %s6307_s28, %s8388_s28   ;;  %s6209_s27 = sphi %s6305_s27, %s8396_s27   ;;  %s6205_s26 = sphi %s6303_s26, %s8395_s26   ;;  %s6201_s25 = sphi %s6301_s25, %s8394_s25   ;;  %s6197_s24 = sphi %s6299_s24, %s8393_s24   ;;  %s6193_s23 = sphi %s6297_s23, %s8392_s23   ;;  %s6189_s22 = sphi %s6295_s22, %s8391_s22   ;;  %s6185_s21 = sphi %s6293_s21, %s8385_s21  }
  0x11   : > { %8284 = sst [smem:[#allocation23_spill]] %s6197_s24  ;;  %s36_s10 = sadd.s32 1, %s6217_s29 }
  0x12   : > { %8285 = sst [smem:[#allocation24_spill]] %s6209_s27  ;;  %s39_s11 = sadd.s32 1, %s6221_s30 }
  0x13   : > { %8286 = sst [smem:[#allocation25_spill]] %s6213_s28  ;;  %p37_p0 = scmp.ge.s32.totalorder %s36_s10, 2 }
  0x14   : > { %8287 = sst [smem:[#allocation26_spill]] %s6221_s30  ;;  %s3793_s12 = sshll.u32 %s6221_s30, 1 }
  0x15   : > { %s6354_s13 = sadd.s32 %s6217_s29, %s3793_s12  ;;  %s50_s14 = sadd.s32 1, %s6205_s26 }
  0x16   : > { %s8400_s10 = smov (%p37_p0, %s36_s10), 0  ;;  %s8402_s11 = smov (!%p37_p0, %s39_s11), %s6221_s30 }
  0x17   : > { %8288 = sst [smem:[#allocation27_spill]] %s8400_s10  ;;  %p8259_p1 = scmp.ne.s32.totalorder %s6205_s26, %s6201_s25 }
  0x18   : > { %p58_p2 = scmp.eq.s32.totalorder %s6225_s7, 0  ;;  %p41_p3 = scmp.ge.s32.totalorder %s8402_s11, 2 }
  0x19   : > { %p8258_p4 = scmp.ne.s32.totalorder %s6201_s25, %s6197_s24  ;;  %p6376_p6 = scmp.eq.s32.totalorder %s8255_s8, 0 }
  0x1a   : > { %p6370_p5 = por %p58_p2, %p8259_p1  ;;  %s8404_s11 = smov (%p41_p3, %s8402_s11), 0 }
  0x1b   : > { %s8290_s16 = scalar_select %p6376_p6, 1, 0 }
  0x1c   : > { %s8289_s15 = scalar_select %p6370_p5, 1, 0 }
  0x1d   : > { %8291 = sst [smem:[#allocation28_spill]] %s8290_s16  ;;  %p6387_p7 = por %p6376_p6, %p8258_p4 }
  0x1e   : > { %8292 = sst [smem:[#allocation29_spill]] %s8404_s11  ;;  %s157_s18 = ssub.s32 %s6217_s29, %s8400_s10 }
  0x1f   : > { %s8293_s17 = scalar_select %p6387_p7, 1, 0 }
  0x20   : > { %s3794_s19 = sshll.u32 %s8404_s11, 1  ;;  %p158_p8 = scmp.eq.s32.totalorder %s157_s18, 0 }
  0x21   : > { %8294 = sst [smem:[#allocation30_spill]] %s8293_s17  ;;  %s46_s20 = sadd.s32 %s3794_s19, %s8400_s10 }
  0x22   : > { %s160_s12 = sadd.s32 1, %s6193_s23  ;;  %s47_s9 = ssub.s32 %s6354_s13, %s46_s20 }
  0x23   : > { %p167_p9 = scmp.ne.s32.totalorder %s6193_s23, %s6189_s22  ;;  %p48_p10 = scmp.eq.s32.totalorder %s47_s9, 0 }
  0x24   : > { %p173_p11 = scmp.ne.s32.totalorder %s6189_s22, %s6185_s21  ;;  %s8300_s19 = sadd.s32 4294967295, %s6225_s7  }
  0x25   : > { %s6402_s8 = scalar_select %p158_p8, %s6193_s23, %s160_s12  }
  0x26   : > { %s6405_s30 = scalar_select %p48_p10, %s6205_s26, %s50_s14  }
  0x27   : > { %8295 = sst [smem:[#allocation31_spill]] %s6402_s8  ;;  %p6409_p12 = por %p167_p9, %p58_p2 }
  0x28   : > { %8296 = sst [smem:[#allocation32_spill]] %s6405_s30  ;;  %p6415_p13 = por %p173_p11, %p6376_p6 }
  0x29   : > { %s8297_s6 = scalar_select %p6409_p12, 1, 0 }
  0x2a   : > { %s8298_s18 = scalar_select %p6415_p13, 1, 0 }
  0x2b   : > { %p201_p0 = scmp.eq.s32.totalorder %s8300_s19, 3  ;;  %s8301_s20 = sadd.s32 4294967294, %s6225_s7  }
  0x2c   : > { %8299 = sst [smem:[#allocation33_spill]] %s8298_s18  ;;  %p207_p3 = scmp.eq.s32.totalorder %s8301_s20, 3 }
  0x2d   : > { %p3797_p4 = scmp.ge.s32.totalorder %s6225_s7, 1  ;;  %p214_p1 = scmp.lt.s32.totalorder %s6225_s7, 5 }
  0x2e   : > { %p8302_p8 = scmp.ne.s32.totalorder %s6205_s26, %s6201_s25  ;;  %p8305_p2 = scmp.ne.s32.totalorder %s6201_s25, %s6197_s24 }
  0x2f   : > { %p6439_p10 = pnand %p3797_p4, %p214_p1  ;;  %s6227_s12 = smov [#allocation5]  }
  0x30   : > { %p6428_p7 = por %p201_p0, %p8302_p8  ;;  %p6435_p9 = por %p207_p3, %p8305_p2 }
  0x31   : > { %s8308_s14 = scalar_select %p6439_p10, 1, 0 }
  0x32   : > { %s8303_s21 = scalar_select %p6428_p7, 1, 0 }
  0x33   : > { %s8306_s9 = scalar_select %p6435_p9, 1, 0 }
  0x34   : > { %8304 = sst [smem:[#allocation34_spill]] %s8303_s21  ;;  %p5232_p11 = pneg %p6439_p10 }
  0x35   : > { %8307 = sst [smem:[#allocation35_spill]] %s8306_s9  ;;  %s226_s19 = sshll.u32 %s6227_s12, 4  ;;  %s227_s19 = int_to_ptr.vmem [resolvable:$true] %s226_s19 }
  0x36   : > { %p6447_p0 = pnand %p5232_p11, %p6376_p6  ;;  %s6228_s11 = smov [#allocation8]  }
  0x37   : > { %s250_s10 = sshll.u32 %s6228_s11, 4  ;;  %s8310_s1 = sld [smem:[#allocation62_spill]]  ;;  %s6451_s10 = int_to_ptr.vmem [resolvable:$true] %s250_s10 }
  0x38   : > { %p6461_p4 = pneg %p6447_p0 }
  0x3d   : > { %s5951_s9 = scalar_lea.hbm %s8310_s1, 512 }
  0x3e   : > { %p5952_p1 = scmp.ne.s32.totalorder %s8310_s1, %s5951_s9  ;;  %p5958_p2 = scmp.lt.u32.totalorder %s5951_s9, %s8310_s1 }
  0x40   : > { %p5954_p3 = pnand %p6461_p4, %p5952_p1 }
  0x42   : > { %p5955_p8 = pneg %p5954_p3 }
  0x44   : > { %p5960_p11 = pnand %p5958_p2, %p5955_p8 }
  0x46   : > { %5963 = shalt.err (!%p5960_p11)
}
  0x47   : > { %s5964_s30 = scalar_lea.vmem %s227_s19, 512  ;;  %p5972_p6 = scmp.lt.s32.totalorder %s227_s19, %s227_s19 }
  0x48   : > { %p5965_p9 = scmp.ne.s32.totalorder %s227_s19, %s5964_s30  ;;  %p5973_p10 = scmp.lt.s32.totalorder %s5964_s30, %s5964_s30 }
  0x4a   : > { %p5967_p7 = pnand %p5965_p9, %p6461_p4  ;;  %p5974_p12 = por %p5973_p10, %p5972_p6 }
  0x4c   : > { %p5968_p13 = pneg %p5967_p7 }
  0x4e   : > { %p5975_p5 = pnand %p5974_p12, %p5968_p13 }
  0x50   : > { %5978 = shalt.err (!%p5975_p5)
}
  0x51   : > { %s6229_s24 = smov 128   ;;  %s6230_s8 = smov 8  }
  0x52   : > { %5235 = dma.hbm_to_vmem [thread:$0]  (!%p6447_p0), %s8310_s1, 512, %s227_s19, [#allocation6], %s6229_s24, %s6229_s24, %s6230_s8  }
  0x53   : > { %s5979_s28 = scalar_lea.hbm %s8251_s3, 512 }
  0x54   : > { %p5980_p7 = scmp.ne.s32.totalorder %s8251_s3, %s5979_s28  ;;  %p5986_p12 = scmp.lt.u32.totalorder %s5979_s28, %s8251_s3 }
  0x56   : > { %p5982_p6 = pnand %p5980_p7, %p6461_p4 }
  0x58   : > { %p5983_p5 = pneg %p5982_p6 }
  0x5a   : > { %p5988_p13 = pnand %p5986_p12, %p5983_p5 }
  0x5c   : > { %5991 = shalt.err (!%p5988_p13)
}
  0x5d   : > { %s5992_s19 = scalar_lea.vmem %s6451_s10, 512  ;;  %p6000_p3 = scmp.lt.s32.totalorder %s6451_s10, %s6451_s10 }
  0x5e   : > { %p5993_p9 = scmp.ne.s32.totalorder %s6451_s10, %s5992_s19  ;;  %p6001_p8 = scmp.lt.s32.totalorder %s5992_s19, %s5992_s19 }
  0x60   : > { %p5995_p10 = pnand %p5993_p9, %p6461_p4  ;;  %p6002_p2 = por %p6001_p8, %p6000_p3 }
  0x62   : > { %p5996_p1 = pneg %p5995_p10 }
  0x64   : > { %p6003_p11 = pnand %p6002_p2, %p5996_p1 }
  0x66   : > { %6006 = shalt.err (!%p6003_p11)
}
  0x67   : > { %5241 = dma.hbm_to_vmem [thread:$0]  (!%p6447_p0), %s8251_s3, 512, %s6451_s10, [#allocation9], %s6229_s24, %s6229_s24, %s6230_s8  }
  0x68   : > { %s6231_s16 = smov [#allocation7]   ;;  %s6232_s27 = smov [#allocation10]  }
  0x69   : > { %s240_s18 = sshll.u32 %s6231_s16, 4  ;;  %s264_s21 = sshll.u32 %s6232_s27, 4  ;;  %s241_s18 = int_to_ptr.vmem [resolvable:$true] %s240_s18  ;;  %s265_s21 = int_to_ptr.vmem [resolvable:$true] %s264_s21 }
  0x6a   : > { %s6007_s30 = scalar_lea.hbm %s8250_s2, 16 }
  0x6b   : > { %p6008_p7 = scmp.ne.s32.totalorder %s8250_s2, %s6007_s30  ;;  %p6014_p12 = scmp.lt.u32.totalorder %s6007_s30, %s8250_s2 }
  0x6d   : > { %p6010_p6 = pnand %p6008_p7, %p6461_p4 }
  0x6f   : > { %p6011_p5 = pneg %p6010_p6 }
  0x71   : > { %p6016_p13 = pnand %p6014_p12, %p6011_p5 }
  0x73   : > { %6019 = shalt.err (!%p6016_p13)
}
  0x74   : > { %s6020_s10 = scalar_lea.vmem %s241_s18, 16  ;;  %s6027_s24 = scalar_lea.vmem %s241_s18, 32 }
  0x75   : > { %p6021_p9 = scmp.ne.s32.totalorder %s241_s18, %s6020_s10  ;;  %p6028_p3 = scmp.lt.s32.totalorder %s241_s18, %s241_s18 }
  0x76   : > { %p6029_p8 = scmp.lt.s32.totalorder %s6027_s24, %s6020_s10 }
  0x77   : > { %p6023_p10 = pnand %p6021_p9, %p6461_p4 }
  0x78   : > { %p6030_p2 = por %p6029_p8, %p6028_p3 }
  0x79   : > { %p6024_p1 = pneg %p6023_p10 }
  0x7b   : > { %p6031_p11 = pnand %p6030_p2, %p6024_p1 }
  0x7d   : > { %6034 = shalt.err (!%p6031_p11)
}
  0x7e   : > { %5238 = dma.hbm_to_vmem [thread:$0]  (!%p6447_p0), %s8250_s2, 16, %s241_s18, [#allocation6]  }
  0x7f   : > { %s6035_s16 = scalar_lea.hbm %s8252_s4, 16 }
  0x80   : > { %p6036_p7 = scmp.ne.s32.totalorder %s8252_s4, %s6035_s16  ;;  %p6042_p12 = scmp.lt.u32.totalorder %s6035_s16, %s8252_s4 }
  0x82   : > { %p6038_p6 = pnand %p6036_p7, %p6461_p4 }
  0x84   : > { %p6039_p5 = pneg %p6038_p6 }
  0x86   : > { %p6044_p13 = pnand %p6042_p12, %p6039_p5 }
  0x88   : > { %6047 = shalt.err (!%p6044_p13)
}
  0x89   : > { %s6048_s19 = scalar_lea.vmem %s265_s21, 16  ;;  %s6055_s18 = scalar_lea.vmem %s265_s21, 32 }
  0x8a   : > { %p6049_p9 = scmp.ne.s32.totalorder %s265_s21, %s6048_s19  ;;  %p6056_p3 = scmp.lt.s32.totalorder %s265_s21, %s265_s21 }
  0x8b   : > { %p6057_p8 = scmp.lt.s32.totalorder %s6055_s18, %s6048_s19 }
  0x8c   : > { %p6051_p10 = pnand %p6049_p9, %p6461_p4 }
  0x8d   : > { %p6058_p2 = por %p6057_p8, %p6056_p3 }
  0x8e   : > { %p6052_p1 = pneg %p6051_p10 }
  0x90   : > { %p6059_p11 = pnand %p6058_p2, %p6052_p1 }
  0x92   : > { %6062 = shalt.err (!%p6059_p11)
}
  0x93   : > { %5244 = dma.hbm_to_vmem [thread:$0]  (!%p6447_p0), %s8252_s4, 16, %s265_s21, [#allocation9]  }
  0x94   : > { %p3802_p7 = scmp.ge.s32.totalorder %s6225_s7, 4 }
  0x95   : > { %s275_s12 = sand.u32 (!%p3802_p7), 1, %s6205_s26   ;;  %s4039_s24 = sshll.u32 (!%p3802_p7), %s6354_s13, 11 }
  0x96   : > { %271 = sbr.rel (%p3802_p7) target bundleno = 191 (0xbf), region = 32  ;;  %s3803_s1 = sshll.u32 (!%p3802_p7), %s275_s12, 7 }
  0x97   : > { %s6542_s28 = scalar_lea.hbm (!%p3802_p7), %s8248_s0, %s4039_s24  ;;  %s279_s20 = scalar_lea.vmem (!%p3802_p7), [#allocation2], %s3803_s1 }
  0x98   : > { %s289_s21 = sshll.u32 (!%p3802_p7), %s279_s20, 4  ;;  %s6546_s16 = scalar_lea.sflag (!%p3802_p7), [#allocation3], %s275_s12  ;;  %s6544_s21 = int_to_ptr.vmem [resolvable:$true] %s289_s21 }
  0x99   : > { %s6063_s27 = scalar_lea.hbm (!%p3802_p7), %s6542_s28, 2048  ;;  %p8312_p4 = scmp.ne.s32.totalorder (!%p3802_p7), %s8289_s15, 0 }
  0x9a   : > { %p6064_p0 = scmp.ne.s32.totalorder (!%p3802_p7), %s6542_s28, %s6063_s27  ;;  %s6067_s11 = scalar_lea.hbm (!%p3802_p7), %s8248_s0, 8192 }
  0x9b   : > { %p6068_p12 = scmp.lt.u32.totalorder (!%p3802_p7), %s6542_s28, %s8248_s0  ;;  %p6069_p13 = scmp.lt.u32.totalorder (!%p3802_p7), %s6067_s11, %s6063_s27 }
  0x9c   : > { %p6065_p6 = pnand (!%p3802_p7), %p6064_p0, %p8312_p4  ;;  %p6071_p10 = scmp.lt.u32.totalorder (!%p3802_p7), %s6063_s27, %s6542_s28 }
  0x9d   : > { %p6070_p9 = por %p6069_p13, %p6068_p12 }
  0x9e   : > { %p6066_p5 = pneg %p6065_p6 }
  0x9f   : > { %p6072_p1 = por %p6071_p10, %p6070_p9 }
  0xa1   : > { %p6073_p3 = pnand %p6072_p1, %p6066_p5 }
  0xa3   : > { %6076 = shalt.err (!%p6073_p3)
}
  0xa4   : > { %s6077_s18 = scalar_lea.vmem %s6544_s21, 2048  ;;  %s6233_s22 = smov [#allocation2]  }
  0xa5   : > { %p6078_p8 = scmp.ne.s32.totalorder %s6544_s21, %s6077_s18  ;;  %s6081_s10 = sshll.u32 %s6233_s22, 4  ;;  %s6082_s10 = int_to_ptr.vmem [resolvable:$false] %s6081_s10 }
  0xa6   : > { %s6083_s12 = scalar_lea.vmem %s6082_s10, 4096  ;;  %p6084_p7 = scmp.lt.s32.totalorder %s6544_s21, %s6082_s10 }
  0xa7   : > { %p6079_p2 = pnand %p6078_p8, %p8312_p4  ;;  %p6085_p0 = scmp.lt.s32.totalorder %s6083_s12, %s6077_s18 }
  0xa9   : > { %p6080_p11 = pneg %p6079_p2  ;;  %p6086_p6 = por %p6085_p0, %p6084_p7 }
  0xab   : > { %p6087_p12 = pnand %p6086_p6, %p6080_p11 }
  0xad   : > { %6090 = shalt.err (!%p6087_p12)
}
  0xae   : > { %s6234_s24 = smov 128   ;;  %s6235_s1 = smov 8  }
  0xaf   : > { %5211 = dma.hbm_to_vmem [thread:$0]  (%p8312_p4), %s6542_s28, 2048, %s6544_s21, %s6546_s16, %s6234_s24, %s6234_s24, %s6235_s1  }
  0xb0   : > { %s299_s8 = sand.u32 1, %s6193_s23   ;;  %s4040_s17 = sshll.u32 %s6217_s29, 11 }
  0xb1   : > { %s3808_s20 = sshll.u32 %s299_s8, 9  ;;  %s309_s9 = scalar_lea.hbm %s8253_s5, %s4040_s17 }
  0xb2   : > { %p8313_p5 = scmp.ne.s32.totalorder %s8297_s6, 0  ;;  %s303_s15 = scalar_lea.vmem [#allocation11], %s3808_s20 }
  0xb3   : > { %s322_s28 = sshll.u32 %s303_s15, 4  ;;  %s6236_s16 = smov 4096   ;;  %s323_s28 = int_to_ptr.vmem [resolvable:$true] %s322_s28 }
  0xb4   : > { %s5212_s11 = scalar_select %p8313_p5, [#allocation0], [#allocation16] }
  0xb5   : > { %5213 = sst [smem:[#allocation15]] (%p8313_p5), %s6236_s16  ;;  %s6237_s30 = smov 2048  }
  0xb6   : > { %s314_s21 = sld [smem:[%s5212_s11]]   ;;  %s6238_s19 = smov 16  }
  0xb7   : > { %5214 = sst [smem:[#allocation15 + $0x1]] (%p8313_p5), %s6237_s30  ;;  %s6239_s18 = smov 128  }
  0xb8   : > { %5215 = sst [smem:[#allocation15 + $0x2]] (%p8313_p5), %s6238_s19  ;;  %s6240_s10 = smov 8  }
  0xb9   : > { %5216 = sst [smem:[#allocation15 + $0x3]] (%p8313_p5), %s6239_s18  ;;  %s300_s24 = scalar_lea.sflag [#allocation12], %s299_s8 }
  0xba   : > { %5217 = sst [smem:[#allocation15 + $0x4]] (%p8313_p5), %s6239_s18  ;;  %s6241_s1 = smov [#allocation14]  }
  0xbb   : > { %5218 = sst [smem:[#allocation15 + $0x5]] (%p8313_p5), %s6240_s10 }
  0xbc   : > { %s3811_s22 = sshll.u32 %s314_s21, 26 }
  0xbd   : > { %s3812_s12 = sadd.s32 134217728, %s3811_s22 }
  0xbe   : > { %5219 = dma.general (%p8313_p5), %s309_s9, 8192, %s323_s28, %s300_s24, %s6241_s1, [#allocation15], %s3812_s12, 0  }
  0xbf PF: > { %p8314_p4 = scmp.ne.s32.totalorder %s8308_s14, 0 }
  0xc1   : > { %347 = sbr.rel (%p8314_p4) target bundleno = 3736 (0xe98), region = 44 }
  0xc8   : > { %s8315_s17 = sld [smem:[#allocation30_spill]]  ;;  %s6594_s20 = sand.u32 1, %s6201_s25  }
  0xc9   : > { %s3814_s27 = sshll.u32 %s6594_s20, 7  ;;  %s350_s13 = scalar_lea.sflag [#allocation3], %s6594_s20 }
  0xca   : > { %s6600_s11 = scalar_lea.vmem [#allocation2], %s3814_s27 }
  0xce   : > { %p8316_p13 = scmp.ne.s32.totalorder %s8315_s17, 0 }
  0xd0   : > { %6164 = dma.done.wait (%p8316_p13), %s350_s13, 2048  }
  0xd1   : > { %6166 = vsyncadd (%p8316_p13), %s350_s13, 4294965248  ;;  %s8317_s6 = sld [smem:[#allocation28_spill]] }
  0xd7   : > { %p8318_p9 = scmp.ne.s32.totalorder %s8317_s6, 0 }
  0xd9   : > { %6168 = dma.done.wait (%p8318_p9), [#allocation6], 528  }
  0xda   : > { %6170 = vsyncadd (%p8318_p9), [#allocation6], 4294966768 }
  0xdb   : > { %6172 = dma.done.wait (%p8318_p9), [#allocation9], 528  }
  0xdc   : > { %6174 = vsyncadd (%p8318_p9), [#allocation9], 4294966768  ;;  %s8319_s14 = sld [smem:[#allocation22_spill]]  ;;  %s8320_s8 = sld [smem:[#allocation33_spill]] }
  0xe2   : > { %s374_s9 = sand.u32 1, %s8319_s14   ;;  %p8321_p10 = scmp.ne.s32.totalorder %s8320_s8, 0 }
  0xe3   : > { %s3819_s15 = sshll.u32 %s374_s9, 9  ;;  %s375_s28 = scalar_lea.sflag [#allocation12], %s374_s9 }
  0xe4   : > { %s6615_s21 = scalar_lea.vmem [#allocation11], %s3819_s15 }
  0xe5   : > { %6176 = dma.done.wait (%p8321_p10), %s375_s28, 8192  }
  0xe6   : > { %6178 = vsyncadd (%p8321_p10), %s375_s28, 4294959104  ;;  %vm445_vm0 = vcmask 261120   ;;  %v434_v0 = vld [vmem:[#allocation5] sm:$0xff]  ;;  %v435_v1 = vld [vmem:[#allocation5 + $0x8] sm:$0xff]  ;;  %vm719_vm1 = vcmask 64512   ;;  %s6242_s16 = smov 96  }
  0xe7   : > { %v436_v2 = vld [vmem:[#allocation5 + $0x10] sm:$0xff]  ;;  %v4851_v3 = vpack.c.bf16 %v435_v1, %v434_v0  ;;  %v437_v4 = vld [vmem:[#allocation5 + $0x18] sm:$0xff]  ;;  %v418_v5 = vld [vmem:[%s6600_s11] sm:$0xff]  ;;  %s6243_s30 = smov 64   ;;  %s6244_s19 = smov 88   ;;  %vm3371_vm3 = vcmask 130048  }
  0xe8   : > { %v4855_v6 = vpack.c.bf16 %v437_v4, %v436_v2  ;;  %4347 = vmatprep.mubr.msk.f32.mxu0 %vm445_vm0, %v418_v5  ;;  %v419_v7 = vld [vmem:[%s6600_s11 + $0x8] sm:$0xff]  ;;  %v420_v8 = vld [vmem:[%s6600_s11 + $0x10] sm:$0xff]  ;;  %v421_v9 = vld [vmem:[%s6600_s11 + $0x18] sm:$0xff]  ;;  %s6245_s18 = smov 120   ;;  %s6246_s22 = smov 56   ;;  %vm3388_vm4 = vcmask 195584  }
  0xe9   : > { %4852 = vmatprep.subr.bf16.mxu0 %v4851_v3  ;;  %v422_v10 = vld [vmem:[%s6600_s11 + $0x20] sm:$0xff]  ;;  %v423_v11 = vld [vmem:[%s6600_s11 + $0x28] sm:$0xff]  ;;  %v424_v12 = vld [vmem:[%s6600_s11 + $0x30] sm:$0xff]  ;;  %s6247_s10 = smov 80   ;;  %s6248_s12 = smov 112  }
  0xea   : > { %4854 = vmatpush3.bf16.msra.mxu0 %v4851_v3  ;;  %v425_v13 = vld [vmem:[%s6600_s11 + $0x38] sm:$0xff]  ;;  %v426_v14 = vld [vmem:[%s6600_s11 + $0x40] sm:$0xff]  ;;  %v427_v15 = vld [vmem:[%s6600_s11 + $0x48] sm:$0xff]  ;;  %s6249_s24 = smov 48   ;;  %s6250_s1 = smov 72  }
  0xeb   : > { %4856 = vmatprep.subr.bf16.mxu0 %v4855_v6  ;;  %v428_v16 = vld [vmem:[%s6600_s11 + $0x50] sm:$0xff]  ;;  %v429_v17 = vld [vmem:[%s6600_s11 + $0x58] sm:$0xff]  ;;  %v430_v18 = vld [vmem:[%s6600_s11 + $0x60] sm:$0xff]  ;;  %s6251_s17 = smov 104   ;;  %s6252_s13 = smov 40  }
  0xec   : > { %v431_v19 = vld [vmem:[%s6600_s11 + $0x68] sm:$0xff]  ;;  %v432_v20 = vld [vmem:[%s6600_s11 + $0x70] sm:$0xff]  ;;  %v433_v21 = vld [vmem:[%s6600_s11 + $0x78] sm:$0xff]  ;;  %s6253_s11 = smov 8   ;;  %s6254_s6 = smov 16  }
  0xed   : > { %v3821_v22 = vld [vmem:[#allocation7] ss:$0 sm:$0xff]  ;;  %vm6744_vm2 = vmpackc.low %vm719_vm1, %vm719_vm1  ;;  %s6255_s14 = smov 24   ;;  %s8142_s8 = scalar_lea.vmem [#allocation13], %s3814_s27 }
  0xee   : > { %4858 = vmatpush3.bf16.msra.mxu0 %v4855_v6  ;;  %s8376_s27 = sld [smem:[#allocation25_spill]]  ;;  %s8377_s9 = sld [smem:[#allocation24_spill]] }
  0xf1   : > { %4348 = vmatmul.mubr.msk.f32.vlgmr.msra.gmra.mrb[0].mxu0 %vm445_vm0, %v419_v7 }
  0xf2   : > { %4350 = vmatprep.mubr.msk.f32.mxu0 %vm445_vm0, %v420_v8 }
  0xf4   : > { %s4032_s15 = sshll.u32 %s8376_s27, 1 }
  0xf5   : > { %4351 = vmatmul.mubr.msk.f32.gmra.mrb[2].mxu0 %vm445_vm0, %v421_v9  ;;  %s3634_s28 = sadd.s32 %s8377_s9, %s4032_s15 }
  0xf6   : > { %4353 = vmatprep.mubr.msk.f32.mxu0 %vm445_vm0, %v422_v10 }
  0xf9   : > { %4354 = vmatmul.mubr.msk.f32.gmra.mrb[4].mxu0 %vm445_vm0, %v423_v11 }
  0xfa   : > { %4356 = vmatprep.mubr.msk.f32.mxu0 %vm445_vm0, %v424_v12 }
  0xfd   : > { %4357 = vmatmul.mubr.msk.f32.gmra.mrb[6].mxu0 %vm445_vm0, %v425_v13 }
  0xfe   : > { %4359 = vmatprep.mubr.msk.f32.mxu0 %vm445_vm0, %v426_v14 }
 0x101   : > { %4360 = vmatmul.mubr.msk.f32.gmra.mrb[8].mxu0 %vm445_vm0, %v427_v15 }
 0x102   : > { %4362 = vmatprep.mubr.msk.f32.mxu0 %vm445_vm0, %v428_v16 }
 0x105   : > { %4363 = vmatmul.mubr.msk.f32.gmra.mrb[10].mxu0 %vm445_vm0, %v429_v17 }
 0x106   : > { %4365 = vmatprep.mubr.msk.f32.mxu0 %vm445_vm0, %v430_v18 }
 0x109   : > { %4366 = vmatmul.mubr.msk.f32.gmra.mrb[12].mxu0 %vm445_vm0, %v431_v19 }
 0x10a   : > { %4368 = vmatprep.mubr.msk.f32.mxu0 %vm445_vm0, %v432_v20 }
 0x10d   : > { %4369 = vmatmul.mubr.msk.f32.gmra.mrb[14].mxu0 %vm445_vm0, %v433_v21 }
 0x1c4   : > { %v4349_v23 = vpop.f32.mrb[0].mxu0 }
 0x1c5   : > { %v6653_v24 = vadd.f32 %v4349_v23, %v3821_v22  ;;  %v560_v25 = vpop.f32.mrb[1].mxu0 }
 0x1c6   : > { %v561_v26 = vadd.f32 %v3821_v22, %v560_v25 }
 0x1c8   : > { %v6656_v27 = vpack.i.bf16 %v6653_v24, %v561_v26  ;;  %v6658_v28 = vmul.f32 0.35355338, %v561_v26  ;;  %v4352_v29 = vpop.f32.mrb[2].mxu0 }
 0x1c9   : > { %v6660_v30 = vadd.f32 %v4352_v29, %v3821_v22  ;;  %v570_v31 = vpop.f32.mrb[3].mxu0 }
 0x1ca   : > { %5376 = vrot.lane.b32.xlu0 %v6656_v27, %s6242_s16  ;;  %4403 = vmatprep.mubr.msk.f32.mxu1 %vm719_vm1, %v6658_v28  ;;  %v6666_v32 = vadd.f32 %v3821_v22, %v570_v31 }
 0x1cc   : > { %v6670_v33 = vpack.i.bf16 %v6660_v30, %v6666_v32  ;;  %v4355_v34 = vpop.f32.mrb[4].mxu0 }
 0x1cd   : > { %v6672_v35 = vadd.f32 %v4355_v34, %v3821_v22  ;;  %v580_v36 = vpop.f32.mrb[5].mxu0 }
 0x1ce   : > { %5381 = vrot.lane.b32.xlu0 %v6670_v33, %s6242_s16  ;;  %v6676_v37 = vadd.f32 %v3821_v22, %v580_v36 }
 0x1d0   : > { %v4358_v38 = vpop.f32.mrb[6].mxu0  ;;  %v6680_v39 = vpack.i.bf16 %v6672_v35, %v6676_v37 }
 0x1d1   : > { %v6682_v40 = vadd.f32 %v4358_v38, %v3821_v22  ;;  %v590_v41 = vpop.f32.mrb[7].mxu0 }
 0x1d2   : > { %v6684_v42 = vadd.f32 %v3821_v22, %v590_v41  ;;  %5386 = vrot.lane.b32.xlu1 %v6680_v39, %s6242_s16 }
 0x1d4   : > { %v4361_v43 = vpop.f32.mrb[8].mxu0  ;;  %v6690_v44 = vpack.i.bf16 %v6682_v40, %v6684_v42 }
 0x1d5   : > { %v6692_v45 = vadd.f32 %v4361_v43, %v3821_v22  ;;  %v600_v46 = vpop.f32.mrb[9].mxu0 }
 0x1d6   : > { %v6694_v47 = vadd.f32 %v3821_v22, %v600_v46  ;;  %5391 = vrot.lane.b32.xlu1 %v6690_v44, %s6242_s16 }
 0x1d8   : > { %v4364_v48 = vpop.f32.mrb[10].mxu0  ;;  %v6700_v49 = vpack.i.bf16 %v6692_v45, %v6694_v47 }
 0x1d9   : > { %v6702_v50 = vadd.f32 %v4364_v48, %v3821_v22  ;;  %v610_v51 = vpop.f32.mrb[11].mxu0 }
 0x1da   : > { %v6704_v52 = vadd.f32 %v3821_v22, %v610_v51  ;;  %5396 = vrot.lane.b32.xlu0 %v6700_v49, %s6242_s16 }
 0x1dc   : > { %v4367_v53 = vpop.f32.mrb[12].mxu0  ;;  %v6710_v54 = vpack.i.bf16 %v6702_v50, %v6704_v52 }
 0x1dd   : > { %v6712_v55 = vadd.f32 %v4367_v53, %v3821_v22  ;;  %v620_v56 = vpop.f32.mrb[13].mxu0 }
 0x1de   : > { %v6714_v57 = vadd.f32 %v3821_v22, %v620_v56  ;;  %5401 = vrot.lane.b32.xlu1 %v6710_v54, %s6242_s16 }
 0x1e0   : > { %v4370_v58 = vpop.f32.mrb[14].mxu0  ;;  %v6720_v59 = vpack.i.bf16 %v6712_v55, %v6714_v57 }
 0x1e1   : > { %v6722_v60 = vadd.f32 %v4370_v58, %v3821_v22  ;;  %v630_v61 = vpop.f32.mrb[15].mxu0 }
 0x1e2   : > { %v6724_v62 = vadd.f32 %v3821_v22, %v630_v61  ;;  %5406 = vrot.lane.b32.xlu0 %v6720_v59, %s6242_s16 }
 0x1e4   : > { %v6730_v63 = vpack.i.bf16 %v6722_v60, %v6724_v62 }
 0x1e6   : > { %5411 = vrot.lane.b32.xlu1 %v6730_v63, %s6242_s16  ;;  %5421 = vrot.lane.b32.xlu0 %v6670_v33, %s6243_s30  ;;  %s4042_s16 = sshll.u32 %s3634_s28, 11 }
 0x1ea   : > { %5416 = vrot.lane.b32.xlu1 %v6656_v27, %s6243_s30  ;;  %5431 = vrot.lane.b32.xlu0 %v6690_v44, %s6243_s30 }
 0x1ee   : > { %5426 = vrot.lane.b32.xlu1 %v6680_v39, %s6243_s30  ;;  %5441 = vrot.lane.b32.xlu0 %v6710_v54, %s6243_s30 }
 0x1f2   : > { %5436 = vrot.lane.b32.xlu1 %v6700_v49, %s6243_s30 }
 0x1f6   : > { %5446 = vrot.lane.b32.xlu1 %v6720_v59, %s6243_s30 }
 0x1fa   : > { %5451 = vrot.lane.b32.xlu1 %v6730_v63, %s6243_s30  ;;  %s3642_s30 = sshll.u32 %s8142_s8, 4  ;;  %s8180_s30 = int_to_ptr.vmem [resolvable:$true] %s3642_s30 }
 0x23c   : > { %v5377_v0 = vpop.permute.xlu0 %5376 }
 0x23d   : > { %v5379_v1 = vunpack.i.h.bf16 %v5377_v0  ;;  %v5378_v2 = vunpack.i.l.bf16 %v5377_v0 }
 0x23f   : > { %v4859_v4 = vpack.c.bf16 %v5379_v1, %v5378_v2 }
 0x240   : > { %v5382_v5 = vpop.permute.xlu0 %5381 }
 0x241   : > { %4861 = vmatprep.subr.msk.bf16.mxu1 %vm6744_vm2, %v4859_v4  ;;  %v5384_v6 = vunpack.i.h.bf16 %v5382_v5  ;;  %v5383_v7 = vunpack.i.l.bf16 %v5382_v5 }
 0x242   : > { %4864 = vmatpush3.bf16.xpose.msk.msra.mxu1 %vm6744_vm2, %v4859_v4 }
 0x243   : > { %v4865_v8 = vpack.c.bf16 %v5384_v6, %v5383_v7 }
 0x244   : > { %v5387_v9 = vpop.permute.xlu1 %5386 }
 0x245   : > { %4867 = vmatprep.subr.msk.bf16.mxu1 %vm6744_vm2, %v4865_v8  ;;  %v5389_v10 = vunpack.i.h.bf16 %v5387_v9  ;;  %v5388_v11 = vunpack.i.l.bf16 %v5387_v9 }
 0x247   : > { %v4871_v12 = vpack.c.bf16 %v5389_v10, %v5388_v11 }
 0x248   : > { %v5392_v13 = vpop.permute.xlu1 %5391 }
 0x249   : > { %v5394_v14 = vunpack.i.h.bf16 %v5392_v13  ;;  %v5393_v15 = vunpack.i.l.bf16 %v5392_v13 }
 0x24a   : > { %4870 = vmatpush3.bf16.xpose.msk.msra.mxu1 %vm6744_vm2, %v4865_v8 }
 0x24b   : > { %4873 = vmatprep.subr.msk.bf16.mxu1 %vm6744_vm2, %v4871_v12  ;;  %v4877_v17 = vpack.c.bf16 %v5394_v14, %v5393_v15 }
 0x24c   : > { %v5397_v16 = vpop.permute.xlu0 %5396 }
 0x24d   : > { %v5399_v19 = vunpack.i.h.bf16 %v5397_v16  ;;  %v5398_v20 = vunpack.i.l.bf16 %v5397_v16 }
 0x24f   : > { %v4883_v22 = vpack.c.bf16 %v5399_v19, %v5398_v20 }
 0x250   : > { %v5402_v18 = vpop.permute.xlu1 %5401 }
 0x251   : > { %v5404_v26 = vunpack.i.h.bf16 %v5402_v18  ;;  %v5403_v29 = vunpack.i.l.bf16 %v5402_v18 }
 0x252   : > { %4876 = vmatpush3.bf16.xpose.msk.msra.mxu1 %vm6744_vm2, %v4871_v12 }
 0x253   : > { %4879 = vmatprep.subr.msk.bf16.mxu1 %vm6744_vm2, %v4877_v17  ;;  %v4889_v43 = vpack.c.bf16 %v5404_v26, %v5403_v29  ;;  %v6781_v29 = vmul.f32 0.35355338, %v6653_v24  ;;  %v6801_v24 = vmul.f32 0.35355338, %v6672_v35  ;;  %v6821_v35 = vmul.f32 0.35355338, %v6692_v45 }
 0x254   : > { %v5407_v21 = vpop.permute.xlu0 %5406  ;;  %v6841_v45 = vmul.f32 0.35355338, %v6712_v55 }
 0x255   : > { %v5409_v61 = vunpack.i.h.bf16 %v5407_v21  ;;  %v5408_v0 = vunpack.i.l.bf16 %v5407_v21 }
 0x257   : > { %v4895_v6 = vpack.c.bf16 %v5409_v61, %v5408_v0 }
 0x258   : > { %v5412_v23 = vpop.permute.xlu1 %5411  ;;  %v5422_v25 = vpop.permute.xlu0 %5421 }
 0x259   : > { %v5424_v34 = vunpack.i.h.bf16 %v5422_v25  ;;  %v5423_v36 = vunpack.i.l.bf16 %v5422_v25  ;;  %v5414_v11 = vunpack.i.h.bf16 %v5412_v23  ;;  %v5413_v12 = vunpack.i.l.bf16 %v5412_v23 }
 0x25a   : > { %4882 = vmatpush3.bf16.xpose.msk.msra.mxu1 %vm6744_vm2, %v4877_v17 }
 0x25b   : > { %4885 = vmatprep.subr.msk.bf16.mxu1 %vm6744_vm2, %v4883_v22  ;;  %v4911_v56 = vpack.c.bf16 %v5424_v34, %v5423_v36  ;;  %v4901_v17 = vpack.c.bf16 %v5414_v11, %v5413_v12  ;;  %v6791_v34 = vmul.f32 0.35355338, %v6660_v30  ;;  %v6794_v36 = vmul.f32 0.35355338, %v6676_v37  ;;  %v659_v11 = vld [vmem:[%s6615_s21 + $0x20] sm:$0xff]  ;;  %v660_v12 = vld [vmem:[%s6615_s21 + $0x28] sm:$0xff] }
 0x25c   : > { %v5417_v31 = vpop.permute.xlu1 %5416  ;;  %v5432_v58 = vpop.permute.xlu0 %5431  ;;  %v6811_v30 = vmul.f32 0.35355338, %v6682_v40  ;;  %v6814_v37 = vmul.f32 0.35355338, %v6694_v47  ;;  %v6831_v40 = vmul.f32 0.35355338, %v6702_v50 }
 0x25d   : > { %v5419_v38 = vunpack.i.h.bf16 %v5417_v31  ;;  %v5418_v41 = vunpack.i.l.bf16 %v5417_v31  ;;  %v5434_v1 = vunpack.i.h.bf16 %v5432_v58  ;;  %v5433_v2 = vunpack.i.l.bf16 %v5432_v58 }
 0x25e   : > { %v6784_v31 = vmul.f32 0.35355338, %v6666_v32  ;;  %v6804_v32 = vmul.f32 0.35355338, %v6684_v42  ;;  %v6824_v42 = vmul.f32 0.35355338, %v6704_v52 }
 0x25f   : > { %v4907_v46 = vpack.c.bf16 %v5419_v38, %v5418_v41  ;;  %v4919_v9 = vpack.c.bf16 %v5434_v1, %v5433_v2  ;;  %v6834_v47 = vmul.f32 0.35355338, %v6714_v57  ;;  %v6844_v52 = vmul.f32 0.35355338, %v6724_v62  ;;  %v656_v57 = vld [vmem:[%s6615_s21 + $0x8] sm:$0xff]  ;;  %v655_v38 = vld [vmem:[%s6615_s21] sm:$0xff] }
 0x260   : > { %v5427_v48 = vpop.permute.xlu1 %5426  ;;  %v5442_v10 = vpop.permute.xlu0 %5441  ;;  %v6851_v50 = vmul.f32 0.35355338, %v6722_v60 }
 0x261   : > { %v5429_v51 = vunpack.i.h.bf16 %v5427_v48  ;;  %v5428_v53 = vunpack.i.l.bf16 %v5427_v48  ;;  %4908 = vmatprep.subr.bf16.mxu0 %v4907_v46  ;;  %v5444_v13 = vunpack.i.h.bf16 %v5442_v10  ;;  %v5443_v14 = vunpack.i.l.bf16 %v5442_v10 }
 0x262   : > { %4888 = vmatpush3.bf16.xpose.msk.msra.mxu1 %vm6744_vm2, %v4883_v22  ;;  %4910 = vmatpush3.bf16.msra.mxu0 %v4907_v46 }
 0x263   : > { %4912 = vmatprep.subr.bf16.mxu0 %v4911_v56  ;;  %4891 = vmatprep.subr.msk.bf16.mxu1 %vm6744_vm2, %v4889_v43  ;;  %v4915_v4 = vpack.c.bf16 %v5429_v51, %v5428_v53  ;;  %v4927_v20 = vpack.c.bf16 %v5444_v13, %v5443_v14 }
 0x264   : > { %v5437_v5 = vpop.permute.xlu1 %5436 }
 0x265   : > { %v5439_v7 = vunpack.i.h.bf16 %v5437_v5  ;;  %v5438_v8 = vunpack.i.l.bf16 %v5437_v5 }
 0x266   : > { %4914 = vmatpush3.bf16.msra.mxu0 %v4911_v56 }
 0x267   : > { %4916 = vmatprep.subr.bf16.mxu0 %v4915_v4  ;;  %v4923_v15 = vpack.c.bf16 %v5439_v7, %v5438_v8  ;;  %v658_v7 = vld [vmem:[%s6615_s21 + $0x18] sm:$0xff] }
 0x268   : > { %v5447_v16 = vpop.permute.xlu1 %5446 }
 0x269   : > { %v5449_v18 = vunpack.i.h.bf16 %v5447_v16  ;;  %v5448_v19 = vunpack.i.l.bf16 %v5447_v16  ;;  %v662_v16 = vld [vmem:[%s6615_s21 + $0x38] sm:$0xff] }
 0x26a   : > { %4894 = vmatpush3.bf16.xpose.msk.msra.mxu1 %vm6744_vm2, %v4889_v43  ;;  %4918 = vmatpush3.bf16.msra.mxu0 %v4915_v4 }
 0x26b   : > { %4920 = vmatprep.subr.bf16.mxu0 %v4919_v9  ;;  %4897 = vmatprep.subr.msk.bf16.mxu1 %vm6744_vm2, %v4895_v6  ;;  %v4931_v25 = vpack.c.bf16 %v5449_v18, %v5448_v19  ;;  %v663_v19 = vld [vmem:[%s6615_s21 + $0x40] sm:$0xff] }
 0x26c   : > { %v5452_v21 = vpop.permute.xlu1 %5451 }
 0x26d   : > { %v5454_v22 = vunpack.i.h.bf16 %v5452_v21  ;;  %v5453_v23 = vunpack.i.l.bf16 %v5452_v21 }
 0x26e   : > { %4922 = vmatpush3.bf16.msra.mxu0 %v4919_v9  ;;  %v657_v9 = vld [vmem:[%s6615_s21 + $0x10] sm:$0xff] }
 0x26f   : > { %4924 = vmatprep.subr.bf16.mxu0 %v4923_v15  ;;  %v4935_v26 = vpack.c.bf16 %v5454_v22, %v5453_v23  ;;  %v665_v23 = vld [vmem:[%s6615_s21 + $0x50] sm:$0xff] }
 0x272   : > { %4900 = vmatpush3.bf16.xpose.msk.msra.mxu1 %vm6744_vm2, %v4895_v6  ;;  %4926 = vmatpush3.bf16.msra.mxu0 %v4923_v15  ;;  %v661_v15 = vld [vmem:[%s6615_s21 + $0x30] sm:$0xff] }
 0x273   : > { %4928 = vmatprep.subr.bf16.mxu0 %v4927_v20  ;;  %4903 = vmatprep.subr.msk.bf16.mxu1 %vm6744_vm2, %v4901_v17 }
 0x276   : > { %4930 = vmatpush3.bf16.msra.mxu0 %v4927_v20  ;;  %v664_v20 = vld [vmem:[%s6615_s21 + $0x48] sm:$0xff] }
 0x277   : > { %4932 = vmatprep.subr.bf16.mxu0 %v4931_v25 }
 0x27a   : > { %4906 = vmatpush3.bf16.xpose.msk.msra.mxu1 %vm6744_vm2, %v4901_v17  ;;  %4934 = vmatpush3.bf16.msra.mxu0 %v4931_v25  ;;  %v666_v25 = vld [vmem:[%s6615_s21 + $0x58] sm:$0xff] }
 0x27b   : > { %4936 = vmatprep.subr.bf16.mxu0 %v4935_v26 }
 0x27e   : > { %4938 = vmatpush3.bf16.msra.mxu0 %v4935_v26 }
 0x281   : > { %4404 = vmatmul.mubr.msk.f32.vlgmr.msra.gmra.mrb[0].mxu1 %vm719_vm1, %v6781_v29 }
 0x282   : > { %4406 = vmatprep.mubr.msk.f32.mxu1 %vm719_vm1, %v6784_v31 }
 0x285   : > { %4407 = vmatmul.mubr.msk.f32.gmra.mrb[2].mxu1 %vm719_vm1, %v6791_v34 }
 0x286   : > { %4409 = vmatprep.mubr.msk.f32.mxu1 %vm719_vm1, %v6794_v36 }
 0x289   : > { %4410 = vmatmul.mubr.msk.f32.gmra.mrb[4].mxu1 %vm719_vm1, %v6801_v24 }
 0x28a   : > { %4412 = vmatprep.mubr.msk.f32.mxu1 %vm719_vm1, %v6804_v32 }
 0x28d   : > { %4413 = vmatmul.mubr.msk.f32.gmra.mrb[6].mxu1 %vm719_vm1, %v6811_v30 }
 0x28e   : > { %4415 = vmatprep.mubr.msk.f32.mxu1 %vm719_vm1, %v6814_v37 }
 0x291   : > { %4416 = vmatmul.mubr.msk.f32.gmra.mrb[8].mxu1 %vm719_vm1, %v6821_v35 }
 0x292   : > { %4418 = vmatprep.mubr.msk.f32.mxu1 %vm719_vm1, %v6824_v42 }
 0x295   : > { %4419 = vmatmul.mubr.msk.f32.gmra.mrb[10].mxu1 %vm719_vm1, %v6831_v40 }
 0x296   : > { %4421 = vmatprep.mubr.msk.f32.mxu1 %vm719_vm1, %v6834_v47 }
 0x299   : > { %4422 = vmatmul.mubr.msk.f32.gmra.mrb[12].mxu1 %vm719_vm1, %v6841_v45 }
 0x29a   : > { %4424 = vmatprep.mubr.msk.f32.mxu1 %vm719_vm1, %v6844_v52 }
 0x29d   : > { %4425 = vmatmul.mubr.msk.f32.gmra.mrb[14].mxu1 %vm719_vm1, %v6851_v50 }
 0x354   : > { %v4405_v41 = vpop.f32.mrb[0].mxu1 }
 0x355   : > { %v6857_v55 = vadd.f32 %v4405_v41, %v656_v57  ;;  %v866_v43 = vpop.f32.mrb[1].mxu1  ;;  %v668_v41 = vld [vmem:[%s6615_s21 + $0x68] sm:$0xff] }
 0x356   : > { %v6859_v62 = vadd.f32 %v866_v43, %v655_v38  ;;  %v667_v38 = vld [vmem:[%s6615_s21 + $0x60] sm:$0xff] }
 0x357   : > { %947 = vmax.xlane.f32.xlu1 %v6857_v55 }
 0x358   : > { %v4408_v46 = vpop.f32.mrb[2].mxu1  ;;  %945 = vmax.xlane.f32.xlu0 %v6859_v62 }
 0x359   : > { %v876_v48 = vpop.f32.mrb[3].mxu1  ;;  %v6872_v8 = vadd.f32 %v4408_v46, %v658_v7 }
 0x35a   : > { %v6876_v10 = vadd.f32 %v876_v48, %v657_v9  ;;  %v669_v48 = vld [vmem:[%s6615_s21 + $0x70] sm:$0xff] }
 0x35c   : > { %v4411_v51 = vpop.f32.mrb[4].mxu1 }
 0x35d   : > { %v886_v60 = vpop.f32.mrb[5].mxu1  ;;  %v6883_v14 = vadd.f32 %v4411_v51, %v660_v12  ;;  %v670_v51 = vld [vmem:[%s6615_s21 + $0x78] sm:$0xff] }
 0x35e   : > { %v6881_v13 = vadd.f32 %v886_v60, %v659_v11 }
 0x360   : > { %v4414_v53 = vpop.f32.mrb[6].mxu1 }
 0x361   : > { %v896_v56 = vpop.f32.mrb[7].mxu1  ;;  %v6891_v18 = vadd.f32 %v4414_v53, %v662_v16 }
 0x362   : > { %v6889_v17 = vadd.f32 %v896_v56, %v661_v15 }
 0x364   : > { %v4417_v58 = vpop.f32.mrb[8].mxu1 }
 0x365   : > { %v906_v61 = vpop.f32.mrb[9].mxu1  ;;  %v6899_v22 = vadd.f32 %v4417_v58, %v664_v20 }
 0x366   : > { %v6897_v21 = vadd.f32 %v906_v61, %v663_v19 }
 0x368   : > { %5461 = vrot.lane.b32.xlu1 %v6670_v33, %s6244_s19  ;;  %v4420_v0 = vpop.f32.mrb[10].mxu1 }
 0x369   : > { %v916_v1 = vpop.f32.mrb[11].mxu1  ;;  %v6907_v57 = vadd.f32 %v4420_v0, %v666_v25 }
 0x36a   : > { %v6905_v26 = vadd.f32 %v916_v1, %v665_v23 }
 0x36c   : > { %5466 = vrot.lane.b32.xlu1 %v6680_v39, %s6244_s19  ;;  %v4423_v2 = vpop.f32.mrb[12].mxu1 }
 0x36d   : > { %v926_v4 = vpop.f32.mrb[13].mxu1  ;;  %v6915_v46 = vadd.f32 %v4423_v2, %v668_v41 }
 0x36e   : > { %5456 = vrot.lane.b32.xlu0 %v6656_v27, %s6244_s19  ;;  %v6913_v43 = vadd.f32 %v926_v4, %v667_v38 }
 0x370   : > { %5471 = vrot.lane.b32.xlu1 %v6690_v44, %s6244_s19  ;;  %v4426_v5 = vpop.f32.mrb[14].mxu1 }
 0x371   : > { %v936_v6 = vpop.f32.mrb[15].mxu1  ;;  %v6923_v53 = vadd.f32 %v4426_v5, %v670_v51 }
 0x372   : > { %v6921_v60 = vadd.f32 %v936_v6, %v669_v48 }
 0x38d   : > { %951 = vmax.xlane.f32.xlu0 %v6872_v8 }
 0x391   : > { %949 = vmax.xlane.f32.xlu0 %v6876_v10 }
 0x394   : > { %953 = vmax.xlane.f32.xlu1 %v6881_v13 }
 0x395   : > { %955 = vmax.xlane.f32.xlu0 %v6883_v14 }
 0x398   : > { %957 = vmax.xlane.f32.xlu1 %v6889_v17 }
 0x399   : > { %959 = vmax.xlane.f32.xlu0 %v6891_v18 }
 0x39c   : > { %961 = vmax.xlane.f32.xlu1 %v6897_v21 }
 0x39d   : > { %963 = vmax.xlane.f32.xlu0 %v6899_v22 }
 0x3a0   : > { %965 = vmax.xlane.f32.xlu1 %v6905_v26 }
 0x3a1   : > { %967 = vmax.xlane.f32.xlu0 %v6907_v57 }
 0x3a4   : > { %969 = vmax.xlane.f32.xlu1 %v6913_v43 }
 0x3a5   : > { %971 = vmax.xlane.f32.xlu0 %v6915_v46 }
 0x3a8   : > { %973 = vmax.xlane.f32.xlu1 %v6921_v60 }
 0x3a9   : > { %975 = vmax.xlane.f32.xlu0 %v6923_v53 }
 0x3b9   : > { %5481 = vrot.lane.b32.xlu1 %v6710_v54, %s6244_s19 }
 0x3bd   : > { %5486 = vrot.lane.b32.xlu1 %v6720_v59, %s6244_s19 }
 0x3e4   : > { %v948_v56 = vpop.xlane.xlu1 %947 }
 0x3e5   : > { %v978_v58 = vsub.f32 %v6857_v55, %v948_v56  ;;  %v946_v61 = vpop.xlane.xlu0 %945 }
 0x3e6   : > { %v977_v0 = vsub.f32 %v6859_v62, %v946_v61 }
 0x3e7   : > { %v995_v1 = vmul.f32 1.442695, %v978_v58 }
 0x3e8   : > { %v993_v2 = vmul.f32 1.442695, %v977_v0  ;;  %v6946_v55 = vpop.permute.xlu1 %5461 }
 0x3e9   : > { %5695 = vpow2.f32 %v995_v1  ;;  %v5457_v4 = vpop.permute.xlu0 %5456 }
 0x3ea   : > { %5697 = vpow2.f32 %v993_v2  ;;  %v5459_v5 = vunpack.i.h.bf16 %v5457_v4  ;;  %v5458_v6 = vunpack.i.l.bf16 %v5457_v4 }
 0x3ec   : > { %v6933_v7 = vpack.c.bf16 %v5459_v5, %v5458_v6  ;;  %v6948_v62 = vpop.permute.xlu1 %5466 }
 0x3ee   : > { %4941 = vmatprep.subr.msk.bf16.mxu0 %vm6744_vm2, %v6933_v7 }
 0x3f0   : > { %v6951_v16 = vpop.permute.xlu1 %5471 }
 0x3f3   : > { %v6938_v9 = vpop.eup %5695 }
 0x3f4   : > { %v6940_v11 = vpop.eup %5697  ;;  %1027 = vadd.xlane.f32.xlu0 %v6938_v9 }
 0x3f5   : > { %1025 = vadd.xlane.f32.xlu1 %v6940_v11 }
 0x40a   : > { %5476 = vrot.lane.b32.xlu0 %v6700_v49, %s6244_s19 }
 0x41a   : > { %v952_v12 = vpop.xlane.xlu0 %951 }
 0x41b   : > { %v980_v15 = vsub.f32 %v6872_v8, %v952_v12 }
 0x41d   : > { %v999_v19 = vmul.f32 1.442695, %v980_v15 }
 0x41e   : > { %v950_v20 = vpop.xlane.xlu0 %949 }
 0x41f   : > { %5699 = vpow2.f32 %v999_v19  ;;  %v979_v23 = vsub.f32 %v6876_v10, %v950_v20 }
 0x421   : > { %v997_v25 = vmul.f32 1.442695, %v979_v23  ;;  %v954_v38 = vpop.xlane.xlu1 %953 }
 0x422   : > { %v956_v41 = vpop.xlane.xlu0 %955  ;;  %v981_v48 = vsub.f32 %v6881_v13, %v954_v38 }
 0x423   : > { %5701 = vpow2.f32 %v997_v25  ;;  %v982_v51 = vsub.f32 %v6883_v14, %v956_v41 }
 0x424   : > { %v1001_v61 = vmul.f32 1.442695, %v981_v48 }
 0x425   : > { %v1003_v56 = vmul.f32 1.442695, %v982_v51  ;;  %v958_v0 = vpop.xlane.xlu1 %957 }
 0x426   : > { %v960_v58 = vpop.xlane.xlu0 %959  ;;  %v983_v10 = vsub.f32 %v6889_v17, %v958_v0 }
 0x427   : > { %5703 = vpow2.f32 %v1003_v56  ;;  %v984_v8 = vsub.f32 %v6891_v18, %v960_v58 }
 0x428   : > { %5705 = vpow2.f32 %v1001_v61  ;;  %v1005_v14 = vmul.f32 1.442695, %v983_v10 }
 0x429   : > { %v6957_v1 = vpop.eup %5699  ;;  %v1007_v2 = vmul.f32 1.442695, %v984_v8  ;;  %v962_v13 = vpop.xlane.xlu1 %961 }
 0x42a   : > { %1031 = vadd.xlane.f32.xlu1 %v6957_v1  ;;  %v964_v4 = vpop.xlane.xlu0 %963  ;;  %v985_v15 = vsub.f32 %v6897_v21, %v962_v13 }
 0x42b   : > { %5707 = vpow2.f32 %v1007_v2  ;;  %v986_v6 = vsub.f32 %v6899_v22, %v964_v4 }
 0x42c   : > { %5709 = vpow2.f32 %v1005_v14  ;;  %v1009_v23 = vmul.f32 1.442695, %v985_v15 }
 0x42d   : > { %v6961_v5 = vpop.eup %5701  ;;  %v1011_v17 = vmul.f32 1.442695, %v986_v6  ;;  %v966_v19 = vpop.xlane.xlu1 %965 }
 0x42e   : > { %1029 = vadd.xlane.f32.xlu0 %v6961_v5  ;;  %v968_v12 = vpop.xlane.xlu0 %967  ;;  %v987_v25 = vsub.f32 %v6905_v26, %v966_v19 }
 0x42f   : > { %5711 = vpow2.f32 %v1011_v17 }
 0x430   : > { %5713 = vpow2.f32 %v1009_v23  ;;  %v1013_v48 = vmul.f32 1.442695, %v987_v25 }
 0x431   : > { %v6965_v18 = vpop.eup %5703  ;;  %v970_v41 = vpop.xlane.xlu1 %969 }
 0x432   : > { %1035 = vadd.xlane.f32.xlu0 %v6965_v18  ;;  %v6969_v20 = vpop.eup %5705  ;;  %v972_v38 = vpop.xlane.xlu0 %971  ;;  %5715 = vpow2.f32 %v1013_v48  ;;  %v989_v26 = vsub.f32 %v6913_v43, %v970_v41  ;;  %v988_v43 = vsub.f32 %v6907_v57, %v968_v12  ;;  %v5464_v48 = vunpack.i.h.bf16 %v6946_v55 }
 0x433   : > { %v990_v21 = vsub.f32 %v6915_v46, %v972_v38 }
 0x434   : > { %v1017_v8 = vmul.f32 1.442695, %v989_v26  ;;  %v1015_v14 = vmul.f32 1.442695, %v988_v43 }
 0x435   : > { %v6973_v22 = vpop.eup %5707  ;;  %v1019_v56 = vmul.f32 1.442695, %v990_v21  ;;  %v974_v58 = vpop.xlane.xlu1 %973  ;;  %v5463_v21 = vunpack.i.l.bf16 %v6946_v55 }
 0x436   : > { %1033 = vadd.xlane.f32.xlu0 %v6969_v20  ;;  %v6979_v51 = vpop.eup %5709  ;;  %v991_v46 = vsub.f32 %v6921_v60, %v974_v58  ;;  %v976_v13 = vpop.xlane.xlu0 %975 }
 0x437   : > { %5717 = vpow2.f32 %v1019_v56  ;;  %v992_v60 = vsub.f32 %v6923_v53, %v976_v13  ;;  %v4945_v58 = vpack.c.bf16 %v5464_v48, %v5463_v21 }
 0x438   : > { %5719 = vpow2.f32 %v1017_v8  ;;  %v1021_v10 = vmul.f32 1.442695, %v991_v46  ;;  %v5473_v8 = vunpack.i.l.bf16 %v6951_v16 }
 0x439   : > { %v6983_v61 = vpop.eup %5711  ;;  %v1023_v15 = vmul.f32 1.442695, %v992_v60  ;;  %v5482_v53 = vpop.permute.xlu1 %5481 }
 0x43a   : > { %1039 = vadd.xlane.f32.xlu0 %v6973_v22  ;;  %v6987_v0 = vpop.eup %5713  ;;  %5721 = vpow2.f32 %v1021_v10  ;;  %v5484_v13 = vunpack.i.h.bf16 %v5482_v53 }
 0x43b   : > { %5491 = vrot.lane.b32.xlu1 %v6730_v63, %s6244_s19  ;;  %5723 = vpow2.f32 %v1015_v14  ;;  %v5483_v14 = vunpack.i.l.bf16 %v5482_v53 }
 0x43c   : > { %v6990_v2 = vpop.eup %5715  ;;  %5725 = vpow2.f32 %v1023_v15 }
 0x43d   : > { %v5487_v19 = vpop.permute.xlu1 %5486  ;;  %v4969_v60 = vpack.c.bf16 %v5484_v13, %v5483_v14 }
 0x43e   : > { %1037 = vadd.xlane.f32.xlu0 %v6979_v51  ;;  %v5489_v15 = vunpack.i.h.bf16 %v5487_v19 }
 0x441   : > { %v6994_v4 = vpop.eup %5717 }
 0x442   : > { %1043 = vadd.xlane.f32.xlu0 %v6983_v61  ;;  %v6998_v6 = vpop.eup %5719 }
 0x444   : > { %v7001_v17 = vpop.eup %5721 }
 0x445   : > { %v7004_v57 = vpop.eup %5723 }
 0x446   : > { %1041 = vadd.xlane.f32.xlu0 %v6987_v0  ;;  %v7007_v12 = vpop.eup %5725 }
 0x44a   : > { %1045 = vadd.xlane.f32.xlu0 %v6990_v2 }
 0x44e   : > { %1051 = vadd.xlane.f32.xlu0 %v6994_v4 }
 0x452   : > { %1049 = vadd.xlane.f32.xlu0 %v6998_v6 }
 0x456   : > { %1053 = vadd.xlane.f32.xlu0 %v7001_v17 }
 0x45f   : > { %1047 = vadd.xlane.f32.xlu1 %v7004_v57 }
 0x463   : > { %1055 = vadd.xlane.f32.xlu1 %v7007_v12 }
 0x46c   : > { %1299 = vrot.lane.b32.xlu0 %v6658_v28, %s6245_s18 }
 0x470   : > { %1311 = vrot.lane.b32.xlu0 %v6804_v32, %s6245_s18 }
 0x474   : > { %1315 = vrot.lane.b32.xlu0 %v6814_v37, %s6245_s18  ;;  %1301 = vrot.lane.b32.xlu1 %v6781_v29, %s6245_s18 }
 0x478   : > { %1319 = vrot.lane.b32.xlu0 %v6824_v42, %s6245_s18  ;;  %1303 = vrot.lane.b32.xlu1 %v6784_v31, %s6245_s18 }
 0x47c   : > { %1323 = vrot.lane.b32.xlu0 %v6834_v47, %s6245_s18  ;;  %1305 = vrot.lane.b32.xlu1 %v6791_v34, %s6245_s18 }
 0x480   : > { %1327 = vrot.lane.b32.xlu0 %v6844_v52, %s6245_s18  ;;  %1307 = vrot.lane.b32.xlu1 %v6794_v36, %s6245_s18 }
 0x481   : > { %v1028_v23 = vpop.xlane.xlu0 %1027 }
 0x482   : > { %5727 = vrcp.f32 %v1028_v23  ;;  %v1026_v25 = vpop.xlane.xlu1 %1025  ;;  %v5488_v23 = vunpack.i.l.bf16 %v5487_v19 }
 0x483   : > { %5729 = vrcp.f32 %v1026_v25 }
 0x484   : > { %5501 = vrot.lane.b32.xlu0 %v6670_v33, %s6246_s22  ;;  %1309 = vrot.lane.b32.xlu1 %v6801_v24, %s6245_s18 }
 0x485   : > { %v5477_v46 = vpop.permute.xlu0 %5476 }
 0x486   : > { %v5479_v10 = vunpack.i.h.bf16 %v5477_v46  ;;  %v5478_v43 = vunpack.i.l.bf16 %v5477_v46 }
 0x488   : > { %5511 = vrot.lane.b32.xlu0 %v6690_v44, %s6246_s22  ;;  %1313 = vrot.lane.b32.xlu1 %v6811_v30, %s6245_s18 }
 0x48c   : > { %v5728_v38 = vpop.eup %5727  ;;  %5521 = vrot.lane.b32.xlu0 %v6710_v54, %s6246_s22  ;;  %1317 = vrot.lane.b32.xlu1 %v6821_v35, %s6245_s18 }
 0x48d   : > { %v5730_v41 = vpop.eup %5729  ;;  %v1074_v56 = vmul.f32 %v5728_v38, %v6938_v9  ;;  %v5468_v9 = vunpack.i.l.bf16 %v6948_v62  ;;  %v4975_v38 = vpack.c.bf16 %v5489_v15, %v5488_v23 }
 0x48e   : > { %v1073_v26 = vmul.f32 %v5730_v41, %v6940_v11  ;;  %v5469_v11 = vunpack.i.h.bf16 %v6948_v62 }
 0x490   : > { %4459 = vmatprep.mubr.f32.mxu0 %v1073_v26  ;;  %1321 = vrot.lane.b32.xlu1 %v6831_v40, %s6245_s18  ;;  %v4951_v55 = vpack.c.bf16 %v5469_v11, %v5468_v9 }
 0x491   : > { %4460 = vmatmul.mubr.f32.vlgmr.msra.gmra.mrb[16].mxu0 %v1074_v56 }
 0x492   : > { %4944 = vmatpush3.bf16.xpose.msk.msra.mxu0 %vm6744_vm2, %v6933_v7  ;;  %v5474_v7 = vunpack.i.h.bf16 %v6951_v16  ;;  %v4963_v16 = vpack.c.bf16 %v5479_v10, %v5478_v43 }
 0x493   : > { %4947 = vmatprep.subr.msk.bf16.mxu0 %vm6744_vm2, %v4945_v58 }
 0x494   : > { %1325 = vrot.lane.b32.xlu1 %v6841_v45, %s6245_s18  ;;  %v4957_v62 = vpack.c.bf16 %v5474_v7, %v5473_v8 }
 0x498   : > { %1329 = vrot.lane.b32.xlu1 %v6851_v50, %s6245_s18 }
 0x49a   : > { %4950 = vmatpush3.bf16.xpose.msk.msra.mxu0 %vm6744_vm2, %v4945_v58 }
 0x49b   : > { %4953 = vmatprep.subr.msk.bf16.mxu0 %vm6744_vm2, %v4951_v55 }
 0x49c   : > { %5496 = vrot.lane.b32.xlu1 %v6656_v27, %s6246_s22 }
 0x4a0   : > { %5506 = vrot.lane.b32.xlu1 %v6680_v39, %s6246_s22 }
 0x4a2   : > { %4956 = vmatpush3.bf16.xpose.msk.msra.mxu0 %vm6744_vm2, %v4951_v55 }
 0x4a3   : > { %4959 = vmatprep.subr.msk.bf16.mxu0 %vm6744_vm2, %v4957_v62 }
 0x4a4   : > { %5516 = vrot.lane.b32.xlu1 %v6700_v49, %s6246_s22 }
 0x4a8   : > { %5526 = vrot.lane.b32.xlu1 %v6720_v59, %s6246_s22 }
 0x4aa   : > { %4962 = vmatpush3.bf16.xpose.msk.msra.mxu0 %vm6744_vm2, %v4957_v62 }
 0x4ab   : > { %4965 = vmatprep.subr.msk.bf16.mxu0 %vm6744_vm2, %v4963_v16 }
 0x4ac   : > { %5531 = vrot.lane.b32.xlu1 %v6730_v63, %s6246_s22  ;;  %s8379_s22 = sld [smem:[#allocation63_spill]] }
 0x4b2   : > { %4968 = vmatpush3.bf16.xpose.msk.msra.mxu0 %vm6744_vm2, %v4963_v16 }
 0x4b3   : > { %4971 = vmatprep.subr.msk.bf16.mxu0 %vm6744_vm2, %v4969_v60 }
 0x4b7   : > { %v1032_v25 = vpop.xlane.xlu1 %1031 }
 0x4b8   : > { %5731 = vrcp.f32 %v1032_v25 }
 0x4ba   : > { %4974 = vmatpush3.bf16.xpose.msk.msra.mxu0 %vm6744_vm2, %v4969_v60 }
 0x4bb   : > { %4977 = vmatprep.subr.msk.bf16.mxu0 %vm6744_vm2, %v4975_v38  ;;  %v5492_v41 = vpop.permute.xlu1 %5491  ;;  %v1030_v53 = vpop.xlane.xlu0 %1029 }
 0x4bc   : > { %5733 = vrcp.f32 %v1030_v53  ;;  %v5494_v48 = vunpack.i.h.bf16 %v5492_v41  ;;  %v5493_v21 = vunpack.i.l.bf16 %v5492_v41 }
 0x4be   : > { %v4981_v56 = vpack.c.bf16 %v5494_v48, %v5493_v21 }
 0x4bf   : > { %v1036_v26 = vpop.xlane.xlu0 %1035 }
 0x4c0   : > { %5735 = vrcp.f32 %v1036_v26 }
 0x4c2   : > { %4980 = vmatpush3.bf16.xpose.msk.msra.mxu0 %vm6744_vm2, %v4975_v38  ;;  %v5732_v58 = vpop.eup %5731 }
 0x4c3   : > { %4983 = vmatprep.subr.msk.bf16.mxu0 %vm6744_vm2, %v4981_v56  ;;  %v1034_v19 = vpop.xlane.xlu0 %1033  ;;  %v1076_v7 = vmul.f32 %v5732_v58, %v6957_v1 }
 0x4c4   : > { %5737 = vrcp.f32 %v1034_v19 }
 0x4c6   : > { %v5734_v11 = vpop.eup %5733 }
 0x4c7   : > { %v1040_v9 = vpop.xlane.xlu0 %1039  ;;  %v1075_v55 = vmul.f32 %v5734_v11, %v6961_v5 }
 0x4c8   : > { %5739 = vrcp.f32 %v1040_v9 }
 0x4c9   : > { %4462 = vmatprep.mubr.f32.mxu0 %v1075_v55 }
 0x4ca   : > { %4986 = vmatpush3.bf16.xpose.msk.msra.mxu0 %vm6744_vm2, %v4981_v56  ;;  %v5736_v62 = vpop.eup %5735 }
 0x4cb   : > { %4463 = vmatmul.mubr.f32.gmra.mrb[18].mxu0 %v1076_v7  ;;  %v1038_v8 = vpop.xlane.xlu0 %1037  ;;  %v1078_v16 = vmul.f32 %v5736_v62, %v6965_v18 }
 0x4cc   : > { %5741 = vrcp.f32 %v1038_v8 }
 0x4ce   : > { %v5738_v46 = vpop.eup %5737 }
 0x4cf   : > { %v1044_v10 = vpop.xlane.xlu0 %1043  ;;  %v1077_v43 = vmul.f32 %v5738_v46, %v6969_v20 }
 0x4d0   : > { %5743 = vrcp.f32 %v1044_v10 }
 0x4d1   : > { %4465 = vmatprep.mubr.f32.mxu0 %v1077_v43 }
 0x4d2   : > { %4466 = vmatmul.mubr.f32.gmra.mrb[20].mxu0 %v1078_v16  ;;  %v5740_v1 = vpop.eup %5739 }
 0x4d3   : > { %v1042_v5 = vpop.xlane.xlu0 %1041  ;;  %v1080_v15 = vmul.f32 %v5740_v1, %v6973_v22 }
 0x4d4   : > { %5745 = vrcp.f32 %v1042_v5 }
 0x4d6   : > { %v5742_v13 = vpop.eup %5741 }
 0x4d7   : > { %v1046_v14 = vpop.xlane.xlu0 %1045  ;;  %v1079_v60 = vmul.f32 %v5742_v13, %v6979_v51 }
 0x4d8   : > { %5747 = vrcp.f32 %v1046_v14 }
 0x4d9   : > { %4468 = vmatprep.mubr.f32.mxu0 %v1079_v60 }
 0x4da   : > { %4469 = vmatmul.mubr.f32.gmra.mrb[22].mxu0 %v1080_v15  ;;  %v5744_v23 = vpop.eup %5743 }
 0x4db   : > { %v1082_v18 = vmul.f32 %v5744_v23, %v6983_v61  ;;  %v1052_v38 = vpop.xlane.xlu0 %1051 }
 0x4de   : > { %v5746_v25 = vpop.eup %5745 }
 0x4df   : > { %v1081_v20 = vmul.f32 %v5746_v25, %v6987_v0  ;;  %v1050_v48 = vpop.xlane.xlu0 %1049 }
 0x4e0   : > { %5749 = vrcp.f32 %v1050_v48 }
 0x4e1   : > { %4471 = vmatprep.mubr.f32.mxu0 %v1081_v20 }
 0x4e2   : > { %v5748_v41 = vpop.eup %5747  ;;  %4472 = vmatmul.mubr.f32.gmra.mrb[24].mxu0 %v1082_v18 }
 0x4e3   : > { %v1083_v53 = vmul.f32 %v5748_v41, %v6990_v2  ;;  %v1054_v21 = vpop.xlane.xlu0 %1053 }
 0x4e5   : > { %4474 = vmatprep.mubr.f32.mxu0 %v1083_v53 }
 0x4e7   : > { %v1300_v56 = vpop.permute.xlu0 %1299 }
 0x4ea   : > { %v5750_v0 = vpop.eup %5749 }
 0x4eb   : > { %v1085_v2 = vmul.f32 %v5750_v0, %v6998_v6  ;;  %v1312_v55 = vpop.permute.xlu0 %1311 }
 0x4ec   : > { %v1048_v51 = vpop.xlane.xlu1 %1047 }
 0x4ed   : > { %5751 = vrcp.f32 %v1048_v51 }
 0x4ee   : > { %5753 = vrcp.f32 %v1052_v38 }
 0x4ef   : > { %5755 = vrcp.f32 %v1054_v21  ;;  %v1316_v16 = vpop.permute.xlu0 %1315 }
 0x4f0   : > { %v1056_v22 = vpop.xlane.xlu1 %1055 }
 0x4f1   : > { %5757 = vrcp.f32 %v1056_v22 }
 0x4f4   : > { %v1302_v26 = vpop.permute.xlu1 %1301 }
 0x4f7   : > { %v5752_v61 = vpop.eup %5751 }
 0x4f8   : > { %v1304_v19 = vpop.permute.xlu1 %1303  ;;  %v1084_v58 = vmul.f32 %v5752_v61, %v7004_v57  ;;  %v5754_v11 = vpop.eup %5753 }
 0x4f9   : > { %v5756_v9 = vpop.eup %5755  ;;  %v1086_v8 = vmul.f32 %v5754_v11, %v6994_v4  ;;  %v1320_v57 = vpop.permute.xlu0 %1319 }
 0x4fa   : > { %4475 = vmatmul.mubr.f32.gmra.mrb[26].mxu0 %v1084_v58  ;;  %v1087_v46 = vmul.f32 %v5756_v9, %v7001_v17 }
 0x4fb   : > { %4477 = vmatprep.mubr.f32.mxu0 %v1085_v2  ;;  %v5758_v62 = vpop.eup %5757 }
 0x4fc   : > { %v1306_v7 = vpop.permute.xlu1 %1305  ;;  %v1088_v43 = vmul.f32 %v5758_v62, %v7007_v12 }
 0x4fd   : > { %v1324_v17 = vpop.permute.xlu0 %1323 }
 0x4fe   : > { %4478 = vmatmul.mubr.f32.gmra.mrb[28].mxu0 %v1086_v8 }
 0x4ff   : > { %4480 = vmatprep.mubr.f32.mxu0 %v1087_v46 }
 0x500   : > { %v1308_v10 = vpop.permute.xlu1 %1307 }
 0x501   : > { %v1328_v1 = vpop.permute.xlu0 %1327 }
 0x502   : > { %4481 = vmatmul.mubr.f32.gmra.mrb[30].mxu0 %v1088_v43 }
 0x503   : > { %4515 = vmatprep.mubr.msk.f32.mxu0 %vm719_vm1, %v1300_v56 }
 0x504   : > { %v1310_v6 = vpop.permute.xlu1 %1309 }
 0x505   : > { %v5502_v60 = vpop.permute.xlu0 %5501 }
 0x506   : > { %4516 = vmatmul.mubr.msk.f32.vlgmr.msra.gmra.mrb[32].mxu0 %vm719_vm1, %v1302_v26  ;;  %v5504_v23 = vunpack.i.h.bf16 %v5502_v60  ;;  %v5503_v25 = vunpack.i.l.bf16 %v5502_v60 }
 0x507   : > { %4518 = vmatprep.mubr.msk.f32.mxu0 %vm719_vm1, %v1304_v19 }
 0x508   : > { %v1314_v5 = vpop.permute.xlu1 %1313  ;;  %v4991_v51 = vpack.c.bf16 %v5504_v23, %v5503_v25 }
 0x509   : > { %v5512_v21 = vpop.permute.xlu0 %5511 }
 0x50a   : > { %4519 = vmatmul.mubr.msk.f32.gmra.mrb[34].mxu0 %vm719_vm1, %v1306_v7  ;;  %v5514_v22 = vunpack.i.h.bf16 %v5512_v21  ;;  %v5513_v26 = vunpack.i.l.bf16 %v5512_v21 }
 0x50b   : > { %4521 = vmatprep.mubr.msk.f32.mxu0 %vm719_vm1, %v1308_v10 }
 0x50c   : > { %v1318_v4 = vpop.permute.xlu1 %1317  ;;  %v4999_v58 = vpack.c.bf16 %v5514_v22, %v5513_v26 }
 0x50d   : > { %v5522_v11 = vpop.permute.xlu0 %5521 }
 0x50e   : > { %4522 = vmatmul.mubr.msk.f32.gmra.mrb[36].mxu0 %vm719_vm1, %v1310_v6  ;;  %v5524_v9 = vunpack.i.h.bf16 %v5522_v11 }
 0x50f   : > { %4524 = vmatprep.mubr.msk.f32.mxu0 %vm719_vm1, %v1312_v55  ;;  %v5523_v55 = vunpack.i.l.bf16 %v5522_v11 }
 0x510   : > { %v1322_v12 = vpop.permute.xlu1 %1321 }
 0x511   : > { %v5007_v46 = vpack.c.bf16 %v5524_v9, %v5523_v55 }
 0x512   : > { %4525 = vmatmul.mubr.msk.f32.gmra.mrb[38].mxu0 %vm719_vm1, %v1314_v5 }
 0x513   : > { %4527 = vmatprep.mubr.msk.f32.mxu0 %vm719_vm1, %v1316_v16 }
 0x514   : > { %v1326_v13 = vpop.permute.xlu1 %1325 }
 0x516   : > { %4528 = vmatmul.mubr.msk.f32.gmra.mrb[40].mxu0 %vm719_vm1, %v1318_v4 }
 0x517   : > { %4530 = vmatprep.mubr.msk.f32.mxu0 %vm719_vm1, %v1320_v57 }
 0x518   : > { %v1330_v14 = vpop.permute.xlu1 %1329 }
 0x51a   : > { %4531 = vmatmul.mubr.msk.f32.gmra.mrb[42].mxu0 %vm719_vm1, %v1322_v12 }
 0x51b   : > { %4533 = vmatprep.mubr.msk.f32.mxu0 %vm719_vm1, %v1324_v17 }
 0x51c   : > { %v5497_v15 = vpop.permute.xlu1 %5496 }
 0x51d   : > { %v5499_v20 = vunpack.i.h.bf16 %v5497_v15  ;;  %v5498_v18 = vunpack.i.l.bf16 %v5497_v15 }
 0x51e   : > { %4534 = vmatmul.mubr.msk.f32.gmra.mrb[44].mxu0 %vm719_vm1, %v1326_v13 }
 0x51f   : > { %4536 = vmatprep.mubr.msk.f32.mxu0 %vm719_vm1, %v1328_v1  ;;  %v4987_v38 = vpack.c.bf16 %v5499_v20, %v5498_v18 }
 0x520   : > { %v5507_v41 = vpop.permute.xlu1 %5506 }
 0x521   : > { %v5509_v53 = vunpack.i.h.bf16 %v5507_v41  ;;  %v5508_v48 = vunpack.i.l.bf16 %v5507_v41  ;;  %4988 = vmatprep.subr.bf16.mxu1 %v4987_v38 }
 0x522   : > { %4537 = vmatmul.mubr.msk.f32.gmra.mrb[46].mxu0 %vm719_vm1, %v1330_v14  ;;  %4990 = vmatpush3.bf16.msra.mxu1 %v4987_v38 }
 0x523   : > { %4992 = vmatprep.subr.bf16.mxu1 %v4991_v51  ;;  %v4995_v0 = vpack.c.bf16 %v5509_v53, %v5508_v48  ;;  %v3871_v48 = vld [vmem:[%s6615_s21 + $0x88] sm:$0xff] }
 0x524   : > { %v5517_v56 = vpop.permute.xlu1 %5516 }
 0x525   : > { %v5519_v61 = vunpack.i.h.bf16 %v5517_v56  ;;  %v5518_v19 = vunpack.i.l.bf16 %v5517_v56 }
 0x526   : > { %4994 = vmatpush3.bf16.msra.mxu1 %v4991_v51  ;;  %v3870_v51 = vld [vmem:[%s6615_s21 + $0x80] sm:$0xff] }
 0x527   : > { %4996 = vmatprep.subr.bf16.mxu1 %v4995_v0  ;;  %v5003_v7 = vpack.c.bf16 %v5519_v61, %v5518_v19 }
 0x528   : > { %v5527_v2 = vpop.permute.xlu1 %5526 }
 0x529   : > { %v5529_v8 = vunpack.i.h.bf16 %v5527_v2  ;;  %v5528_v62 = vunpack.i.l.bf16 %v5527_v2 }
 0x52a   : > { %4998 = vmatpush3.bf16.msra.mxu1 %v4995_v0 }
 0x52b   : > { %5000 = vmatprep.subr.bf16.mxu1 %v4999_v58  ;;  %v5011_v6 = vpack.c.bf16 %v5529_v8, %v5528_v62 }
 0x52c   : > { %v5532_v10 = vpop.permute.xlu1 %5531 }
 0x52d   : > { %v5534_v43 = vunpack.i.h.bf16 %v5532_v10  ;;  %v5533_v16 = vunpack.i.l.bf16 %v5532_v10 }
 0x52e   : > { %5002 = vmatpush3.bf16.msra.mxu1 %v4999_v58 }
 0x52f   : > { %5004 = vmatprep.subr.bf16.mxu1 %v5003_v7  ;;  %v5015_v57 = vpack.c.bf16 %v5534_v43, %v5533_v16  ;;  %v3873_v16 = vld [vmem:[%s6615_s21 + $0x98] sm:$0xff] }
 0x532   : > { %5006 = vmatpush3.bf16.msra.mxu1 %v5003_v7 }
 0x533   : > { %5008 = vmatprep.subr.bf16.mxu1 %v5007_v46 }
 0x536   : > { %5010 = vmatpush3.bf16.msra.mxu1 %v5007_v46 }
 0x537   : > { %5012 = vmatprep.subr.bf16.mxu1 %v5011_v6 }
 0x53a   : > { %5014 = vmatpush3.bf16.msra.mxu1 %v5011_v6 }
 0x53b   : > { %5016 = vmatprep.subr.bf16.mxu1 %v5015_v57 }
 0x53e   : > { %5018 = vmatpush3.bf16.msra.mxu1 %v5015_v57  ;;  %v3872_v57 = vld [vmem:[%s6615_s21 + $0x90] sm:$0xff] }
 0x564   : > { %v7127_v5 = vpop.f32.mrb[16].mxu0 }
 0x565   : > { %8324 = vst [vmem:[#allocation36_spill] sm:$0xff] %v7127_v5  ;;  %v7129_v4 = vpop.f32.mrb[17].mxu0  ;;  %v3923_v5 = vld [vmem:[%s6615_s21 + $0x128] sm:$0xff] }
 0x566   : > { %8325 = vst [vmem:[#allocation37_spill] sm:$0xff] %v7129_v4 }
 0x59e   : > { %v7131_v17 = vpop.f32.mrb[18].mxu0 }
 0x59f   : > { %8326 = vst [vmem:[#allocation38_spill] sm:$0xff] %v7131_v17  ;;  %v7133_v12 = vpop.f32.mrb[19].mxu0 }
 0x5a0   : > { %8327 = vst [vmem:[#allocation39_spill] sm:$0xff] %v7133_v12 }
 0x5a5   : > { %v7135_v1 = vpop.f32.mrb[20].mxu0 }
 0x5a6   : > { %8328 = vst [vmem:[#allocation40_spill] sm:$0xff] %v7135_v1  ;;  %v7137_v13 = vpop.f32.mrb[21].mxu0  ;;  %v3877_v1 = vld [vmem:[%s6615_s21 + $0xb8] sm:$0xff] }
 0x5a7   : > { %8329 = vst [vmem:[#allocation41_spill] sm:$0xff] %v7137_v13 }
 0x5ad   : > { %v7139_v14 = vpop.f32.mrb[22].mxu0 }
 0x5ae   : > { %8330 = vst [vmem:[#allocation42_spill] sm:$0xff] %v7139_v14  ;;  %v7141_v60 = vpop.f32.mrb[23].mxu0 }
 0x5af   : > { %8331 = vst [vmem:[#allocation43_spill] sm:$0xff] %v7141_v60  ;;  %v3876_v60 = vld [vmem:[%s6615_s21 + $0xb0] sm:$0xff] }
 0x5b5   : > { %v7143_v15 = vpop.f32.mrb[24].mxu0 }
 0x5b6   : > { %8332 = vst [vmem:[#allocation44_spill] sm:$0xff] %v7143_v15  ;;  %v7145_v23 = vpop.f32.mrb[25].mxu0  ;;  %v3922_v15 = vld [vmem:[%s6615_s21 + $0x120] sm:$0xff] }
 0x5b7   : > { %8333 = vst [vmem:[#allocation45_spill] sm:$0xff] %v7145_v23  ;;  %v3920_v23 = vld [vmem:[%s6615_s21 + $0x110] sm:$0xff] }
 0x5cd   : > { %v7147_v25 = vpop.f32.mrb[26].mxu0 }
 0x5ce   : > { %8334 = vst [vmem:[#allocation46_spill] sm:$0xff] %v7147_v25  ;;  %v7149_v20 = vpop.f32.mrb[27].mxu0 }
 0x5cf   : > { %8335 = vst [vmem:[#allocation47_spill] sm:$0xff] %v7149_v20 }
 0x5d1   : > { %v7151_v18 = vpop.f32.mrb[28].mxu0 }
 0x5d2   : > { %8336 = vst [vmem:[#allocation48_spill] sm:$0xff] %v7151_v18  ;;  %v7153_v38 = vpop.f32.mrb[29].mxu0 }
 0x5d3   : > { %8337 = vst [vmem:[#allocation49_spill] sm:$0xff] %v7153_v38 }
 0x5d5   : > { %v7155_v41 = vpop.f32.mrb[30].mxu0 }
 0x5d6   : > { %8338 = vst [vmem:[#allocation50_spill] sm:$0xff] %v7155_v41  ;;  %v7157_v53 = vpop.f32.mrb[31].mxu0 }
 0x5d7   : > { %8339 = vst [vmem:[#allocation51_spill] sm:$0xff] %v7157_v53 }
 0x5d9   : > { %v4517_v21 = vpop.f32.mrb[32].mxu0 }
 0x5da   : > { %v7161_v22 = vadd.f32 %v4517_v21, %v3871_v48  ;;  %v1493_v26 = vpop.f32.mrb[33].mxu0  ;;  %v3875_v21 = vld [vmem:[%s6615_s21 + $0xa8] sm:$0xff] }
 0x5db   : > { %v7163_v0 = vadd.f32 %v3870_v51, %v1493_v26  ;;  %v3874_v51 = vld [vmem:[%s6615_s21 + $0xa0] sm:$0xff] }
 0x5dc   : > { %1574 = vmax.xlane.f32.xlu1 %v7161_v22 }
 0x5dd   : > { %v4520_v56 = vpop.f32.mrb[34].mxu0  ;;  %1572 = vmax.xlane.f32.xlu0 %v7163_v0 }
 0x5de   : > { %v1503_v61 = vpop.f32.mrb[35].mxu0  ;;  %v7176_v6 = vadd.f32 %v4520_v56, %v3873_v16  ;;  %v3878_v16 = vld [vmem:[%s6615_s21 + $0xc0] sm:$0xff] }
 0x5df   : > { %v7180_v48 = vadd.f32 %v3872_v57, %v1503_v61  ;;  %v3879_v57 = vld [vmem:[%s6615_s21 + $0xc8] sm:$0xff] }
 0x5e1   : > { %v4523_v19 = vpop.f32.mrb[36].mxu0 }
 0x5e2   : > { %v1513_v58 = vpop.f32.mrb[37].mxu0  ;;  %v7187_v14 = vadd.f32 %v4523_v19, %v3875_v21  ;;  %v3881_v21 = vld [vmem:[%s6615_s21 + $0xd8] sm:$0xff] }
 0x5e3   : > { %v7185_v26 = vadd.f32 %v3874_v51, %v1513_v58  ;;  %v3880_v51 = vld [vmem:[%s6615_s21 + $0xd0] sm:$0xff] }
 0x5e5   : > { %v4526_v11 = vpop.f32.mrb[38].mxu0 }
 0x5e6   : > { %v1523_v2 = vpop.f32.mrb[39].mxu0  ;;  %v7195_v61 = vadd.f32 %v4526_v11, %v3877_v1  ;;  %v3882_v11 = vld [vmem:[%s6615_s21 + $0xe0] sm:$0xff] }
 0x5e7   : > { %v7193_v56 = vadd.f32 %v3876_v60, %v1523_v2  ;;  %v3883_v2 = vld [vmem:[%s6615_s21 + $0xe8] sm:$0xff] }
 0x5e9   : > { %v4529_v9 = vpop.f32.mrb[40].mxu0 }
 0x5ea   : > { %v1533_v55 = vpop.f32.mrb[41].mxu0  ;;  %v7203_v58 = vadd.f32 %v4529_v9, %v3879_v57  ;;  %v3885_v57 = vld [vmem:[%s6615_s21 + $0xf8] sm:$0xff] }
 0x5eb   : > { %v7201_v19 = vadd.f32 %v3878_v16, %v1533_v55  ;;  %v3884_v16 = vld [vmem:[%s6615_s21 + $0xf0] sm:$0xff] }
 0x5ed   : > { %5541 = vrot.lane.b32.xlu1 %v6670_v33, %s6247_s10  ;;  %v4532_v7 = vpop.f32.mrb[42].mxu0 }
 0x5ee   : > { %v1543_v8 = vpop.f32.mrb[43].mxu0  ;;  %v7211_v60 = vadd.f32 %v4532_v7, %v3881_v21 }
 0x5ef   : > { %v7209_v1 = vadd.f32 %v3880_v51, %v1543_v8 }
 0x5f1   : > { %5546 = vrot.lane.b32.xlu1 %v6680_v39, %s6247_s10  ;;  %v4535_v62 = vpop.f32.mrb[44].mxu0 }
 0x5f2   : > { %v1553_v46 = vpop.f32.mrb[45].mxu0  ;;  %v7219_v9 = vadd.f32 %v4535_v62, %v3883_v2 }
 0x5f3   : > { %5536 = vrot.lane.b32.xlu0 %v6656_v27, %s6247_s10  ;;  %v7217_v55 = vadd.f32 %v3882_v11, %v1553_v46 }
 0x5f5   : > { %5551 = vrot.lane.b32.xlu1 %v6690_v44, %s6247_s10  ;;  %v4538_v10 = vpop.f32.mrb[46].mxu0 }
 0x5f6   : > { %v1563_v43 = vpop.f32.mrb[47].mxu0  ;;  %v7227_v7 = vadd.f32 %v4538_v10, %v3885_v57 }
 0x5f7   : > { %v7225_v8 = vadd.f32 %v3884_v16, %v1563_v43 }
 0x612   : > { %1578 = vmax.xlane.f32.xlu0 %v7176_v6 }
 0x616   : > { %1576 = vmax.xlane.f32.xlu0 %v7180_v48 }
 0x619   : > { %1580 = vmax.xlane.f32.xlu1 %v7185_v26 }
 0x61a   : > { %1582 = vmax.xlane.f32.xlu0 %v7187_v14 }
 0x61d   : > { %1584 = vmax.xlane.f32.xlu1 %v7193_v56 }
 0x61e   : > { %1586 = vmax.xlane.f32.xlu0 %v7195_v61 }
 0x621   : > { %1588 = vmax.xlane.f32.xlu1 %v7201_v19 }
 0x622   : > { %1590 = vmax.xlane.f32.xlu0 %v7203_v58 }
 0x625   : > { %1592 = vmax.xlane.f32.xlu1 %v7209_v1 }
 0x626   : > { %1594 = vmax.xlane.f32.xlu0 %v7211_v60 }
 0x629   : > { %1596 = vmax.xlane.f32.xlu1 %v7217_v55 }
 0x62a   : > { %1598 = vmax.xlane.f32.xlu0 %v7219_v9 }
 0x62d   : > { %1600 = vmax.xlane.f32.xlu1 %v7225_v8 }
 0x62e   : > { %1602 = vmax.xlane.f32.xlu0 %v7227_v7 }
 0x63e   : > { %5561 = vrot.lane.b32.xlu1 %v6710_v54, %s6247_s10 }
 0x642   : > { %5566 = vrot.lane.b32.xlu1 %v6720_v59, %s6247_s10 }
 0x669   : > { %v1575_v62 = vpop.xlane.xlu1 %1574 }
 0x66a   : > { %v1605_v46 = vsub.f32 %v7161_v22, %v1575_v62  ;;  %v1573_v51 = vpop.xlane.xlu0 %1572 }
 0x66b   : > { %v1604_v21 = vsub.f32 %v7163_v0, %v1573_v51 }
 0x66c   : > { %v1622_v43 = vmul.f32 1.442695, %v1605_v46 }
 0x66d   : > { %v1620_v11 = vmul.f32 1.442695, %v1604_v21  ;;  %v7250_v22 = vpop.permute.xlu1 %5541 }
 0x66e   : > { %5759 = vpow2.f32 %v1622_v43  ;;  %v5537_v10 = vpop.permute.xlu0 %5536 }
 0x66f   : > { %5761 = vpow2.f32 %v1620_v11  ;;  %v5539_v2 = vunpack.i.h.bf16 %v5537_v10  ;;  %v5538_v16 = vunpack.i.l.bf16 %v5537_v10 }
 0x671   : > { %v7237_v57 = vpack.c.bf16 %v5539_v2, %v5538_v16  ;;  %v7252_v0 = vpop.permute.xlu1 %5546 }
 0x673   : > { %5021 = vmatprep.subr.msk.bf16.mxu1 %vm6744_vm2, %v7237_v57 }
 0x675   : > { %v7255_v51 = vpop.permute.xlu1 %5551 }
 0x678   : > { %v7242_v13 = vpop.eup %5759 }
 0x679   : > { %v7244_v17 = vpop.eup %5761  ;;  %1654 = vadd.xlane.f32.xlu0 %v7242_v13 }
 0x67a   : > { %1652 = vadd.xlane.f32.xlu1 %v7244_v17 }
 0x68f   : > { %5556 = vrot.lane.b32.xlu0 %v6700_v49, %s6247_s10 }
 0x69f   : > { %v1579_v62 = vpop.xlane.xlu0 %1578 }
 0x6a0   : > { %v1607_v46 = vsub.f32 %v7176_v6, %v1579_v62 }
 0x6a2   : > { %v1626_v21 = vmul.f32 1.442695, %v1607_v46 }
 0x6a3   : > { %v1577_v43 = vpop.xlane.xlu0 %1576 }
 0x6a4   : > { %5763 = vpow2.f32 %v1626_v21  ;;  %v1606_v11 = vsub.f32 %v7180_v48, %v1577_v43 }
 0x6a6   : > { %v1624_v10 = vmul.f32 1.442695, %v1606_v11  ;;  %v1581_v2 = vpop.xlane.xlu1 %1580 }
 0x6a7   : > { %v1583_v16 = vpop.xlane.xlu0 %1582  ;;  %v1608_v41 = vsub.f32 %v7185_v26, %v1581_v2 }
 0x6a8   : > { %5765 = vpow2.f32 %v1624_v10  ;;  %v1609_v12 = vsub.f32 %v7187_v14, %v1583_v16 }
 0x6a9   : > { %v1628_v20 = vmul.f32 1.442695, %v1608_v41 }
 0x6aa   : > { %v1630_v53 = vmul.f32 1.442695, %v1609_v12  ;;  %v1585_v62 = vpop.xlane.xlu1 %1584 }
 0x6ab   : > { %v1587_v38 = vpop.xlane.xlu0 %1586  ;;  %v1610_v48 = vsub.f32 %v7193_v56, %v1585_v62 }
 0x6ac   : > { %5767 = vpow2.f32 %v1630_v53  ;;  %v1611_v6 = vsub.f32 %v7195_v61, %v1587_v38 }
 0x6ad   : > { %5769 = vpow2.f32 %v1628_v20  ;;  %v1632_v12 = vmul.f32 1.442695, %v1610_v48 }
 0x6ae   : > { %v7261_v46 = vpop.eup %5763  ;;  %v1634_v21 = vmul.f32 1.442695, %v1611_v6  ;;  %v1589_v26 = vpop.xlane.xlu1 %1588 }
 0x6af   : > { %1658 = vadd.xlane.f32.xlu1 %v7261_v46  ;;  %v1591_v43 = vpop.xlane.xlu0 %1590  ;;  %v1612_v20 = vsub.f32 %v7201_v19, %v1589_v26 }
 0x6b0   : > { %5771 = vpow2.f32 %v1634_v21  ;;  %v1613_v14 = vsub.f32 %v7203_v58, %v1591_v43 }
 0x6b1   : > { %5773 = vpow2.f32 %v1632_v12  ;;  %v1636_v10 = vmul.f32 1.442695, %v1612_v20 }
 0x6b2   : > { %v7265_v11 = vpop.eup %5765  ;;  %v1638_v53 = vmul.f32 1.442695, %v1613_v14  ;;  %v1593_v56 = vpop.xlane.xlu1 %1592 }
 0x6b3   : > { %1656 = vadd.xlane.f32.xlu0 %v7265_v11  ;;  %v1595_v41 = vpop.xlane.xlu0 %1594  ;;  %v1614_v2 = vsub.f32 %v7209_v1, %v1593_v56 }
 0x6b4   : > { %5775 = vpow2.f32 %v1638_v53 }
 0x6b5   : > { %5777 = vpow2.f32 %v1636_v10  ;;  %v1640_v62 = vmul.f32 1.442695, %v1614_v2 }
 0x6b6   : > { %v7269_v38 = vpop.eup %5767  ;;  %v1597_v6 = vpop.xlane.xlu1 %1596 }
 0x6b7   : > { %1662 = vadd.xlane.f32.xlu0 %v7269_v38  ;;  %v7273_v61 = vpop.eup %5769  ;;  %v1599_v16 = vpop.xlane.xlu0 %1598  ;;  %5779 = vpow2.f32 %v1640_v62  ;;  %v1616_v1 = vsub.f32 %v7217_v55, %v1597_v6  ;;  %v1615_v55 = vsub.f32 %v7211_v60, %v1595_v41 }
 0x6b8   : > { %v1617_v19 = vsub.f32 %v7219_v9, %v1599_v16 }
 0x6b9   : > { %v1644_v12 = vmul.f32 1.442695, %v1616_v1  ;;  %v1642_v2 = vmul.f32 1.442695, %v1615_v55 }
 0x6ba   : > { %v7277_v58 = vpop.eup %5771  ;;  %v1646_v21 = vmul.f32 1.442695, %v1617_v19  ;;  %v1601_v43 = vpop.xlane.xlu1 %1600 }
 0x6bb   : > { %1660 = vadd.xlane.f32.xlu0 %v7273_v61  ;;  %v7283_v48 = vpop.eup %5773  ;;  %v1618_v9 = vsub.f32 %v7225_v8, %v1601_v43  ;;  %v1603_v10 = vpop.xlane.xlu0 %1602 }
 0x6bc   : > { %5781 = vpow2.f32 %v1646_v21  ;;  %v1619_v8 = vsub.f32 %v7227_v7, %v1603_v10 }
 0x6bd   : > { %5783 = vpow2.f32 %v1644_v12  ;;  %v1648_v20 = vmul.f32 1.442695, %v1618_v9  ;;  %v5544_v9 = vunpack.i.h.bf16 %v7250_v22 }
 0x6be   : > { %v7287_v26 = vpop.eup %5775  ;;  %v1650_v6 = vmul.f32 1.442695, %v1619_v8  ;;  %v5562_v7 = vpop.permute.xlu1 %5561  ;;  %v5553_v8 = vunpack.i.l.bf16 %v7255_v51 }
 0x6bf   : > { %1666 = vadd.xlane.f32.xlu0 %v7277_v58  ;;  %v7291_v14 = vpop.eup %5777  ;;  %5785 = vpow2.f32 %v1648_v20  ;;  %v5543_v20 = vunpack.i.l.bf16 %v7250_v22 }
 0x6c0   : > { %5571 = vrot.lane.b32.xlu1 %v6730_v63, %s6247_s10  ;;  %5787 = vpow2.f32 %v1642_v2  ;;  %s8380_s10 = smov %s8379_s22 }
 0x6c1   : > { %v7294_v53 = vpop.eup %5779  ;;  %5789 = vpow2.f32 %v1650_v6  ;;  %v5025_v2 = vpack.c.bf16 %v5544_v9, %v5543_v20 }
 0x6c2   : > { %v5567_v19 = vpop.permute.xlu1 %5566 }
 0x6c3   : > { %1664 = vadd.xlane.f32.xlu0 %v7283_v48  ;;  %v5569_v20 = vunpack.i.h.bf16 %v5567_v19 }
 0x6c6   : > { %v7298_v56 = vpop.eup %5781 }
 0x6c7   : > { %1670 = vadd.xlane.f32.xlu0 %v7287_v26  ;;  %v7302_v16 = vpop.eup %5783 }
 0x6c9   : > { %v7305_v62 = vpop.eup %5785 }
 0x6ca   : > { %v7308_v60 = vpop.eup %5787 }
 0x6cb   : > { %1668 = vadd.xlane.f32.xlu0 %v7291_v14  ;;  %v7311_v41 = vpop.eup %5789 }
 0x6cf   : > { %1672 = vadd.xlane.f32.xlu0 %v7294_v53 }
 0x6d3   : > { %1678 = vadd.xlane.f32.xlu0 %v7298_v56 }
 0x6d7   : > { %1676 = vadd.xlane.f32.xlu0 %v7302_v16 }
 0x6db   : > { %1680 = vadd.xlane.f32.xlu0 %v7305_v62 }
 0x6e4   : > { %1674 = vadd.xlane.f32.xlu1 %v7308_v60 }
 0x6e8   : > { %1682 = vadd.xlane.f32.xlu1 %v7311_v41 }
 0x6f1   : > { %1926 = vrot.lane.b32.xlu0 %v6658_v28, %s6248_s12 }
 0x6f5   : > { %1938 = vrot.lane.b32.xlu0 %v6804_v32, %s6248_s12 }
 0x6f9   : > { %1942 = vrot.lane.b32.xlu0 %v6814_v37, %s6248_s12  ;;  %1928 = vrot.lane.b32.xlu1 %v6781_v29, %s6248_s12 }
 0x6fd   : > { %1946 = vrot.lane.b32.xlu0 %v6824_v42, %s6248_s12  ;;  %1930 = vrot.lane.b32.xlu1 %v6784_v31, %s6248_s12 }
 0x701   : > { %1950 = vrot.lane.b32.xlu0 %v6834_v47, %s6248_s12  ;;  %1932 = vrot.lane.b32.xlu1 %v6791_v34, %s6248_s12 }
 0x705   : > { %1954 = vrot.lane.b32.xlu0 %v6844_v52, %s6248_s12  ;;  %1934 = vrot.lane.b32.xlu1 %v6794_v36, %s6248_s12 }
 0x706   : > { %v1655_v1 = vpop.xlane.xlu0 %1654 }
 0x707   : > { %5791 = vrcp.f32 %v1655_v1  ;;  %v1653_v21 = vpop.xlane.xlu1 %1652 }
 0x708   : > { %5793 = vrcp.f32 %v1653_v21 }
 0x709   : > { %5581 = vrot.lane.b32.xlu0 %v6670_v33, %s6249_s24  ;;  %1936 = vrot.lane.b32.xlu1 %v6801_v24, %s6248_s12 }
 0x70a   : > { %v5557_v6 = vpop.permute.xlu0 %5556 }
 0x70b   : > { %v5559_v1 = vunpack.i.h.bf16 %v5557_v6  ;;  %v5558_v21 = vunpack.i.l.bf16 %v5557_v6 }
 0x70d   : > { %5591 = vrot.lane.b32.xlu0 %v6690_v44, %s6249_s24  ;;  %1940 = vrot.lane.b32.xlu1 %v6811_v30, %s6248_s12 }
 0x711   : > { %v5792_v43 = vpop.eup %5791  ;;  %5601 = vrot.lane.b32.xlu0 %v6710_v54, %s6249_s24  ;;  %1944 = vrot.lane.b32.xlu1 %v6821_v35, %s6248_s12 }
 0x712   : > { %v5794_v12 = vpop.eup %5793  ;;  %v1701_v10 = vmul.f32 %v5792_v43, %v7242_v13  ;;  %v5548_v13 = vunpack.i.l.bf16 %v7252_v0  ;;  %v5564_v43 = vunpack.i.h.bf16 %v5562_v7 }
 0x713   : > { %v1700_v55 = vmul.f32 %v5794_v12, %v7244_v17  ;;  %v5549_v17 = vunpack.i.h.bf16 %v7252_v0  ;;  %v5563_v12 = vunpack.i.l.bf16 %v5562_v7 }
 0x715   : > { %4571 = vmatprep.mubr.f32.mxu1 %v1700_v55  ;;  %1948 = vrot.lane.b32.xlu1 %v6831_v40, %s6248_s12  ;;  %v5031_v22 = vpack.c.bf16 %v5549_v17, %v5548_v13  ;;  %v5049_v9 = vpack.c.bf16 %v5564_v43, %v5563_v12  ;;  %v5568_v55 = vunpack.i.l.bf16 %v5567_v19 }
 0x716   : > { %4572 = vmatmul.mubr.f32.vlgmr.msra.gmra.mrb[16].mxu1 %v1701_v10 }
 0x717   : > { %5024 = vmatpush3.bf16.xpose.msk.msra.mxu1 %vm6744_vm2, %v7237_v57  ;;  %v5554_v57 = vunpack.i.h.bf16 %v7255_v51  ;;  %v5043_v51 = vpack.c.bf16 %v5559_v1, %v5558_v21 }
 0x718   : > { %5027 = vmatprep.subr.msk.bf16.mxu1 %vm6744_vm2, %v5025_v2 }
 0x719   : > { %1952 = vrot.lane.b32.xlu1 %v6841_v45, %s6248_s12  ;;  %v5037_v0 = vpack.c.bf16 %v5554_v57, %v5553_v8 }
 0x71d   : > { %1956 = vrot.lane.b32.xlu1 %v6851_v50, %s6248_s12  ;;  %s8178_s12 = scalar_lea.hbm %s8379_s22, %s4042_s16 }
 0x71f   : > { %5030 = vmatpush3.bf16.xpose.msk.msra.mxu1 %vm6744_vm2, %v5025_v2  ;;  %v5055_v2 = vpack.c.bf16 %v5569_v20, %v5568_v55 }
 0x720   : > { %5033 = vmatprep.subr.msk.bf16.mxu1 %vm6744_vm2, %v5031_v22 }
 0x721   : > { %5576 = vrot.lane.b32.xlu1 %v6656_v27, %s6249_s24 }
 0x725   : > { %5586 = vrot.lane.b32.xlu1 %v6680_v39, %s6249_s24 }
 0x727   : > { %5036 = vmatpush3.bf16.xpose.msk.msra.mxu1 %vm6744_vm2, %v5031_v22 }
 0x728   : > { %5039 = vmatprep.subr.msk.bf16.mxu1 %vm6744_vm2, %v5037_v0 }
 0x729   : > { %5596 = vrot.lane.b32.xlu1 %v6700_v49, %s6249_s24 }
 0x72d   : > { %5606 = vrot.lane.b32.xlu1 %v6720_v59, %s6249_s24 }
 0x72f   : > { %5042 = vmatpush3.bf16.xpose.msk.msra.mxu1 %vm6744_vm2, %v5037_v0 }
 0x730   : > { %5045 = vmatprep.subr.msk.bf16.mxu1 %vm6744_vm2, %v5043_v51 }
 0x731   : > { %5611 = vrot.lane.b32.xlu1 %v6730_v63, %s6249_s24  ;;  %s3626_s24 = scalar_lea.sflag [#allocation4], %s6594_s20 }
 0x737   : > { %5048 = vmatpush3.bf16.xpose.msk.msra.mxu1 %vm6744_vm2, %v5043_v51 }
 0x738   : > { %5051 = vmatprep.subr.msk.bf16.mxu1 %vm6744_vm2, %v5049_v9 }
 0x73c   : > { %v1659_v10 = vpop.xlane.xlu1 %1658 }
 0x73d   : > { %5795 = vrcp.f32 %v1659_v10 }
 0x73f   : > { %5054 = vmatpush3.bf16.xpose.msk.msra.mxu1 %vm6744_vm2, %v5049_v9 }
 0x740   : > { %5057 = vmatprep.subr.msk.bf16.mxu1 %vm6744_vm2, %v5055_v2  ;;  %v5572_v17 = vpop.permute.xlu1 %5571  ;;  %v1657_v7 = vpop.xlane.xlu0 %1656 }
 0x741   : > { %5797 = vrcp.f32 %v1657_v7  ;;  %v5574_v13 = vunpack.i.h.bf16 %v5572_v17  ;;  %v5573_v22 = vunpack.i.l.bf16 %v5572_v17 }
 0x743   : > { %v5061_v8 = vpack.c.bf16 %v5574_v13, %v5573_v22 }
 0x744   : > { %v1663_v57 = vpop.xlane.xlu0 %1662 }
 0x745   : > { %5799 = vrcp.f32 %v1663_v57 }
 0x747   : > { %5060 = vmatpush3.bf16.xpose.msk.msra.mxu1 %vm6744_vm2, %v5055_v2  ;;  %v5796_v0 = vpop.eup %5795 }
 0x748   : > { %5063 = vmatprep.subr.msk.bf16.mxu1 %vm6744_vm2, %v5061_v8  ;;  %v1661_v19 = vpop.xlane.xlu0 %1660  ;;  %v1703_v51 = vmul.f32 %v5796_v0, %v7261_v46 }
 0x749   : > { %5801 = vrcp.f32 %v1661_v19 }
 0x74b   : > { %v5798_v6 = vpop.eup %5797 }
 0x74c   : > { %v1667_v1 = vpop.xlane.xlu0 %1666  ;;  %v1702_v21 = vmul.f32 %v5798_v6, %v7265_v11 }
 0x74d   : > { %5803 = vrcp.f32 %v1667_v1 }
 0x74e   : > { %4574 = vmatprep.mubr.f32.mxu1 %v1702_v21 }
 0x74f   : > { %5066 = vmatpush3.bf16.xpose.msk.msra.mxu1 %vm6744_vm2, %v5061_v8  ;;  %v5800_v12 = vpop.eup %5799 }
 0x750   : > { %4575 = vmatmul.mubr.f32.gmra.mrb[18].mxu1 %v1703_v51  ;;  %v1665_v43 = vpop.xlane.xlu0 %1664  ;;  %v1705_v10 = vmul.f32 %v5800_v12, %v7269_v38 }
 0x751   : > { %5805 = vrcp.f32 %v1665_v43 }
 0x753   : > { %v5802_v9 = vpop.eup %5801 }
 0x754   : > { %v1671_v20 = vpop.xlane.xlu0 %1670  ;;  %v1704_v55 = vmul.f32 %v5802_v9, %v7273_v61 }
 0x755   : > { %5807 = vrcp.f32 %v1671_v20 }
 0x756   : > { %4577 = vmatprep.mubr.f32.mxu1 %v1704_v55 }
 0x757   : > { %4578 = vmatmul.mubr.f32.gmra.mrb[20].mxu1 %v1705_v10  ;;  %v5804_v46 = vpop.eup %5803 }
 0x758   : > { %v1669_v11 = vpop.xlane.xlu0 %1668  ;;  %v1707_v13 = vmul.f32 %v5804_v46, %v7277_v58 }
 0x759   : > { %5809 = vrcp.f32 %v1669_v11 }
 0x75b   : > { %v5806_v2 = vpop.eup %5805 }
 0x75c   : > { %v1673_v17 = vpop.xlane.xlu0 %1672  ;;  %v1706_v7 = vmul.f32 %v5806_v2, %v7283_v48 }
 0x75d   : > { %5811 = vrcp.f32 %v1673_v17 }
 0x75e   : > { %4580 = vmatprep.mubr.f32.mxu1 %v1706_v7 }
 0x75f   : > { %4581 = vmatmul.mubr.f32.gmra.mrb[22].mxu1 %v1707_v13  ;;  %v5808_v22 = vpop.eup %5807 }
 0x760   : > { %v1709_v38 = vmul.f32 %v5808_v22, %v7287_v26  ;;  %v1679_v8 = vpop.xlane.xlu0 %1678 }
 0x763   : > { %v5810_v57 = vpop.eup %5809 }
 0x764   : > { %v1708_v61 = vmul.f32 %v5810_v57, %v7291_v14  ;;  %v1677_v6 = vpop.xlane.xlu0 %1676 }
 0x765   : > { %5813 = vrcp.f32 %v1677_v6 }
 0x766   : > { %4583 = vmatprep.mubr.f32.mxu1 %v1708_v61 }
 0x767   : > { %v5812_v19 = vpop.eup %5811  ;;  %4584 = vmatmul.mubr.f32.gmra.mrb[24].mxu1 %v1709_v38 }
 0x768   : > { %v1710_v0 = vmul.f32 %v5812_v19, %v7294_v53  ;;  %v1681_v1 = vpop.xlane.xlu0 %1680 }
 0x76a   : > { %4586 = vmatprep.mubr.f32.mxu1 %v1710_v0 }
 0x76c   : > { %v1927_v51 = vpop.permute.xlu0 %1926 }
 0x76f   : > { %v5814_v14 = vpop.eup %5813 }
 0x770   : > { %v1712_v53 = vmul.f32 %v5814_v14, %v7302_v16  ;;  %v1939_v55 = vpop.permute.xlu0 %1938 }
 0x771   : > { %v1675_v48 = vpop.xlane.xlu1 %1674 }
 0x772   : > { %5815 = vrcp.f32 %v1675_v48 }
 0x773   : > { %5817 = vrcp.f32 %v1679_v8 }
 0x774   : > { %5819 = vrcp.f32 %v1681_v1  ;;  %v1943_v13 = vpop.permute.xlu0 %1942 }
 0x775   : > { %v1683_v58 = vpop.xlane.xlu1 %1682 }
 0x776   : > { %5821 = vrcp.f32 %v1683_v58 }
 0x779   : > { %v1929_v21 = vpop.permute.xlu1 %1928 }
 0x77c   : > { %v5816_v26 = vpop.eup %5815 }
 0x77d   : > { %v1931_v43 = vpop.permute.xlu1 %1930  ;;  %v1711_v12 = vmul.f32 %v5816_v26, %v7308_v60  ;;  %v5818_v9 = vpop.eup %5817 }
 0x77e   : > { %v5820_v20 = vpop.eup %5819  ;;  %v1713_v11 = vmul.f32 %v5818_v9, %v7298_v56  ;;  %v1947_v60 = vpop.permute.xlu0 %1946 }
 0x77f   : > { %4587 = vmatmul.mubr.f32.gmra.mrb[26].mxu1 %v1711_v12  ;;  %v1714_v2 = vmul.f32 %v5820_v20, %v7305_v62 }
 0x780   : > { %4589 = vmatprep.mubr.f32.mxu1 %v1712_v53  ;;  %v5822_v46 = vpop.eup %5821 }
 0x781   : > { %v1933_v10 = vpop.permute.xlu1 %1932  ;;  %v1715_v7 = vmul.f32 %v5822_v46, %v7311_v41 }
 0x782   : > { %v1951_v62 = vpop.permute.xlu0 %1950 }
 0x783   : > { %4590 = vmatmul.mubr.f32.gmra.mrb[28].mxu1 %v1713_v11 }
 0x784   : > { %4592 = vmatprep.mubr.f32.mxu1 %v1714_v2 }
 0x785   : > { %v1935_v17 = vpop.permute.xlu1 %1934 }
 0x786   : > { %v1955_v57 = vpop.permute.xlu0 %1954 }
 0x787   : > { %4593 = vmatmul.mubr.f32.gmra.mrb[30].mxu1 %v1715_v7 }
 0x788   : > { %4627 = vmatprep.mubr.msk.f32.mxu1 %vm719_vm1, %v1927_v51 }
 0x789   : > { %v1937_v16 = vpop.permute.xlu1 %1936 }
 0x78a   : > { %v5582_v8 = vpop.permute.xlu0 %5581 }
 0x78b   : > { %4628 = vmatmul.mubr.msk.f32.vlgmr.msra.gmra.mrb[32].mxu1 %vm719_vm1, %v1929_v21  ;;  %v5584_v0 = vunpack.i.h.bf16 %v5582_v8  ;;  %v5583_v6 = vunpack.i.l.bf16 %v5582_v8 }
 0x78c   : > { %4630 = vmatprep.mubr.msk.f32.mxu1 %vm719_vm1, %v1931_v43 }
 0x78d   : > { %v1941_v22 = vpop.permute.xlu1 %1940  ;;  %v5071_v26 = vpack.c.bf16 %v5584_v0, %v5583_v6 }
 0x78e   : > { %v5592_v43 = vpop.permute.xlu0 %5591 }
 0x78f   : > { %4631 = vmatmul.mubr.msk.f32.gmra.mrb[34].mxu1 %vm719_vm1, %v1933_v10  ;;  %v5594_v12 = vunpack.i.h.bf16 %v5592_v43  ;;  %v5593_v9 = vunpack.i.l.bf16 %v5592_v43 }
 0x790   : > { %4633 = vmatprep.mubr.msk.f32.mxu1 %vm719_vm1, %v1935_v17 }
 0x791   : > { %v1945_v56 = vpop.permute.xlu1 %1944  ;;  %v5079_v11 = vpack.c.bf16 %v5594_v12, %v5593_v9 }
 0x792   : > { %v5602_v46 = vpop.permute.xlu0 %5601 }
 0x793   : > { %4634 = vmatmul.mubr.msk.f32.gmra.mrb[36].mxu1 %vm719_vm1, %v1937_v16  ;;  %v5604_v17 = vunpack.i.h.bf16 %v5602_v46  ;;  %v5603_v7 = vunpack.i.l.bf16 %v5602_v46 }
 0x794   : > { %4636 = vmatprep.mubr.msk.f32.mxu1 %vm719_vm1, %v1939_v55 }
 0x795   : > { %v1949_v41 = vpop.permute.xlu1 %1948 }
 0x797   : > { %4637 = vmatmul.mubr.msk.f32.gmra.mrb[38].mxu1 %vm719_vm1, %v1941_v22  ;;  %v5087_v22 = vpack.c.bf16 %v5604_v17, %v5603_v7 }
 0x798   : > { %4639 = vmatprep.mubr.msk.f32.mxu1 %vm719_vm1, %v1943_v13 }
 0x799   : > { %v1953_v61 = vpop.permute.xlu1 %1952 }
 0x79b   : > { %4640 = vmatmul.mubr.msk.f32.gmra.mrb[40].mxu1 %vm719_vm1, %v1945_v56 }
 0x79c   : > { %4642 = vmatprep.mubr.msk.f32.mxu1 %vm719_vm1, %v1947_v60 }
 0x79d   : > { %v1957_v38 = vpop.permute.xlu1 %1956 }
 0x79f   : > { %4643 = vmatmul.mubr.msk.f32.gmra.mrb[42].mxu1 %vm719_vm1, %v1949_v41 }
 0x7a0   : > { %4645 = vmatprep.mubr.msk.f32.mxu1 %vm719_vm1, %v1951_v62 }
 0x7a1   : > { %v5577_v19 = vpop.permute.xlu1 %5576 }
 0x7a2   : > { %v5579_v48 = vunpack.i.h.bf16 %v5577_v19  ;;  %v5578_v1 = vunpack.i.l.bf16 %v5577_v19 }
 0x7a3   : > { %4646 = vmatmul.mubr.msk.f32.gmra.mrb[44].mxu1 %vm719_vm1, %v1953_v61 }
 0x7a4   : > { %4648 = vmatprep.mubr.msk.f32.mxu1 %vm719_vm1, %v1955_v57  ;;  %v5067_v58 = vpack.c.bf16 %v5579_v48, %v5578_v1 }
 0x7a5   : > { %v5587_v21 = vpop.permute.xlu1 %5586 }
 0x7a6   : > { %v5589_v14 = vunpack.i.h.bf16 %v5587_v21  ;;  %v5588_v51 = vunpack.i.l.bf16 %v5587_v21  ;;  %5068 = vmatprep.subr.bf16.mxu0 %v5067_v58 }
 0x7a7   : > { %4649 = vmatmul.mubr.msk.f32.gmra.mrb[46].mxu1 %vm719_vm1, %v1957_v38  ;;  %5070 = vmatpush3.bf16.msra.mxu0 %v5067_v58 }
 0x7a8   : > { %5072 = vmatprep.subr.bf16.mxu0 %v5071_v26  ;;  %v5075_v53 = vpack.c.bf16 %v5589_v14, %v5588_v51 }
 0x7a9   : > { %v5597_v20 = vpop.permute.xlu1 %5596 }
 0x7aa   : > { %v5599_v55 = vunpack.i.h.bf16 %v5597_v20  ;;  %v5598_v10 = vunpack.i.l.bf16 %v5597_v20  ;;  %v3919_v20 = vld [vmem:[%s6615_s21 + $0x108] sm:$0xff] }
 0x7ab   : > { %5074 = vmatpush3.bf16.msra.mxu0 %v5071_v26 }
 0x7ac   : > { %5076 = vmatprep.subr.bf16.mxu0 %v5075_v53  ;;  %v5083_v13 = vpack.c.bf16 %v5599_v55, %v5598_v10  ;;  %v3918_v55 = vld [vmem:[%s6615_s21 + $0x100] sm:$0xff] }
 0x7ad   : > { %v5607_v2 = vpop.permute.xlu1 %5606 }
 0x7ae   : > { %v5609_v16 = vunpack.i.h.bf16 %v5607_v2  ;;  %v5608_v60 = vunpack.i.l.bf16 %v5607_v2 }
 0x7af   : > { %5078 = vmatpush3.bf16.msra.mxu0 %v5075_v53 }
 0x7b0   : > { %5080 = vmatprep.subr.bf16.mxu0 %v5079_v11  ;;  %v5091_v57 = vpack.c.bf16 %v5609_v16, %v5608_v60 }
 0x7b1   : > { %v5612_v56 = vpop.permute.xlu1 %5611 }
 0x7b2   : > { %v5614_v62 = vunpack.i.h.bf16 %v5612_v56  ;;  %v5613_v41 = vunpack.i.l.bf16 %v5612_v56 }
 0x7b3   : > { %5082 = vmatpush3.bf16.msra.mxu0 %v5079_v11 }
 0x7b4   : > { %5084 = vmatprep.subr.bf16.mxu0 %v5083_v13  ;;  %v5095_v61 = vpack.c.bf16 %v5614_v62, %v5613_v41 }
 0x7b7   : > { %5086 = vmatpush3.bf16.msra.mxu0 %v5083_v13 }
 0x7b8   : > { %5088 = vmatprep.subr.bf16.mxu0 %v5087_v22 }
 0x7bb   : > { %5090 = vmatpush3.bf16.msra.mxu0 %v5087_v22 }
 0x7bc   : > { %5092 = vmatprep.subr.bf16.mxu0 %v5091_v57 }
 0x7bf   : > { %5094 = vmatpush3.bf16.msra.mxu0 %v5091_v57 }
 0x7c0   : > { %5096 = vmatprep.subr.bf16.mxu0 %v5095_v61 }
 0x7c3   : > { %5098 = vmatpush3.bf16.msra.mxu0 %v5095_v61 }
 0x7e9   : > { %v7431_v38 = vpop.f32.mrb[16].mxu1 }
 0x7ea   : > { %v7433_v8 = vpop.f32.mrb[17].mxu1 }
 0x823   : > { %v7435_v19 = vpop.f32.mrb[18].mxu1 }
 0x824   : > { %v7437_v0 = vpop.f32.mrb[19].mxu1 }
 0x82a   : > { %v7439_v6 = vpop.f32.mrb[20].mxu1 }
 0x82b   : > { %v7441_v48 = vpop.f32.mrb[21].mxu1 }
 0x832   : > { %v7443_v1 = vpop.f32.mrb[22].mxu1 }
 0x833   : > { %8340 = vst [vmem:[#allocation52_spill] sm:$0xff] %v7443_v1  ;;  %v7445_v58 = vpop.f32.mrb[23].mxu1 }
 0x834   : > { %8341 = vst [vmem:[#allocation53_spill] sm:$0xff] %v7445_v58 }
 0x83a   : > { %v7447_v21 = vpop.f32.mrb[24].mxu1 }
 0x83b   : > { %8342 = vst [vmem:[#allocation54_spill] sm:$0xff] %v7447_v21  ;;  %v7449_v14 = vpop.f32.mrb[25].mxu1 }
 0x83c   : > { %8343 = vst [vmem:[#allocation55_spill] sm:$0xff] %v7449_v14 }
 0x852   : > { %v7451_v51 = vpop.f32.mrb[26].mxu1 }
 0x853   : > { %8344 = vst [vmem:[#allocation56_spill] sm:$0xff] %v7451_v51  ;;  %v7453_v26 = vpop.f32.mrb[27].mxu1 }
 0x854   : > { %8345 = vst [vmem:[#allocation57_spill] sm:$0xff] %v7453_v26 }
 0x856   : > { %v7455_v43 = vpop.f32.mrb[28].mxu1 }
 0x857   : > { %8346 = vst [vmem:[#allocation58_spill] sm:$0xff] %v7455_v43  ;;  %v7457_v12 = vpop.f32.mrb[29].mxu1 }
 0x858   : > { %8347 = vst [vmem:[#allocation59_spill] sm:$0xff] %v7457_v12  ;;  %v3925_v12 = vld [vmem:[%s6615_s21 + $0x138] sm:$0xff] }
 0x85a   : > { %v7459_v9 = vpop.f32.mrb[30].mxu1 }
 0x85b   : > { %8348 = vst [vmem:[#allocation60_spill] sm:$0xff] %v7459_v9  ;;  %v7461_v53 = vpop.f32.mrb[31].mxu1  ;;  %v3924_v9 = vld [vmem:[%s6615_s21 + $0x130] sm:$0xff] }
 0x85c   : > { %8349 = vst [vmem:[#allocation61_spill] sm:$0xff] %v7461_v53 }
 0x85e   : > { %v4629_v10 = vpop.f32.mrb[32].mxu1 }
 0x85f   : > { %v7465_v11 = vadd.f32 %v4629_v10, %v3919_v20  ;;  %v2120_v46 = vpop.f32.mrb[33].mxu1 }
 0x860   : > { %v7467_v2 = vadd.f32 %v3918_v55, %v2120_v46  ;;  %v3921_v46 = vld [vmem:[%s6615_s21 + $0x118] sm:$0xff] }
 0x861   : > { %2201 = vmax.xlane.f32.xlu1 %v7465_v11 }
 0x862   : > { %v4632_v17 = vpop.f32.mrb[34].mxu1  ;;  %2199 = vmax.xlane.f32.xlu0 %v7467_v2 }
 0x863   : > { %v2130_v7 = vpop.f32.mrb[35].mxu1  ;;  %v7480_v18 = vadd.f32 %v4632_v17, %v3921_v46  ;;  %v3927_v46 = vld [vmem:[%s6615_s21 + $0x148] sm:$0xff] }
 0x864   : > { %v7484_v25 = vadd.f32 %v3920_v23, %v2130_v7  ;;  %v3926_v7 = vld [vmem:[%s6615_s21 + $0x140] sm:$0xff] }
 0x866   : > { %v4635_v13 = vpop.f32.mrb[36].mxu1 }
 0x867   : > { %v2140_v16 = vpop.f32.mrb[37].mxu1  ;;  %v7491_v53 = vadd.f32 %v4635_v13, %v3923_v5  ;;  %v3928_v13 = vld [vmem:[%s6615_s21 + $0x150] sm:$0xff] }
 0x868   : > { %v7489_v4 = vadd.f32 %v3922_v15, %v2140_v16  ;;  %v3929_v16 = vld [vmem:[%s6615_s21 + $0x158] sm:$0xff] }
 0x86a   : > { %v4638_v60 = vpop.f32.mrb[38].mxu1 }
 0x86b   : > { %v2150_v22 = vpop.f32.mrb[39].mxu1  ;;  %v7499_v17 = vadd.f32 %v4638_v60, %v3925_v12  ;;  %v3930_v60 = vld [vmem:[%s6615_s21 + $0x160] sm:$0xff] }
 0x86c   : > { %v7497_v23 = vadd.f32 %v3924_v9, %v2150_v22  ;;  %v3931_v22 = vld [vmem:[%s6615_s21 + $0x168] sm:$0xff] }
 0x86e   : > { %v4641_v56 = vpop.f32.mrb[40].mxu1 }
 0x86f   : > { %v2160_v62 = vpop.f32.mrb[41].mxu1  ;;  %v7507_v15 = vadd.f32 %v4641_v56, %v3927_v46  ;;  %v3933_v46 = vld [vmem:[%s6615_s21 + $0x178] sm:$0xff] }
 0x870   : > { %v7505_v5 = vadd.f32 %v3926_v7, %v2160_v62  ;;  %v3932_v7 = vld [vmem:[%s6615_s21 + $0x170] sm:$0xff] }
 0x872   : > { %5621 = vrot.lane.b32.xlu1 %v6670_v33, %s6250_s1  ;;  %v4644_v41 = vpop.f32.mrb[42].mxu1 }
 0x873   : > { %v2170_v57 = vpop.f32.mrb[43].mxu1  ;;  %v7515_v9 = vadd.f32 %v4644_v41, %v3929_v16 }
 0x874   : > { %v7513_v12 = vadd.f32 %v3928_v13, %v2170_v57 }
 0x876   : > { %5626 = vrot.lane.b32.xlu1 %v6680_v39, %s6250_s1  ;;  %v4647_v61 = vpop.f32.mrb[44].mxu1 }
 0x877   : > { %v2180_v20 = vpop.f32.mrb[45].mxu1  ;;  %v7523_v56 = vadd.f32 %v4647_v61, %v3931_v22 }
 0x878   : > { %5616 = vrot.lane.b32.xlu0 %v6656_v27, %s6250_s1  ;;  %v7521_v62 = vadd.f32 %v3930_v60, %v2180_v20 }
 0x87a   : > { %5631 = vrot.lane.b32.xlu1 %v6690_v44, %s6250_s1  ;;  %v4650_v55 = vpop.f32.mrb[46].mxu1 }
 0x87b   : > { %v2190_v10 = vpop.f32.mrb[47].mxu1  ;;  %v7531_v41 = vadd.f32 %v4650_v55, %v3933_v46 }
 0x87c   : > { %v7529_v57 = vadd.f32 %v3932_v7, %v2190_v10 }
 0x897   : > { %2205 = vmax.xlane.f32.xlu0 %v7480_v18 }
 0x89b   : > { %2203 = vmax.xlane.f32.xlu0 %v7484_v25 }
 0x89e   : > { %2207 = vmax.xlane.f32.xlu1 %v7489_v4 }
 0x89f   : > { %2209 = vmax.xlane.f32.xlu0 %v7491_v53 }
 0x8a2   : > { %2211 = vmax.xlane.f32.xlu1 %v7497_v23 }
 0x8a3   : > { %2213 = vmax.xlane.f32.xlu0 %v7499_v17 }
 0x8a6   : > { %2215 = vmax.xlane.f32.xlu1 %v7505_v5 }
 0x8a7   : > { %2217 = vmax.xlane.f32.xlu0 %v7507_v15 }
 0x8aa   : > { %2219 = vmax.xlane.f32.xlu1 %v7513_v12 }
 0x8ab   : > { %2221 = vmax.xlane.f32.xlu0 %v7515_v9 }
 0x8ae   : > { %2223 = vmax.xlane.f32.xlu1 %v7521_v62 }
 0x8af   : > { %2225 = vmax.xlane.f32.xlu0 %v7523_v56 }
 0x8b2   : > { %2227 = vmax.xlane.f32.xlu1 %v7529_v57 }
 0x8b3   : > { %2229 = vmax.xlane.f32.xlu0 %v7531_v41 }
 0x8c3   : > { %5641 = vrot.lane.b32.xlu1 %v6710_v54, %s6250_s1 }
 0x8c7   : > { %5646 = vrot.lane.b32.xlu1 %v6720_v59, %s6250_s1 }
 0x8ee   : > { %v2202_v61 = vpop.xlane.xlu1 %2201 }
 0x8ef   : > { %v2232_v20 = vsub.f32 %v7465_v11, %v2202_v61  ;;  %v2200_v13 = vpop.xlane.xlu0 %2199 }
 0x8f0   : > { %v2231_v16 = vsub.f32 %v7467_v2, %v2200_v13 }
 0x8f1   : > { %v2249_v10 = vmul.f32 1.442695, %v2232_v20 }
 0x8f2   : > { %v2247_v60 = vmul.f32 1.442695, %v2231_v16  ;;  %v7554_v11 = vpop.permute.xlu1 %5621 }
 0x8f3   : > { %5823 = vpow2.f32 %v2249_v10  ;;  %v5617_v55 = vpop.permute.xlu0 %5616 }
 0x8f4   : > { %5825 = vpow2.f32 %v2247_v60  ;;  %v5619_v22 = vunpack.i.h.bf16 %v5617_v55  ;;  %v5618_v7 = vunpack.i.l.bf16 %v5617_v55 }
 0x8f6   : > { %v7541_v46 = vpack.c.bf16 %v5619_v22, %v5618_v7  ;;  %v7556_v2 = vpop.permute.xlu1 %5626 }
 0x8f8   : > { %5101 = vmatprep.subr.msk.bf16.mxu0 %vm6744_vm2, %v7541_v46 }
 0x8fa   : > { %v7559_v13 = vpop.permute.xlu1 %5631 }
 0x8fd   : > { %v7546_v43 = vpop.eup %5823 }
 0x8fe   : > { %v7548_v26 = vpop.eup %5825  ;;  %2281 = vadd.xlane.f32.xlu0 %v7546_v43 }
 0x8ff   : > { %2279 = vadd.xlane.f32.xlu1 %v7548_v26 }
 0x914   : > { %5636 = vrot.lane.b32.xlu0 %v6700_v49, %s6250_s1 }
 0x924   : > { %v2206_v61 = vpop.xlane.xlu0 %2205 }
 0x925   : > { %v2234_v20 = vsub.f32 %v7480_v18, %v2206_v61 }
 0x927   : > { %v2253_v16 = vmul.f32 1.442695, %v2234_v20 }
 0x928   : > { %v2204_v10 = vpop.xlane.xlu0 %2203 }
 0x929   : > { %5827 = vpow2.f32 %v2253_v16  ;;  %v2233_v60 = vsub.f32 %v7484_v25, %v2204_v10 }
 0x92b   : > { %v2251_v55 = vmul.f32 1.442695, %v2233_v60  ;;  %v2208_v22 = vpop.xlane.xlu1 %2207 }
 0x92c   : > { %v2210_v7 = vpop.xlane.xlu0 %2209  ;;  %v2235_v51 = vsub.f32 %v7489_v4, %v2208_v22 }
 0x92d   : > { %5829 = vpow2.f32 %v2251_v55  ;;  %v2236_v14 = vsub.f32 %v7491_v53, %v2210_v7 }
 0x92e   : > { %v2255_v1 = vmul.f32 1.442695, %v2235_v51 }
 0x92f   : > { %v2257_v21 = vmul.f32 1.442695, %v2236_v14  ;;  %v2212_v61 = vpop.xlane.xlu1 %2211 }
 0x930   : > { %v2214_v58 = vpop.xlane.xlu0 %2213  ;;  %v2237_v25 = vsub.f32 %v7497_v23, %v2212_v61 }
 0x931   : > { %5831 = vpow2.f32 %v2257_v21  ;;  %v2238_v18 = vsub.f32 %v7499_v17, %v2214_v58 }
 0x932   : > { %5833 = vpow2.f32 %v2255_v1  ;;  %v2259_v14 = vmul.f32 1.442695, %v2237_v25 }
 0x933   : > { %v7565_v20 = vpop.eup %5827  ;;  %v2261_v16 = vmul.f32 1.442695, %v2238_v18  ;;  %v2216_v4 = vpop.xlane.xlu1 %2215 }
 0x934   : > { %2285 = vadd.xlane.f32.xlu1 %v7565_v20  ;;  %v2218_v10 = vpop.xlane.xlu0 %2217  ;;  %v2239_v1 = vsub.f32 %v7505_v5, %v2216_v4 }
 0x935   : > { %5835 = vpow2.f32 %v2261_v16  ;;  %v2240_v21 = vsub.f32 %v7507_v15, %v2218_v10 }
 0x936   : > { %5837 = vpow2.f32 %v2259_v14  ;;  %v2263_v55 = vmul.f32 1.442695, %v2239_v1 }
 0x937   : > { %v7569_v60 = vpop.eup %5829  ;;  %v2265_v53 = vmul.f32 1.442695, %v2240_v21  ;;  %v2220_v23 = vpop.xlane.xlu1 %2219 }
 0x938   : > { %2283 = vadd.xlane.f32.xlu0 %v7569_v60  ;;  %v2222_v51 = vpop.xlane.xlu0 %2221  ;;  %v2241_v22 = vsub.f32 %v7513_v12, %v2220_v23 }
 0x939   : > { %5839 = vpow2.f32 %v2265_v53 }
 0x93a   : > { %5841 = vpow2.f32 %v2263_v55  ;;  %v2267_v61 = vmul.f32 1.442695, %v2241_v22 }
 0x93b   : > { %v7573_v58 = vpop.eup %5831  ;;  %v2224_v18 = vpop.xlane.xlu1 %2223 }
 0x93c   : > { %2289 = vadd.xlane.f32.xlu0 %v7573_v58  ;;  %v7577_v17 = vpop.eup %5833  ;;  %v2226_v7 = vpop.xlane.xlu0 %2225  ;;  %5843 = vpow2.f32 %v2267_v61  ;;  %v2243_v12 = vsub.f32 %v7521_v62, %v2224_v18  ;;  %v2242_v62 = vsub.f32 %v7515_v9, %v2222_v51 }
 0x93d   : > { %v2244_v5 = vsub.f32 %v7523_v56, %v2226_v7 }
 0x93e   : > { %v2271_v14 = vmul.f32 1.442695, %v2243_v12  ;;  %v2269_v22 = vmul.f32 1.442695, %v2242_v62 }
 0x93f   : > { %v7581_v15 = vpop.eup %5835  ;;  %v2273_v16 = vmul.f32 1.442695, %v2244_v5  ;;  %v2228_v10 = vpop.xlane.xlu1 %2227 }
 0x940   : > { %2287 = vadd.xlane.f32.xlu0 %v7577_v17  ;;  %v7587_v25 = vpop.eup %5837  ;;  %v2245_v56 = vsub.f32 %v7529_v57, %v2228_v10  ;;  %v2230_v55 = vpop.xlane.xlu0 %2229 }
 0x941   : > { %5845 = vpow2.f32 %v2273_v16  ;;  %v2246_v57 = vsub.f32 %v7531_v41, %v2230_v55 }
 0x942   : > { %5847 = vpow2.f32 %v2271_v14  ;;  %v2275_v1 = vmul.f32 1.442695, %v2245_v56 }
 0x943   : > { %v7591_v4 = vpop.eup %5839  ;;  %v2277_v18 = vmul.f32 1.442695, %v2246_v57  ;;  %v5642_v41 = vpop.permute.xlu1 %5641 }
 0x944   : > { %2293 = vadd.xlane.f32.xlu0 %v7581_v15  ;;  %v7595_v21 = vpop.eup %5841  ;;  %5849 = vpow2.f32 %v2275_v1 }
 0x945   : > { %5651 = vrot.lane.b32.xlu1 %v6730_v63, %s6250_s1  ;;  %5851 = vpow2.f32 %v2269_v22  ;;  %s6091_s1 = scalar_lea.vmem %s8180_s30, 2048 }
 0x946   : > { %v7598_v53 = vpop.eup %5843  ;;  %5853 = vpow2.f32 %v2277_v18  ;;  %p6092_p1 = scmp.ne.s32.totalorder %s8180_s30, %s6091_s1 }
 0x948   : > { %2291 = vadd.xlane.f32.xlu0 %v7587_v25 }
 0x94b   : > { %v7602_v23 = vpop.eup %5845 }
 0x94c   : > { %2297 = vadd.xlane.f32.xlu0 %v7591_v4  ;;  %v7606_v7 = vpop.eup %5847 }
 0x94e   : > { %v7609_v61 = vpop.eup %5849 }
 0x94f   : > { %v7612_v9 = vpop.eup %5851 }
 0x950   : > { %2295 = vadd.xlane.f32.xlu0 %v7595_v21  ;;  %v7615_v51 = vpop.eup %5853 }
 0x954   : > { %2299 = vadd.xlane.f32.xlu0 %v7598_v53 }
 0x958   : > { %2305 = vadd.xlane.f32.xlu0 %v7602_v23 }
 0x95c   : > { %2303 = vadd.xlane.f32.xlu0 %v7606_v7 }
 0x960   : > { %2307 = vadd.xlane.f32.xlu0 %v7609_v61 }
 0x969   : > { %2301 = vadd.xlane.f32.xlu1 %v7612_v9 }
 0x96d   : > { %2309 = vadd.xlane.f32.xlu1 %v7615_v51 }
 0x976   : > { %2553 = vrot.lane.b32.xlu0 %v6658_v28, %s6251_s17  ;;  %v5647_v28 = vpop.permute.xlu1 %5646 }
 0x97a   : > { %2565 = vrot.lane.b32.xlu0 %v6804_v32, %s6251_s17 }
 0x97e   : > { %2569 = vrot.lane.b32.xlu0 %v6814_v37, %s6251_s17  ;;  %2555 = vrot.lane.b32.xlu1 %v6781_v29, %s6251_s17  ;;  %v5623_v37 = vunpack.i.l.bf16 %v7554_v11 }
 0x982   : > { %2573 = vrot.lane.b32.xlu0 %v6824_v42, %s6251_s17  ;;  %2557 = vrot.lane.b32.xlu1 %v6784_v31, %s6251_s17 }
 0x986   : > { %2577 = vrot.lane.b32.xlu0 %v6834_v47, %s6251_s17  ;;  %2559 = vrot.lane.b32.xlu1 %v6791_v34, %s6251_s17  ;;  %v5633_v47 = vunpack.i.l.bf16 %v7559_v13 }
 0x98a   : > { %2581 = vrot.lane.b32.xlu0 %v6844_v52, %s6251_s17  ;;  %2561 = vrot.lane.b32.xlu1 %v6794_v36, %s6251_s17  ;;  %v5624_v36 = vunpack.i.h.bf16 %v7554_v11  ;;  %v5649_v11 = vunpack.i.h.bf16 %v5647_v28 }
 0x98b   : > { %v2282_v29 = vpop.xlane.xlu0 %2281 }
 0x98c   : > { %5855 = vrcp.f32 %v2282_v29  ;;  %v2280_v32 = vpop.xlane.xlu1 %2279 }
 0x98d   : > { %5857 = vrcp.f32 %v2280_v32 }
 0x98e   : > { %5661 = vrot.lane.b32.xlu0 %v6670_v33, %s6252_s13  ;;  %2563 = vrot.lane.b32.xlu1 %v6801_v24, %s6251_s17  ;;  %v5629_v24 = vunpack.i.h.bf16 %v7556_v2 }
 0x98f   : > { %v5637_v52 = vpop.permute.xlu0 %5636 }
 0x992   : > { %5671 = vrot.lane.b32.xlu0 %v6690_v44, %s6252_s13  ;;  %2567 = vrot.lane.b32.xlu1 %v6811_v30, %s6251_s17  ;;  %v5105_v44 = vpack.c.bf16 %v5624_v36, %v5623_v37  ;;  %v5628_v30 = vunpack.i.l.bf16 %v7556_v2 }
 0x996   : > { %v5856_v31 = vpop.eup %5855  ;;  %2571 = vrot.lane.b32.xlu1 %v6821_v35, %s6251_s17  ;;  %v5111_v35 = vpack.c.bf16 %v5629_v24, %v5628_v30 }
 0x997   : > { %v5858_v34 = vpop.eup %5857  ;;  %v2328_v42 = vmul.f32 %v5856_v31, %v7546_v43  ;;  %v5643_v43 = vunpack.i.l.bf16 %v5642_v41 }
 0x998   : > { %v2327_v33 = vmul.f32 %v5858_v34, %v7548_v26 }
 0x99a   : > { %4683 = vmatprep.mubr.f32.mxu0 %v2327_v33  ;;  %2575 = vrot.lane.b32.xlu1 %v6831_v40, %s6251_s17  ;;  %v5634_v40 = vunpack.i.h.bf16 %v7559_v13 }
 0x99b   : > { %4684 = vmatmul.mubr.f32.vlgmr.msra.gmra.mrb[48].mxu0 %v2328_v42 }
 0x99c   : > { %5104 = vmatpush3.bf16.xpose.msk.msra.mxu0 %vm6744_vm2, %v7541_v46 }
 0x99d   : > { %5107 = vmatprep.subr.msk.bf16.mxu0 %vm6744_vm2, %v5105_v44 }
 0x99e   : > { %2579 = vrot.lane.b32.xlu1 %v6841_v45, %s6251_s17  ;;  %v5117_v45 = vpack.c.bf16 %v5634_v40, %v5633_v47 }
 0x9a2   : > { %2583 = vrot.lane.b32.xlu1 %v6851_v50, %s6251_s17  ;;  %v5639_v50 = vunpack.i.h.bf16 %v5637_v52  ;;  %s6256_s17 = smov [#allocation13]  }
 0x9a4   : > { %5110 = vmatpush3.bf16.xpose.msk.msra.mxu0 %vm6744_vm2, %v5105_v44 }
 0x9a5   : > { %5113 = vmatprep.subr.msk.bf16.mxu0 %vm6744_vm2, %v5111_v35 }
 0x9a6   : > { %5656 = vrot.lane.b32.xlu1 %v6656_v27, %s6252_s13  ;;  %v5638_v27 = vunpack.i.l.bf16 %v5637_v52 }
 0x9a8   : > { %v5123_v26 = vpack.c.bf16 %v5639_v50, %v5638_v27 }
 0x9aa   : > { %5666 = vrot.lane.b32.xlu1 %v6680_v39, %s6252_s13  ;;  %v5644_v39 = vunpack.i.h.bf16 %v5642_v41 }
 0x9ac   : > { %5116 = vmatpush3.bf16.xpose.msk.msra.mxu0 %vm6744_vm2, %v5111_v35  ;;  %v5129_v46 = vpack.c.bf16 %v5644_v39, %v5643_v43 }
 0x9ad   : > { %5119 = vmatprep.subr.msk.bf16.mxu0 %vm6744_vm2, %v5117_v45 }
 0x9ae   : > { %5676 = vrot.lane.b32.xlu1 %v6700_v49, %s6252_s13  ;;  %v5648_v49 = vunpack.i.l.bf16 %v5647_v28 }
 0x9b0   : > { %v5135_v13 = vpack.c.bf16 %v5649_v11, %v5648_v49 }
 0x9b4   : > { %5122 = vmatpush3.bf16.xpose.msk.msra.mxu0 %vm6744_vm2, %v5117_v45 }
 0x9b5   : > { %5125 = vmatprep.subr.msk.bf16.mxu0 %vm6744_vm2, %v5123_v26 }
 0x9bc   : > { %5128 = vmatpush3.bf16.xpose.msk.msra.mxu0 %vm6744_vm2, %v5123_v26 }
 0x9bd   : > { %5131 = vmatprep.subr.msk.bf16.mxu0 %vm6744_vm2, %v5129_v46 }
 0x9c1   : > { %v2286_v2 = vpop.xlane.xlu1 %2285 }
 0x9c2   : > { %5859 = vrcp.f32 %v2286_v2 }
 0x9c4   : > { %5134 = vmatpush3.bf16.xpose.msk.msra.mxu0 %vm6744_vm2, %v5129_v46 }
 0x9c5   : > { %5137 = vmatprep.subr.msk.bf16.mxu0 %vm6744_vm2, %v5135_v13  ;;  %v5652_v5 = vpop.permute.xlu1 %5651  ;;  %v2284_v12 = vpop.xlane.xlu0 %2283 }
 0x9c6   : > { %5861 = vrcp.f32 %v2284_v12  ;;  %v5654_v16 = vunpack.i.h.bf16 %v5652_v5  ;;  %v5653_v10 = vunpack.i.l.bf16 %v5652_v5 }
 0x9c8   : > { %v5141_v56 = vpack.c.bf16 %v5654_v16, %v5653_v10 }
 0x9c9   : > { %v2290_v14 = vpop.xlane.xlu0 %2289 }
 0x9ca   : > { %5863 = vrcp.f32 %v2290_v14 }
 0x9cc   : > { %5140 = vmatpush3.bf16.xpose.msk.msra.mxu0 %vm6744_vm2, %v5135_v13  ;;  %v5860_v62 = vpop.eup %5859 }
 0x9cd   : > { %5143 = vmatprep.subr.msk.bf16.mxu0 %vm6744_vm2, %v5141_v56  ;;  %v2288_v1 = vpop.xlane.xlu0 %2287  ;;  %v2330_v18 = vmul.f32 %v5860_v62, %v7565_v20 }
 0x9ce   : > { %5865 = vrcp.f32 %v2288_v1 }
 0x9d0   : > { %v5862_v55 = vpop.eup %5861 }
 0x9d1   : > { %v2294_v22 = vpop.xlane.xlu0 %2293  ;;  %v2329_v57 = vmul.f32 %v5862_v55, %v7569_v60 }
 0x9d2   : > { %5867 = vrcp.f32 %v2294_v22 }
 0x9d3   : > { %4686 = vmatprep.mubr.f32.mxu0 %v2329_v57 }
 0x9d4   : > { %5146 = vmatpush3.bf16.xpose.msk.msra.mxu0 %vm6744_vm2, %v5141_v56  ;;  %v5864_v28 = vpop.eup %5863 }
 0x9d5   : > { %4687 = vmatmul.mubr.f32.gmra.mrb[50].mxu0 %v2330_v18  ;;  %v2292_v41 = vpop.xlane.xlu0 %2291  ;;  %v2332_v34 = vmul.f32 %v5864_v28, %v7573_v58 }
 0x9d6   : > { %5869 = vrcp.f32 %v2292_v41 }
 0x9d8   : > { %v5866_v29 = vpop.eup %5865 }
 0x9d9   : > { %v2298_v32 = vpop.xlane.xlu0 %2297  ;;  %v2331_v31 = vmul.f32 %v5866_v29, %v7577_v17 }
 0x9da   : > { %5871 = vrcp.f32 %v2298_v32 }
 0x9db   : > { %4689 = vmatprep.mubr.f32.mxu0 %v2331_v31 }
 0x9dc   : > { %4690 = vmatmul.mubr.f32.gmra.mrb[52].mxu0 %v2332_v34  ;;  %v5868_v20 = vpop.eup %5867 }
 0x9dd   : > { %v2296_v60 = vpop.xlane.xlu0 %2295  ;;  %v2334_v33 = vmul.f32 %v5868_v20, %v7581_v15 }
 0x9de   : > { %5873 = vrcp.f32 %v2296_v60 }
 0x9e0   : > { %v5870_v36 = vpop.eup %5869 }
 0x9e1   : > { %v2300_v3 = vpop.xlane.xlu0 %2299  ;;  %v2333_v37 = vmul.f32 %v5870_v36, %v7587_v25 }
 0x9e2   : > { %5875 = vrcp.f32 %v2300_v3 }
 0x9e3   : > { %4692 = vmatprep.mubr.f32.mxu0 %v2333_v37 }
 0x9e4   : > { %4693 = vmatmul.mubr.f32.gmra.mrb[54].mxu0 %v2334_v33  ;;  %v5872_v42 = vpop.eup %5871 }
 0x9e5   : > { %v2336_v58 = vmul.f32 %v5872_v42, %v7591_v4  ;;  %v2306_v24 = vpop.xlane.xlu0 %2305 }
 0x9e8   : > { %v5874_v44 = vpop.eup %5873 }
 0x9e9   : > { %v2335_v17 = vmul.f32 %v5874_v44, %v7595_v21  ;;  %v2304_v40 = vpop.xlane.xlu0 %2303 }
 0x9ea   : > { %5877 = vrcp.f32 %v2304_v40 }
 0x9eb   : > { %4695 = vmatprep.mubr.f32.mxu0 %v2335_v17 }
 0x9ec   : > { %v5876_v30 = vpop.eup %5875  ;;  %4696 = vmatmul.mubr.f32.gmra.mrb[56].mxu0 %v2336_v58 }
 0x9ed   : > { %v2337_v35 = vmul.f32 %v5876_v30, %v7598_v53  ;;  %v2308_v47 = vpop.xlane.xlu0 %2307 }
 0x9ef   : > { %4698 = vmatprep.mubr.f32.mxu0 %v2337_v35 }
 0x9f1   : > { %v2554_v52 = vpop.permute.xlu0 %2553 }
 0x9f4   : > { %v5878_v21 = vpop.eup %5877 }
 0x9f5   : > { %v2339_v53 = vmul.f32 %v5878_v21, %v7606_v7  ;;  %v2566_v43 = vpop.permute.xlu0 %2565 }
 0x9f6   : > { %v2302_v25 = vpop.xlane.xlu1 %2301 }
 0x9f7   : > { %5879 = vrcp.f32 %v2302_v25 }
 0x9f8   : > { %5881 = vrcp.f32 %v2306_v24 }
 0x9f9   : > { %5883 = vrcp.f32 %v2308_v47  ;;  %v2570_v12 = vpop.permute.xlu0 %2569 }
 0x9fa   : > { %v2310_v15 = vpop.xlane.xlu1 %2309 }
 0x9fb   : > { %5885 = vrcp.f32 %v2310_v15 }
 0x9fe   : > { %v2556_v45 = vpop.permute.xlu1 %2555 }
 0xa01   : > { %v5880_v4 = vpop.eup %5879 }
 0xa02   : > { %v2558_v50 = vpop.permute.xlu1 %2557  ;;  %v2338_v27 = vmul.f32 %v5880_v4, %v7612_v9  ;;  %v5882_v26 = vpop.eup %5881 }
 0xa03   : > { %v5884_v39 = vpop.eup %5883  ;;  %v2340_v11 = vmul.f32 %v5882_v26, %v7602_v23  ;;  %v2574_v9 = vpop.permute.xlu0 %2573 }
 0xa04   : > { %4699 = vmatmul.mubr.f32.gmra.mrb[58].mxu0 %v2338_v27  ;;  %v2341_v2 = vmul.f32 %v5884_v39, %v7609_v61  ;;  %v3966_v39 = vld [vmem:[%s6615_s21 + $0x180] sm:$0xff] }
 0xa05   : > { %4701 = vmatprep.mubr.f32.mxu0 %v2339_v53  ;;  %v5886_v49 = vpop.eup %5885  ;;  %v3967_v53 = vld [vmem:[%s6615_s21 + $0x188] sm:$0xff] }
 0xa06   : > { %v2560_v46 = vpop.permute.xlu1 %2559  ;;  %v2342_v5 = vmul.f32 %v5886_v49, %v7615_v51 }
 0xa07   : > { %v2578_v61 = vpop.permute.xlu0 %2577 }
 0xa08   : > { %4702 = vmatmul.mubr.f32.gmra.mrb[60].mxu0 %v2340_v11 }
 0xa09   : > { %4704 = vmatprep.mubr.f32.mxu0 %v2341_v2  ;;  %v3969_v2 = vld [vmem:[%s6615_s21 + $0x198] sm:$0xff] }
 0xa0a   : > { %v2562_v13 = vpop.permute.xlu1 %2561 }
 0xa0b   : > { %v2582_v10 = vpop.permute.xlu0 %2581 }
 0xa0c   : > { %4705 = vmatmul.mubr.f32.gmra.mrb[62].mxu0 %v2342_v5 }
 0xa0d   : > { %4739 = vmatprep.mubr.msk.f32.mxu0 %vm719_vm1, %v2554_v52 }
 0xa0e   : > { %v2564_v7 = vpop.permute.xlu1 %2563 }
 0xa0f   : > { %v5662_v1 = vpop.permute.xlu0 %5661 }
 0xa10   : > { %4740 = vmatmul.mubr.msk.f32.vlgmr.msra.gmra.mrb[64].mxu0 %vm719_vm1, %v2556_v45  ;;  %v5664_v55 = vunpack.i.h.bf16 %v5662_v1  ;;  %v5663_v22 = vunpack.i.l.bf16 %v5662_v1 }
 0xa11   : > { %4742 = vmatprep.mubr.msk.f32.mxu0 %vm719_vm1, %v2558_v50 }
 0xa12   : > { %v2568_v16 = vpop.permute.xlu1 %2567  ;;  %v5151_v29 = vpack.c.bf16 %v5664_v55, %v5663_v22  ;;  %v3973_v22 = vld [vmem:[%s6615_s21 + $0x1b8] sm:$0xff] }
 0xa13   : > { %v5672_v34 = vpop.permute.xlu0 %5671 }
 0xa14   : > { %4743 = vmatmul.mubr.msk.f32.gmra.mrb[66].mxu0 %vm719_vm1, %v2560_v46  ;;  %v5674_v60 = vunpack.i.h.bf16 %v5672_v34  ;;  %v5673_v20 = vunpack.i.l.bf16 %v5672_v34 }
 0xa15   : > { %4745 = vmatprep.mubr.msk.f32.mxu0 %vm719_vm1, %v2562_v13 }
 0xa16   : > { %v2572_v23 = vpop.permute.xlu1 %2571  ;;  %v5159_v37 = vpack.c.bf16 %v5674_v60, %v5673_v20 }
 0xa18   : > { %4746 = vmatmul.mubr.msk.f32.gmra.mrb[68].mxu0 %vm719_vm1, %v2564_v7  ;;  %v3968_v7 = vld [vmem:[%s6615_s21 + $0x190] sm:$0xff] }
 0xa19   : > { %4748 = vmatprep.mubr.msk.f32.mxu0 %vm719_vm1, %v2566_v43 }
 0xa1a   : > { %v2576_v51 = vpop.permute.xlu1 %2575 }
 0xa1c   : > { %4749 = vmatmul.mubr.msk.f32.gmra.mrb[70].mxu0 %vm719_vm1, %v2568_v16 }
 0xa1d   : > { %4751 = vmatprep.mubr.msk.f32.mxu0 %vm719_vm1, %v2570_v12 }
 0xa1e   : > { %v2580_v14 = vpop.permute.xlu1 %2579 }
 0xa20   : > { %4752 = vmatmul.mubr.msk.f32.gmra.mrb[72].mxu0 %vm719_vm1, %v2572_v23 }
 0xa21   : > { %4754 = vmatprep.mubr.msk.f32.mxu0 %vm719_vm1, %v2574_v9  ;;  %v3970_v9 = vld [vmem:[%s6615_s21 + $0x1a0] sm:$0xff] }
 0xa22   : > { %v2584_v56 = vpop.permute.xlu1 %2583 }
 0xa24   : > { %4755 = vmatmul.mubr.msk.f32.gmra.mrb[74].mxu0 %vm719_vm1, %v2576_v51 }
 0xa25   : > { %4757 = vmatprep.mubr.msk.f32.mxu0 %vm719_vm1, %v2578_v61 }
 0xa26   : > { %v5657_v62 = vpop.permute.xlu1 %5656 }
 0xa27   : > { %v5659_v57 = vunpack.i.h.bf16 %v5657_v62  ;;  %v5658_v18 = vunpack.i.l.bf16 %v5657_v62 }
 0xa28   : > { %4758 = vmatmul.mubr.msk.f32.gmra.mrb[76].mxu0 %vm719_vm1, %v2580_v14  ;;  %v3972_v14 = vld [vmem:[%s6615_s21 + $0x1b0] sm:$0xff] }
 0xa29   : > { %v5147_v41 = vpack.c.bf16 %v5659_v57, %v5658_v18  ;;  %4760 = vmatprep.mubr.msk.f32.mxu0 %vm719_vm1, %v2582_v10  ;;  %v3971_v10 = vld [vmem:[%s6615_s21 + $0x1a8] sm:$0xff]  ;;  %v3974_v57 = vld [vmem:[%s6615_s21 + $0x1c0] sm:$0xff] }
 0xa2a   : > { %v5667_v28 = vpop.permute.xlu1 %5666 }
 0xa2b   : > { %v5669_v32 = vunpack.i.h.bf16 %v5667_v28  ;;  %v5668_v31 = vunpack.i.l.bf16 %v5667_v28  ;;  %5148 = vmatprep.subr.bf16.mxu0 %v5147_v41  ;;  %5187 = vmatprep.subr.bf16.mxu1 %v5147_v41 }
 0xa2c   : > { %4761 = vmatmul.mubr.msk.f32.gmra.mrb[78].mxu0 %vm719_vm1, %v2584_v56  ;;  %5195 = vmatpush3.bf16.msra.mxu1 %v5147_v41 }
 0xa2d   : > { %5150 = vmatpush3.bf16.msra.mxu0 %v5147_v41  ;;  %5188 = vmatprep.subr.bf16.mxu1 %v5151_v29  ;;  %v5155_v36 = vpack.c.bf16 %v5669_v32, %v5668_v31  ;;  %v3975_v32 = vld [vmem:[%s6615_s21 + $0x1c8] sm:$0xff]  ;;  %v3976_v31 = vld [vmem:[%s6615_s21 + $0x1d0] sm:$0xff] }
 0xa2e   : > { %5152 = vmatprep.subr.bf16.mxu0 %v5151_v29  ;;  %v5677_v3 = vpop.permute.xlu1 %5676 }
 0xa2f   : > { %v5679_v33 = vunpack.i.h.bf16 %v5677_v3  ;;  %v5678_v42 = vunpack.i.l.bf16 %v5677_v3  ;;  %v3977_v3 = vld [vmem:[%s6615_s21 + $0x1d8] sm:$0xff] }
 0xa30   : > { %5196 = vmatpush3.bf16.msra.mxu1 %v5151_v29 }
 0xa31   : > { %5154 = vmatpush3.bf16.msra.mxu0 %v5151_v29  ;;  %5189 = vmatprep.subr.bf16.mxu1 %v5155_v36  ;;  %v5163_v44 = vpack.c.bf16 %v5679_v33, %v5678_v42 }
 0xa32   : > { %5156 = vmatprep.subr.bf16.mxu0 %v5155_v36 }
 0xa34   : > { %5197 = vmatpush3.bf16.msra.mxu1 %v5155_v36 }
 0xa35   : > { %5158 = vmatpush3.bf16.msra.mxu0 %v5155_v36  ;;  %5190 = vmatprep.subr.bf16.mxu1 %v5159_v37 }
 0xa36   : > { %5160 = vmatprep.subr.bf16.mxu0 %v5159_v37 }
 0xa38   : > { %5198 = vmatpush3.bf16.msra.mxu1 %v5159_v37 }
 0xa39   : > { %5162 = vmatpush3.bf16.msra.mxu0 %v5159_v37  ;;  %5191 = vmatprep.subr.bf16.mxu1 %v5163_v44  ;;  %v3978_v37 = vld [vmem:[%s6615_s21 + $0x1e0] sm:$0xff] }
 0xa3a   : > { %5164 = vmatprep.subr.bf16.mxu0 %v5163_v44 }
 0xa3c   : > { %5199 = vmatpush3.bf16.msra.mxu1 %v5163_v44 }
 0xa3d   : > { %5166 = vmatpush3.bf16.msra.mxu0 %v5163_v44 }
 0xa6e   : > { %v7729_v17 = vpop.f32.mrb[48].mxu0 }
 0xa6f   : > { %v7731_v58 = vpop.f32.mrb[49].mxu0 }
 0xaa8   : > { %v7733_v24 = vpop.f32.mrb[50].mxu0 }
 0xaa9   : > { %v7735_v30 = vpop.f32.mrb[51].mxu0 }
 0xaaf   : > { %v7737_v35 = vpop.f32.mrb[52].mxu0 }
 0xab0   : > { %v7739_v40 = vpop.f32.mrb[53].mxu0 }
 0xab7   : > { %v7741_v25 = vpop.f32.mrb[54].mxu0 }
 0xab8   : > { %v7743_v47 = vpop.f32.mrb[55].mxu0 }
 0xabf   : > { %v7745_v15 = vpop.f32.mrb[56].mxu0 }
 0xac0   : > { %v7747_v45 = vpop.f32.mrb[57].mxu0 }
 0xad7   : > { %v7749_v21 = vpop.f32.mrb[58].mxu0 }
 0xad8   : > { %v7751_v52 = vpop.f32.mrb[59].mxu0 }
 0xadb   : > { %v7753_v4 = vpop.f32.mrb[60].mxu0 }
 0xadc   : > { %v7755_v50 = vpop.f32.mrb[61].mxu0 }
 0xadf   : > { %v7757_v27 = vpop.f32.mrb[62].mxu0 }
 0xae0   : > { %v7759_v26 = vpop.f32.mrb[63].mxu0 }
 0xae3   : > { %v4741_v43 = vpop.f32.mrb[64].mxu0 }
 0xae4   : > { %v7763_v46 = vadd.f32 %v4741_v43, %v3967_v53  ;;  %v2747_v11 = vpop.f32.mrb[65].mxu0  ;;  %v3980_v43 = vld [vmem:[%s6615_s21 + $0x1f0] sm:$0xff] }
 0xae5   : > { %v7765_v49 = vadd.f32 %v3966_v39, %v2747_v11  ;;  %v3979_v39 = vld [vmem:[%s6615_s21 + $0x1e8] sm:$0xff] }
 0xae6   : > { %2828 = vmax.xlane.f32.xlu1 %v7763_v46 }
 0xae7   : > { %v4744_v13 = vpop.f32.mrb[66].mxu0  ;;  %2826 = vmax.xlane.f32.xlu0 %v7765_v49 }
 0xae8   : > { %v7770_v5 = vadd.f32 %v4744_v13, %v3969_v2  ;;  %v2757_v12 = vpop.f32.mrb[67].mxu0 }
 0xae9   : > { %v7775_v61 = vadd.f32 %v3968_v7, %v2757_v12  ;;  %v3981_v7 = vld [vmem:[%s6615_s21 + $0x1f8] sm:$0xff]  ;;  %s8378_s21 = sld [smem:[#allocation34_spill]] }
 0xaeb   : > { %v4747_v16 = vpop.f32.mrb[68].mxu0  ;;  %2832 = vmax.xlane.f32.xlu0 %v7770_v5 }
 0xaec   : > { %v2767_v23 = vpop.f32.mrb[69].mxu0  ;;  %v7783_v62 = vadd.f32 %v4747_v16, %v3971_v10 }
 0xaed   : > { %v7777_v51 = vadd.f32 %v3970_v9, %v2767_v23 }
 0xaef   : > { %v4750_v56 = vpop.f32.mrb[70].mxu0  ;;  %2834 = vmax.xlane.f32.xlu1 %v7777_v51  ;;  %2830 = vmax.xlane.f32.xlu0 %v7775_v61  ;;  %p8381_p3 = scmp.ne.s32.totalorder %s8378_s21, 0 }
 0xaf0   : > { %v2777_v1 = vpop.f32.mrb[71].mxu0  ;;  %v7791_v28 = vadd.f32 %v4750_v56, %v3973_v22 }
 0xaf1   : > { %v7785_v55 = vadd.f32 %v3972_v14, %v2777_v1  ;;  %p6093_p8 = pnand %p6092_p1, %p8381_p3 }
 0xaf3   : > { %v4753_v18 = vpop.f32.mrb[72].mxu0  ;;  %2838 = vmax.xlane.f32.xlu1 %v7785_v55  ;;  %2836 = vmax.xlane.f32.xlu0 %v7783_v62  ;;  %p6094_p2 = pneg %p6093_p8 }
 0xaf4   : > { %v2787_v41 = vpop.f32.mrb[73].mxu0  ;;  %v7799_v20 = vadd.f32 %v4753_v18, %v3975_v32 }
 0xaf5   : > { %v7793_v29 = vadd.f32 %v3974_v57, %v2787_v41 }
 0xaf7   : > { %v4756_v34 = vpop.f32.mrb[74].mxu0  ;;  %2842 = vmax.xlane.f32.xlu1 %v7793_v29  ;;  %2840 = vmax.xlane.f32.xlu0 %v7791_v28 }
 0xaf8   : > { %v2797_v60 = vpop.f32.mrb[75].mxu0  ;;  %v7807_v44 = vadd.f32 %v4756_v34, %v3977_v3 }
 0xaf9   : > { %v7801_v36 = vadd.f32 %v3976_v31, %v2797_v60 }
 0xafb   : > { %v4759_v33 = vpop.f32.mrb[76].mxu0  ;;  %2846 = vmax.xlane.f32.xlu1 %v7801_v36  ;;  %2844 = vmax.xlane.f32.xlu0 %v7799_v20 }
 0xafc   : > { %v2807_v42 = vpop.f32.mrb[77].mxu0  ;;  %v7815_v13 = vadd.f32 %v4759_v33, %v3979_v39 }
 0xafd   : > { %v7809_v53 = vadd.f32 %v3978_v37, %v2807_v42 }
 0xaff   : > { %v4762_v11 = vpop.f32.mrb[78].mxu0  ;;  %2850 = vmax.xlane.f32.xlu1 %v7809_v53  ;;  %2848 = vmax.xlane.f32.xlu0 %v7807_v44 }
 0xb00   : > { %v2817_v2 = vpop.f32.mrb[79].mxu0  ;;  %v7822_v9 = vadd.f32 %v4762_v11, %v3981_v7 }
 0xb01   : > { %v7817_v12 = vadd.f32 %v3980_v43, %v2817_v2 }
 0xb03   : > { %2854 = vmax.xlane.f32.xlu1 %v7817_v12  ;;  %2852 = vmax.xlane.f32.xlu0 %v7815_v13 }
 0xb07   : > { %2856 = vmax.xlane.f32.xlu0 %v7822_v9 }
 0xb14   : > { %5681 = vrot.lane.b32.xlu1 %v6710_v54, %s6252_s13 }
 0xb1d   : > { %5686 = vrot.lane.b32.xlu0 %v6720_v59, %s6252_s13 }
 0xb73   : > { %v2829_v16 = vpop.xlane.xlu1 %2828 }
 0xb74   : > { %v2859_v23 = vsub.f32 %v7763_v46, %v2829_v16  ;;  %v2827_v10 = vpop.xlane.xlu0 %2826 }
 0xb75   : > { %v2858_v14 = vsub.f32 %v7765_v49, %v2827_v10 }
 0xb76   : > { %v2876_v56 = vmul.f32 1.442695, %v2859_v23 }
 0xb77   : > { %v2874_v1 = vmul.f32 1.442695, %v2858_v14 }
 0xb78   : > { %5887 = vpow2.f32 %v2876_v56  ;;  %v2833_v22 = vpop.xlane.xlu0 %2832 }
 0xb79   : > { %5889 = vpow2.f32 %v2874_v1  ;;  %v2861_v57 = vsub.f32 %v7770_v5, %v2833_v22 }
 0xb7b   : > { %v2880_v18 = vmul.f32 1.442695, %v2861_v57 }
 0xb7c   : > { %v2835_v41 = vpop.xlane.xlu1 %2834  ;;  %v2831_v32 = vpop.xlane.xlu0 %2830 }
 0xb7d   : > { %5891 = vpow2.f32 %v2880_v18  ;;  %v2862_v54 = vsub.f32 %v7777_v51, %v2835_v41  ;;  %v2860_v59 = vsub.f32 %v7775_v61, %v2831_v32 }
 0xb7f   : > { %v2882_v31 = vmul.f32 1.442695, %v2862_v54  ;;  %v2878_v46 = vmul.f32 1.442695, %v2860_v59 }
 0xb80   : > { %v2839_v34 = vpop.xlane.xlu1 %2838  ;;  %v2837_v60 = vpop.xlane.xlu0 %2836 }
 0xb81   : > { %5893 = vpow2.f32 %v2882_v31  ;;  %v2863_v49 = vsub.f32 %v7783_v62, %v2837_v60  ;;  %v2864_v42 = vsub.f32 %v7785_v55, %v2839_v34 }
 0xb82   : > { %v7835_v3 = vpop.eup %5887  ;;  %5895 = vpow2.f32 %v2878_v46 }
 0xb83   : > { %v7837_v37 = vpop.eup %5889  ;;  %v2884_v5 = vmul.f32 1.442695, %v2863_v49  ;;  %2908 = vadd.xlane.f32.xlu0 %v7835_v3  ;;  %v2886_v2 = vmul.f32 1.442695, %v2864_v42 }
 0xb84   : > { %v2843_v33 = vpop.xlane.xlu1 %2842  ;;  %2906 = vadd.xlane.f32.xlu1 %v7837_v37  ;;  %v2841_v51 = vpop.xlane.xlu0 %2840 }
 0xb85   : > { %v2865_v61 = vsub.f32 %v7791_v28, %v2841_v51  ;;  %5897 = vpow2.f32 %v2884_v5  ;;  %v2866_v7 = vsub.f32 %v7793_v29, %v2843_v33 }
 0xb87   : > { %v7843_v39 = vpop.eup %5891  ;;  %v2888_v62 = vmul.f32 1.442695, %v2865_v61  ;;  %v2890_v28 = vmul.f32 1.442695, %v2866_v7 }
 0xb88   : > { %v2847_v43 = vpop.xlane.xlu1 %2846  ;;  %2912 = vadd.xlane.f32.xlu0 %v7843_v39  ;;  %v2845_v11 = vpop.xlane.xlu0 %2844 }
 0xb89   : > { %5899 = vpow2.f32 %v2888_v62  ;;  %v2868_v14 = vsub.f32 %v7801_v36, %v2847_v43  ;;  %v2867_v43 = vsub.f32 %v7799_v20, %v2845_v11 }
 0xb8a   : > { %5901 = vpow2.f32 %v2886_v2 }
 0xb8b   : > { %v7847_v16 = vpop.eup %5893  ;;  %5903 = vpow2.f32 %v2890_v28  ;;  %v2894_v29 = vmul.f32 1.442695, %v2868_v14  ;;  %v2892_v2 = vmul.f32 1.442695, %v2867_v43  ;;  %v8360_v43 = vld [vmem:[#allocation37_spill] sm:$0xff] }
 0xb8c   : > { %v7849_v23 = vpop.eup %5895  ;;  %v2851_v10 = vpop.xlane.xlu1 %2850  ;;  %2914 = vadd.xlane.f32.xlu1 %v7847_v16 }
 0xb8d   : > { %v2849_v55 = vpop.xlane.xlu0 %2848  ;;  %2910 = vadd.xlane.f32.xlu0 %v7849_v23  ;;  %v2870_v57 = vsub.f32 %v7809_v53, %v2851_v10  ;;  %5905 = vpow2.f32 %v2894_v29 }
 0xb8e   : > { %v2869_v7 = vsub.f32 %v7807_v44, %v2849_v55 }
 0xb8f   : > { %v7854_v56 = vpop.eup %5897  ;;  %v2898_v36 = vmul.f32 1.442695, %v2870_v57 }
 0xb90   : > { %v2855_v1 = vpop.xlane.xlu1 %2854  ;;  %v2896_v10 = vmul.f32 1.442695, %v2869_v7  ;;  %v8361_v7 = vld [vmem:[#allocation36_spill] sm:$0xff] }
 0xb91   : > { %v2853_v22 = vpop.xlane.xlu0 %2852  ;;  %2916 = vadd.xlane.f32.xlu0 %v7854_v56  ;;  %v2872_v31 = vsub.f32 %v7817_v12, %v2855_v1  ;;  %5907 = vpow2.f32 %v2898_v36 }
 0xb92   : > { %v2871_v28 = vsub.f32 %v7815_v13, %v2853_v22 }
 0xb93   : > { %v7858_v18 = vpop.eup %5899  ;;  %v2902_v5 = vmul.f32 1.442695, %v2872_v31 }
 0xb94   : > { %v5682_v41 = vpop.permute.xlu1 %5681  ;;  %v7862_v34 = vpop.eup %5901  ;;  %v2900_v14 = vmul.f32 1.442695, %v2871_v28 }
 0xb95   : > { %v2857_v32 = vpop.xlane.xlu0 %2856  ;;  %v5684_v54 = vunpack.i.h.bf16 %v5682_v41  ;;  %v5683_v59 = vunpack.i.l.bf16 %v5682_v41  ;;  %2920 = vadd.xlane.f32.xlu0 %v7858_v18  ;;  %v7866_v61 = vpop.eup %5903  ;;  %5909 = vpow2.f32 %v2902_v5 }
 0xb96   : > { %v2873_v33 = vsub.f32 %v7822_v9, %v2857_v32 }
 0xb97   : > { %v5167_v46 = vpack.c.bf16 %v5684_v54, %v5683_v59  ;;  %v7871_v42 = vpop.eup %5905 }
 0xb98   : > { %v2904_v12 = vmul.f32 1.442695, %v2873_v33 }
 0xb99   : > { %v5687_v60 = vpop.permute.xlu0 %5686  ;;  %2918 = vadd.xlane.f32.xlu0 %v7862_v34  ;;  %5168 = vmatprep.subr.bf16.mxu0 %v5167_v46 }
 0xb9a   : > { %v5689_v49 = vunpack.i.h.bf16 %v5687_v60  ;;  %v5688_v53 = vunpack.i.l.bf16 %v5687_v60  ;;  %5192 = vmatprep.subr.bf16.mxu1 %v5167_v46  ;;  %5170 = vmatpush3.bf16.msra.mxu0 %v5167_v46  ;;  %5911 = vpow2.f32 %v2904_v12 }
 0xb9b   : > { %5200 = vmatpush3.bf16.msra.mxu1 %v5167_v46  ;;  %v7874_v9 = vpop.eup %5907  ;;  %5913 = vpow2.f32 %v2892_v2 }
 0xb9c   : > { %v5171_v51 = vpack.c.bf16 %v5689_v49, %v5688_v53  ;;  %5915 = vpow2.f32 %v2896_v10 }
 0xb9d   : > { %2922 = vadd.xlane.f32.xlu0 %v7866_v61  ;;  %5691 = vrot.lane.b32.xlu1 %v6730_v63, %s6252_s13  ;;  %5917 = vpow2.f32 %v2900_v14  ;;  %s6095_s13 = sshll.u32 %s6256_s17, 4  ;;  %s6096_s13 = int_to_ptr.vmem [resolvable:$false] %s6095_s13 }
 0xb9e   : > { %5172 = vmatprep.subr.bf16.mxu0 %v5171_v51  ;;  %5193 = vmatprep.subr.bf16.mxu1 %v5171_v51  ;;  %p6098_p11 = scmp.lt.s32.totalorder %s8180_s30, %s6096_s13 }
 0xb9f   : > { %5174 = vmatpush3.bf16.msra.mxu0 %v5171_v51  ;;  %5201 = vmatpush3.bf16.msra.mxu1 %v5171_v51  ;;  %v7877_v62 = vpop.eup %5909 }
 0xba1   : > { %2926 = vadd.xlane.f32.xlu0 %v7871_v42 }
 0xba4   : > { %v7880_v63 = vpop.eup %5911 }
 0xba5   : > { %2930 = vadd.xlane.f32.xlu0 %v7874_v9  ;;  %v7886_v1 = vpop.eup %5913 }
 0xba6   : > { %v7891_v29 = vpop.eup %5915 }
 0xba7   : > { %v7896_v20 = vpop.eup %5917 }
 0xba9   : > { %2934 = vadd.xlane.f32.xlu0 %v7877_v62 }
 0xbad   : > { %2936 = vadd.xlane.f32.xlu0 %v7880_v63 }
 0xbc1   : > { %2924 = vadd.xlane.f32.xlu1 %v7886_v1 }
 0xbc3   : > { %3179 = vrot.lane.b32.xlu0 %v7433_v8, %s6253_s11  ;;  %v8351_v8 = vld [vmem:[#allocation53_spill] sm:$0xff] }
 0xbc5   : > { %2928 = vadd.xlane.f32.xlu1 %v7891_v29 }
 0xbc7   : > { %3181 = vrot.lane.b32.xlu0 %v7431_v38, %s6253_s11  ;;  %v8350_v38 = vld [vmem:[#allocation52_spill] sm:$0xff] }
 0xbc9   : > { %2932 = vadd.xlane.f32.xlu1 %v7896_v20 }
 0xbcb   : > { %3243 = vrot.lane.b32.xlu0 %v7731_v58, %s6254_s6  ;;  %v8357_v58 = vld [vmem:[#allocation59_spill] sm:$0xff] }
 0xbcf   : > { %3183 = vrot.lane.b32.xlu0 %v7437_v0, %s6253_s11  ;;  %v8353_v0 = vld [vmem:[#allocation55_spill] sm:$0xff] }
 0xbd3   : > { %3185 = vrot.lane.b32.xlu0 %v7435_v19, %s6253_s11  ;;  %v8352_v19 = vld [vmem:[#allocation54_spill] sm:$0xff] }
 0xbd7   : > { %3249 = vrot.lane.b32.xlu0 %v7733_v24, %s6254_s6  ;;  %v8358_v24 = vld [vmem:[#allocation60_spill] sm:$0xff] }
 0xbda   : > { %3245 = vrot.lane.b32.xlu1 %v7729_v17, %s6254_s6  ;;  %v8356_v17 = vld [vmem:[#allocation58_spill] sm:$0xff] }
 0xbdb   : > { %3189 = vrot.lane.b32.xlu0 %v7439_v6, %s6253_s11  ;;  %v8354_v6 = vld [vmem:[#allocation56_spill] sm:$0xff] }
 0xbde   : > { %3247 = vrot.lane.b32.xlu1 %v7735_v30, %s6254_s6  ;;  %v8359_v30 = vld [vmem:[#allocation61_spill] sm:$0xff] }
 0xbdf   : > { %3253 = vrot.lane.b32.xlu0 %v7737_v35, %s6254_s6 }
 0xbe2   : > { %3187 = vrot.lane.b32.xlu1 %v7441_v48, %s6253_s11  ;;  %v8355_v48 = vld [vmem:[#allocation57_spill] sm:$0xff] }
 0xbe3   : > { %3193 = vrot.lane.b32.xlu0 %v8350_v38, %s6253_s11 }
 0xbe6   : > { %3251 = vrot.lane.b32.xlu1 %v7739_v40, %s6254_s6 }
 0xbe7   : > { %3257 = vrot.lane.b32.xlu0 %v7741_v25, %s6254_s6 }
 0xbea   : > { %3191 = vrot.lane.b32.xlu1 %v8351_v8, %s6253_s11 }
 0xbeb   : > { %3197 = vrot.lane.b32.xlu0 %v8352_v19, %s6253_s11 }
 0xbee   : > { %3255 = vrot.lane.b32.xlu1 %v7743_v47, %s6254_s6 }
 0xbef   : > { %3261 = vrot.lane.b32.xlu0 %v7745_v15, %s6254_s6 }
 0xbf2   : > { %3195 = vrot.lane.b32.xlu1 %v8353_v0, %s6253_s11 }
 0xbf3   : > { %3201 = vrot.lane.b32.xlu0 %v8354_v6, %s6253_s11 }
 0xbf6   : > { %3259 = vrot.lane.b32.xlu1 %v7747_v45, %s6254_s6 }
 0xbf7   : > { %3265 = vrot.lane.b32.xlu0 %v7749_v21, %s6254_s6 }
 0xbfa   : > { %3199 = vrot.lane.b32.xlu1 %v8355_v48, %s6253_s11 }
 0xbfb   : > { %3205 = vrot.lane.b32.xlu0 %v8356_v17, %s6253_s11 }
 0xbfe   : > { %3263 = vrot.lane.b32.xlu1 %v7751_v52, %s6254_s6 }
 0xbff   : > { %3269 = vrot.lane.b32.xlu0 %v7753_v4, %s6254_s6 }
 0xc02   : > { %3203 = vrot.lane.b32.xlu1 %v8357_v58, %s6253_s11 }
 0xc03   : > { %3209 = vrot.lane.b32.xlu0 %v8358_v24, %s6253_s11 }
 0xc06   : > { %3267 = vrot.lane.b32.xlu1 %v7755_v50, %s6254_s6 }
 0xc0a   : > { %3207 = vrot.lane.b32.xlu1 %v8359_v30, %s6253_s11 }
 0xc0e   : > { %3271 = vrot.lane.b32.xlu1 %v7759_v26, %s6254_s6 }
 0xc10   : > { %v2909_v35 = vpop.xlane.xlu0 %2908 }
 0xc11   : > { %v2907_v40 = vpop.xlane.xlu1 %2906 }
 0xc12   : > { %5919 = vrcp.f32 %v2907_v40 }
 0xc13   : > { %5921 = vrcp.f32 %v2909_v35 }
 0xc15   : > { %v2913_v25 = vpop.xlane.xlu0 %2912 }
 0xc16   : > { %5923 = vrcp.f32 %v2913_v25 }
 0xc19   : > { %v2915_v47 = vpop.xlane.xlu1 %2914 }
 0xc1a   : > { %v2911_v15 = vpop.xlane.xlu0 %2910 }
 0xc1b   : > { %5925 = vrcp.f32 %v2911_v15 }
 0xc1c   : > { %v5920_v45 = vpop.eup %5919  ;;  %5927 = vrcp.f32 %v2915_v47 }
 0xc1d   : > { %v5692_v21 = vpop.permute.xlu1 %5691  ;;  %v2954_v52 = vmul.f32 %v5920_v45, %v7837_v37  ;;  %v5922_v13 = vpop.eup %5921 }
 0xc1e   : > { %v5694_v4 = vunpack.i.h.bf16 %v5692_v21  ;;  %v5693_v50 = vunpack.i.l.bf16 %v5692_v21  ;;  %v2917_v44 = vpop.xlane.xlu0 %2916  ;;  %v2955_v22 = vmul.f32 %v5922_v13, %v7835_v3 }
 0xc1f   : > { %5929 = vrcp.f32 %v2917_v44  ;;  %4795 = vmatprep.mubr.f32.mxu0 %v2954_v52 }
 0xc20   : > { %v5175_v26 = vpack.c.bf16 %v5694_v4, %v5693_v50  ;;  %v5924_v55 = vpop.eup %5923 }
 0xc21   : > { %v2957_v54 = vmul.f32 %v5924_v55, %v7843_v39 }
 0xc22   : > { %v2921_v11 = vpop.xlane.xlu0 %2920  ;;  %5176 = vmatprep.subr.bf16.mxu0 %v5175_v26  ;;  %5194 = vmatprep.subr.bf16.mxu1 %v5175_v26 }
 0xc23   : > { %5178 = vmatpush3.bf16.msra.mxu0 %v5175_v26  ;;  %5202 = vmatpush3.bf16.msra.mxu1 %v5175_v26  ;;  %5931 = vrcp.f32 %v2921_v11 }
 0xc25   : > { %v5926_v57 = vpop.eup %5925 }
 0xc26   : > { %v5928_v41 = vpop.eup %5927  ;;  %v2919_v32 = vpop.xlane.xlu0 %2918  ;;  %4796 = vmatmul.mubr.f32.vlgmr.msra.gmra.mrb[80].mxu0 %v2955_v22  ;;  %v2956_v37 = vmul.f32 %v5926_v57, %v7849_v23  ;;  %v8363_v57 = vld [vmem:[#allocation46_spill] sm:$0xff] }
 0xc27   : > { %5933 = vrcp.f32 %v2919_v32  ;;  %v2958_v36 = vmul.f32 %v5928_v41, %v7847_v16 }
 0xc28   : > { %4798 = vmatprep.mubr.f32.mxu0 %v2956_v37 }
 0xc29   : > { %v5930_v59 = vpop.eup %5929 }
 0xc2a   : > { %v2923_v31 = vpop.xlane.xlu0 %2922  ;;  %4799 = vmatmul.mubr.f32.gmra.mrb[82].mxu0 %v2957_v54  ;;  %v2959_v3 = vmul.f32 %v5930_v59, %v7854_v56  ;;  %v8364_v54 = vld [vmem:[#allocation45_spill] sm:$0xff] }
 0xc2b   : > { %5935 = vrcp.f32 %v2923_v31  ;;  %4801 = vmatprep.mubr.f32.mxu0 %v2958_v36 }
 0xc2d   : > { %v5932_v60 = vpop.eup %5931 }
 0xc2e   : > { %v2927_v46 = vpop.xlane.xlu0 %2926  ;;  %4802 = vmatmul.mubr.f32.gmra.mrb[84].mxu0 %v2959_v3  ;;  %v2961_v5 = vmul.f32 %v5932_v60, %v7858_v18  ;;  %v8365_v3 = vld [vmem:[#allocation48_spill] sm:$0xff] }
 0xc2f   : > { %5937 = vrcp.f32 %v2927_v46 }
 0xc31   : > { %v5934_v49 = vpop.eup %5933 }
 0xc32   : > { %v2931_v53 = vpop.xlane.xlu0 %2930  ;;  %v2960_v23 = vmul.f32 %v5934_v49, %v7862_v34 }
 0xc34   : > { %4804 = vmatprep.mubr.f32.mxu1 %v2960_v23 }
 0xc35   : > { %v5936_v39 = vpop.eup %5935  ;;  %4805 = vmatmul.mubr.f32.vlgmr.msra.gmra.mrb[48].mxu1 %v2961_v5  ;;  %v8366_v5 = vld [vmem:[#allocation47_spill] sm:$0xff] }
 0xc36   : > { %v2935_v33 = vpop.xlane.xlu0 %2934  ;;  %v2962_v16 = vmul.f32 %v5936_v39, %v7866_v61 }
 0xc38   : > { %4807 = vmatprep.mubr.f32.mxu1 %v2962_v16 }
 0xc39   : > { %v5938_v0 = vpop.eup %5937 }
 0xc3a   : > { %v2937_v51 = vpop.xlane.xlu0 %2936  ;;  %v2964_v24 = vmul.f32 %v5938_v0, %v7871_v42 }
 0xc3e   : > { %v3180_v12 = vpop.permute.xlu0 %3179 }
 0xc3f   : > { %v7968_v56 = vsel %vm719_vm1, %v8360_v43, %v3180_v12  ;;  %v8367_v12 = vld [vmem:[#allocation49_spill] sm:$0xff] }
 0xc42   : > { %v3182_v2 = vpop.permute.xlu0 %3181 }
 0xc43   : > { %v7972_v10 = vsel %vm719_vm1, %v8361_v7, %v3182_v2 }
 0xc46   : > { %v7974_v34 = vpop.permute.xlu0 %3243 }
 0xc4a   : > { %v7976_v18 = vpop.permute.xlu0 %3183 }
 0xc4e   : > { %v7978_v28 = vpop.permute.xlu0 %3185  ;;  %v2925_v61 = vpop.xlane.xlu1 %2924 }
 0xc4f   : > { %5939 = vrcp.f32 %v2925_v61 }
 0xc50   : > { %5941 = vrcp.f32 %v2931_v53 }
 0xc52   : > { %v7980_v14 = vpop.permute.xlu0 %3249  ;;  %v2929_v38 = vpop.xlane.xlu1 %2928 }
 0xc53   : > { %5943 = vrcp.f32 %v2929_v38  ;;  %v8368_v38 = vld [vmem:[#allocation51_spill] sm:$0xff] }
 0xc54   : > { %5945 = vrcp.f32 %v2935_v33 }
 0xc56   : > { %v7982_v8 = vpop.permute.xlu0 %3189  ;;  %v2933_v19 = vpop.xlane.xlu1 %2932 }
 0xc57   : > { %5947 = vrcp.f32 %v2933_v19 }
 0xc58   : > { %5949 = vrcp.f32 %v2937_v51 }
 0xc59   : > { %v5940_v6 = vpop.eup %5939 }
 0xc5a   : > { %v7984_v48 = vpop.permute.xlu0 %3253  ;;  %v7986_v17 = vpop.permute.xlu1 %3245  ;;  %v2963_v58 = vmul.f32 %v5940_v6, %v7886_v1 }
 0xc5b   : > { %v5942_v30 = vpop.eup %5941 }
 0xc5c   : > { %4808 = vmatmul.mubr.f32.gmra.mrb[50].mxu1 %v2963_v58  ;;  %v2966_v15 = vmul.f32 %v5942_v30, %v7874_v9  ;;  %v3405_v58 = vld [vmem:[#allocation8] sm:$0xff] }
 0xc5d   : > { %v5944_v35 = vpop.eup %5943  ;;  %4810 = vmatprep.mubr.f32.mxu1 %v2964_v24  ;;  %v3406_v24 = vld [vmem:[#allocation8 + $0x8] sm:$0xff] }
 0xc5e   : > { %v7990_v40 = vpop.permute.xlu0 %3193  ;;  %v7992_v25 = vpop.permute.xlu1 %3247  ;;  %v2965_v47 = vmul.f32 %v5944_v35, %v7891_v29  ;;  %v8362_v29 = vld [vmem:[#allocation44_spill] sm:$0xff]  ;;  %v5179_v30 = vpack.c.bf16 %v3406_v24, %v3405_v58  ;;  %v3407_v35 = vld [vmem:[#allocation8 + $0x10] sm:$0xff] }
 0xc5f   : > { %v5946_v45 = vpop.eup %5945 }
 0xc60   : > { %4811 = vmatmul.mubr.f32.gmra.mrb[52].mxu1 %v2965_v47  ;;  %v2968_v50 = vmul.f32 %v5946_v45, %v7877_v62  ;;  %5180 = vmatprep.subr.bf16.mxu1 %v5179_v30  ;;  %v3408_v47 = vld [vmem:[#allocation8 + $0x18] sm:$0xff] }
 0xc61   : > { %v5948_v21 = vpop.eup %5947  ;;  %4813 = vmatprep.mubr.f32.mxu1 %v2966_v15  ;;  %5182 = vmatpush3.bf16.msra.mxu1 %v5179_v30  ;;  %v5183_v15 = vpack.c.bf16 %v3408_v47, %v3407_v35 }
 0xc62   : > { %v7996_v52 = vpop.permute.xlu0 %3257  ;;  %v7998_v1 = vpop.permute.xlu1 %3187  ;;  %v2967_v42 = vmul.f32 %v5948_v21, %v7896_v20 }
 0xc63   : > { %v5950_v4 = vpop.eup %5949  ;;  %5184 = vmatprep.subr.bf16.mxu1 %v5183_v15 }
 0xc64   : > { %4814 = vmatmul.mubr.f32.gmra.mrb[54].mxu1 %v2967_v42  ;;  %v2969_v9 = vmul.f32 %v5950_v4, %v7880_v63 }
 0xc65   : > { %4816 = vmatprep.mubr.f32.mxu1 %v2968_v50  ;;  %5186 = vmatpush3.bf16.msra.mxu1 %v5183_v15 }
 0xc66   : > { %v3198_v44 = vpop.permute.xlu0 %3197  ;;  %v8002_v26 = vpop.permute.xlu1 %3251 }
 0xc67   : > { %v3364_v13 = vsel %vm719_vm1, %v8362_v29, %v3198_v44 }
 0xc68   : > { %4817 = vmatmul.mubr.f32.gmra.mrb[56].mxu1 %v2969_v9 }
 0xc6a   : > { %v3262_v11 = vpop.permute.xlu0 %3261  ;;  %v8007_v55 = vpop.permute.xlu1 %3191 }
 0xc6b   : > { %v8010_v20 = vsel %vm3371_vm3, %v3364_v13, %v3262_v11 }
 0xc6e   : > { %v3202_v22 = vpop.permute.xlu0 %3201  ;;  %v8012_v62 = vpop.permute.xlu1 %3255 }
 0xc6f   : > { %v3366_v41 = vsel %vm719_vm1, %v8363_v57, %v3202_v22 }
 0xc72   : > { %v3266_v32 = vpop.permute.xlu0 %3265  ;;  %v3196_v37 = vpop.permute.xlu1 %3195 }
 0xc73   : > { %v8017_v63 = vsel %vm3371_vm3, %v3366_v41, %v3266_v32  ;;  %v3363_v59 = vsel %vm719_vm1, %v8364_v54, %v3196_v37 }
 0xc76   : > { %v3206_v36 = vpop.permute.xlu0 %3205  ;;  %v3260_v31 = vpop.permute.xlu1 %3259 }
 0xc77   : > { %v3368_v46 = vsel %vm719_vm1, %v8365_v3, %v3206_v36  ;;  %v8024_v60 = vsel %vm3371_vm3, %v3363_v59, %v3260_v31  ;;  %v3372_v36 = vsel %vm3371_vm3, %v7968_v56, %v7974_v34  ;;  %v8369_v31 = vld [vmem:[#allocation39_spill] sm:$0xff]  ;;  %v8370_v56 = vld [vmem:[#allocation50_spill] sm:$0xff] }
 0xc78   : > { %v3357_v3 = vsel %vm719_vm1, %v8369_v31, %v7976_v18 }
 0xc7a   : > { %v3270_v49 = vpop.permute.xlu0 %3269  ;;  %v3200_v53 = vpop.permute.xlu1 %3199 }
 0xc7b   : > { %v8027_v23 = vsel %vm3371_vm3, %v3368_v46, %v3270_v49  ;;  %v3365_v39 = vsel %vm719_vm1, %v8366_v5, %v3200_v53  ;;  %v3373_v49 = vsel %vm3371_vm3, %v7972_v10, %v7986_v17  ;;  %v3374_v53 = vsel %vm3371_vm3, %v3357_v3, %v7992_v25  ;;  %v8371_v17 = vld [vmem:[#allocation38_spill] sm:$0xff] }
 0xc7c   : > { %v3358_v25 = vsel %vm719_vm1, %v8371_v17, %v7978_v28  ;;  %v8373_v28 = vld [vmem:[#allocation40_spill] sm:$0xff] }
 0xc7d   : > { %v3360_v24 = vsel %vm719_vm1, %v8373_v28, %v7982_v8  ;;  %v8375_v8 = vld [vmem:[#allocation42_spill] sm:$0xff] }
 0xc7e   : > { %v3264_v33 = vpop.permute.xlu1 %3263  ;;  %v3210_v54 = vpop.permute.xlu0 %3209 }
 0xc7f   : > { %v8032_v16 = vsel %vm3371_vm3, %v3365_v39, %v3264_v33  ;;  %v3370_v34 = vsel %vm719_vm1, %v8370_v56, %v3210_v54 }
 0xc82   : > { %v3204_v51 = vpop.permute.xlu1 %3203 }
 0xc83   : > { %v3367_v43 = vsel %vm719_vm1, %v8367_v12, %v3204_v51 }
 0xc86   : > { %v3268_v2 = vpop.permute.xlu1 %3267 }
 0xc87   : > { %v8037_v7 = vsel %vm3371_vm3, %v3367_v43, %v3268_v2  ;;  %v3375_v43 = vsel %vm3371_vm3, %v3358_v25, %v7980_v14  ;;  %v8372_v2 = vld [vmem:[#allocation41_spill] sm:$0xff]  ;;  %v3377_v14 = vsel %vm3371_vm3, %v3360_v24, %v7984_v48 }
 0xc8a   : > { %v3208_v61 = vpop.permute.xlu1 %3207 }
 0xc8b   : > { %v3369_v19 = vsel %vm719_vm1, %v8368_v38, %v3208_v61  ;;  %v3359_v61 = vsel %vm719_vm1, %v8372_v2, %v7998_v1  ;;  %v8374_v1 = vld [vmem:[#allocation43_spill] sm:$0xff] }
 0xc8c   : > { %v3361_v30 = vsel %vm719_vm1, %v8374_v1, %v8007_v55 }
 0xc8d   : > { %v3378_v47 = vsel %vm3371_vm3, %v3361_v30, %v8012_v62 }
 0xc8e   : > { %v3272_v0 = vpop.permute.xlu1 %3271 }
 0xc8f   : > { %v8042_v6 = vsel %vm3371_vm3, %v3369_v19, %v3272_v0  ;;  %v3376_v19 = vsel %vm3371_vm3, %v3359_v61, %v8002_v26 }
 0xcf9   : > { %v4797_v45 = vpop.f32.mrb[80].mxu0 }
 0xcfa   : > { %3309 = vrot.lane.b32.xlu0 %v4797_v45, %s6255_s14  ;;  %v3084_v21 = vpop.f32.mrb[81].mxu0 }
 0xcfd   : > { %v4800_v42 = vpop.f32.mrb[82].mxu0 }
 0xcfe   : > { %3307 = vrot.lane.b32.xlu0 %v3084_v21, %s6255_s14  ;;  %v3094_v4 = vpop.f32.mrb[83].mxu0  ;;  %v3362_v21 = vsel %vm719_vm1, %v8375_v8, %v7990_v40 }
 0xcff   : > { %3311 = vrot.lane.b32.xlu1 %v3094_v4, %s6255_s14  ;;  %v3379_v48 = vsel %vm3371_vm3, %v3362_v21, %v7996_v52 }
 0xd01   : > { %v4803_v50 = vpop.f32.mrb[84].mxu0 }
 0xd02   : > { %3273 = vrot.lane.b32.xlu0 %v7757_v27, %s6254_s6  ;;  %v3104_v44 = vpop.f32.mrb[85].mxu0  ;;  %s6097_s6 = scalar_lea.vmem %s6096_s13, 4096 }
 0xd03   : > { %3315 = vrot.lane.b32.xlu1 %v3104_v44, %s6255_s14  ;;  %p6099_p7 = scmp.lt.s32.totalorder %s6097_s6, %s6091_s1 }
 0xd05   : > { %p6100_p0 = por %p6099_p7, %p6098_p11 }
 0xd06   : > { %3313 = vrot.lane.b32.xlu0 %v4800_v42, %s6255_s14 }
 0xd07   : > { %p6101_p6 = pnand %p6100_p0, %p6094_p2 }
 0xd08   : > { %v4806_v9 = vpop.f32.mrb[48].mxu1 }
 0xd09   : > { %v3114_v29 = vpop.f32.mrb[49].mxu1 }
 0xd0a   : > { %3319 = vrot.lane.b32.xlu1 %v3114_v29, %s6255_s14  ;;  %3317 = vrot.lane.b32.xlu0 %v4803_v50, %s6255_s14 }
 0xd0e   : > { %3321 = vrot.lane.b32.xlu0 %v4806_v9, %s6255_s14 }
 0xd2f   : > { %v4809_v13 = vpop.f32.mrb[50].mxu1 }
 0xd30   : > { %v3124_v11 = vpop.f32.mrb[51].mxu1  ;;  %3325 = vrot.lane.b32.xlu0 %v4809_v13, %s6255_s14 }
 0xd31   : > { %3323 = vrot.lane.b32.xlu1 %v3124_v11, %s6255_s14 }
 0xd33   : > { %v4812_v27 = vpop.f32.mrb[52].mxu1 }
 0xd34   : > { %v3134_v22 = vpop.f32.mrb[53].mxu1  ;;  %3329 = vrot.lane.b32.xlu0 %v4812_v27, %s6255_s14 }
 0xd35   : > { %3327 = vrot.lane.b32.xlu1 %v3134_v22, %s6255_s14 }
 0xd37   : > { %v4815_v57 = vpop.f32.mrb[54].mxu1 }
 0xd38   : > { %v3144_v41 = vpop.f32.mrb[55].mxu1  ;;  %3333 = vrot.lane.b32.xlu0 %v4815_v57, %s6255_s14  ;;  %v4014_v57 = vld [vmem:[#allocation10] ss:$0 sm:$0xff] }
 0xd39   : > { %3331 = vrot.lane.b32.xlu1 %v3144_v41, %s6255_s14 }
 0xd3b   : > { %v4818_v32 = vpop.f32.mrb[56].mxu1 }
 0xd3c   : > { %v3154_v37 = vpop.f32.mrb[57].mxu1  ;;  %3337 = vrot.lane.b32.xlu0 %v4818_v32, %s6255_s14 }
 0xd3d   : > { %3335 = vrot.lane.b32.xlu1 %v3154_v37, %s6255_s14 }
 0xd6c   : > { %v3310_v59 = vpop.permute.xlu0 %3309 }
 0xd6d   : > { %v3390_v33 = vsel %vm3388_vm4, %v3373_v49, %v3310_v59 }
 0xd70   : > { %v3308_v46 = vpop.permute.xlu0 %3307 }
 0xd71   : > { %v3389_v5 = vsel %vm3388_vm4, %v3372_v36, %v3308_v46  ;;  %v3312_v39 = vpop.permute.xlu1 %3311 }
 0xd72   : > { %v3391_v51 = vsel %vm3388_vm4, %v3374_v53, %v3312_v39  ;;  %4827 = vmatprep.mubr.msk.f32.mxu1 %vm445_vm0, %v3389_v5 }
 0xd73   : > { %4828 = vmatmul.mubr.msk.f32.vlgmr.msra.gmra.mrb[58].mxu1 %vm445_vm0, %v3390_v33 }
 0xd74   : > { %v3274_v18 = vpop.permute.xlu0 %3273  ;;  %4830 = vmatprep.mubr.msk.f32.mxu1 %vm445_vm0, %v3391_v51 }
 0xd75   : > { %v3387_v10 = vsel %vm3371_vm3, %v3370_v34, %v3274_v18  ;;  %v3316_v12 = vpop.permute.xlu1 %3315 }
 0xd76   : > { %v3393_v58 = vsel %vm3388_vm4, %v3376_v19, %v3316_v12 }
 0xd78   : > { %v3314_v38 = vpop.permute.xlu0 %3313 }
 0xd79   : > { %v3392_v0 = vsel %vm3388_vm4, %v3375_v43, %v3314_v38 }
 0xd7a   : > { %4831 = vmatmul.mubr.msk.f32.gmra.mrb[60].mxu1 %vm445_vm0, %v3392_v0 }
 0xd7b   : > { %4833 = vmatprep.mubr.msk.f32.mxu1 %vm445_vm0, %v3393_v58 }
 0xd7c   : > { %v3320_v26 = vpop.permute.xlu1 %3319  ;;  %v3318_v35 = vpop.permute.xlu0 %3317 }
 0xd7d   : > { %v3394_v15 = vsel %vm3388_vm4, %v3377_v14, %v3318_v35  ;;  %v3395_v45 = vsel %vm3388_vm4, %v3378_v47, %v3320_v26 }
 0xd7e   : > { %4834 = vmatmul.mubr.msk.f32.gmra.mrb[62].mxu1 %vm445_vm0, %v3394_v15 }
 0xd7f   : > { %4836 = vmatprep.mubr.msk.f32.mxu1 %vm445_vm0, %v3395_v45 }
 0xd80   : > { %v3322_v55 = vpop.permute.xlu0 %3321 }
 0xd81   : > { %v3396_v42 = vsel %vm3388_vm4, %v3379_v48, %v3322_v55 }
 0xd82   : > { %4837 = vmatmul.mubr.msk.f32.gmra.mrb[64].mxu1 %vm445_vm0, %v3396_v42 }
 0xda2   : > { %v3326_v62 = vpop.permute.xlu0 %3325 }
 0xda3   : > { %v3324_v4 = vpop.permute.xlu1 %3323  ;;  %v3398_v44 = vsel %vm3388_vm4, %v8010_v20, %v3326_v62 }
 0xda4   : > { %v3397_v50 = vsel %vm3388_vm4, %v8024_v60, %v3324_v4 }
 0xda5   : > { %4839 = vmatprep.mubr.msk.f32.mxu1 %vm445_vm0, %v3397_v50 }
 0xda6   : > { %v3330_v40 = vpop.permute.xlu0 %3329  ;;  %4840 = vmatmul.mubr.msk.f32.gmra.mrb[66].mxu1 %vm445_vm0, %v3398_v44 }
 0xda7   : > { %v3328_v9 = vpop.permute.xlu1 %3327  ;;  %v3400_v29 = vsel %vm3388_vm4, %v8017_v63, %v3330_v40 }
 0xda8   : > { %v3399_v52 = vsel %vm3388_vm4, %v8032_v16, %v3328_v9 }
 0xda9   : > { %4842 = vmatprep.mubr.msk.f32.mxu1 %vm445_vm0, %v3399_v52 }
 0xdaa   : > { %v3334_v13 = vpop.permute.xlu0 %3333  ;;  %4843 = vmatmul.mubr.msk.f32.gmra.mrb[68].mxu1 %vm445_vm0, %v3400_v29 }
 0xdab   : > { %v3332_v60 = vpop.permute.xlu1 %3331  ;;  %v3402_v11 = vsel %vm3388_vm4, %v8027_v23, %v3334_v13 }
 0xdac   : > { %v3401_v20 = vsel %vm3388_vm4, %v8037_v7, %v3332_v60 }
 0xdad   : > { %4845 = vmatprep.mubr.msk.f32.mxu1 %vm445_vm0, %v3401_v20 }
 0xdae   : > { %v3338_v27 = vpop.permute.xlu0 %3337  ;;  %4846 = vmatmul.mubr.msk.f32.gmra.mrb[70].mxu1 %vm445_vm0, %v3402_v11 }
 0xdaf   : > { %v3404_v63 = vsel %vm3388_vm4, %v3387_v10, %v3338_v27  ;;  %v3336_v16 = vpop.permute.xlu1 %3335 }
 0xdb0   : > { %v3403_v22 = vsel %vm3388_vm4, %v8042_v6, %v3336_v16 }
 0xdb1   : > { %4848 = vmatprep.mubr.msk.f32.mxu1 %vm445_vm0, %v3403_v22 }
 0xdb2   : > { %4849 = vmatmul.mubr.msk.f32.gmra.mrb[72].mxu1 %vm445_vm0, %v3404_v63 }
 0xe46   : > { %v4829_v7 = vpop.f32.mrb[58].mxu1 }
 0xe47   : > { %v3536_v41 = vadd.f32 %v4829_v7, %v4014_v57  ;;  %v3530_v32 = vpop.f32.mrb[59].mxu1 }
 0xe48   : > { %v3531_v23 = vadd.f32 %v4014_v57, %v3530_v32 }
 0xe49   : > { %3610 = vst.msk [vmem:[%s8142_s8 + $0x8] sm:$0xff] %vm445_vm0, %v3536_v41 }
 0xe4a   : > { %3609 = vst.msk [vmem:[%s8142_s8] sm:$0xff] %vm445_vm0, %v3531_v23 }
 0xe4d   : > { %v4832_v6 = vpop.f32.mrb[60].mxu1 }
 0xe4e   : > { %v3546_v37 = vadd.f32 %v4832_v6, %v4014_v57  ;;  %v3540_v54 = vpop.f32.mrb[61].mxu1 }
 0xe4f   : > { %v3541_v59 = vadd.f32 %v4014_v57, %v3540_v54 }
 0xe50   : > { %3612 = vst.msk [vmem:[%s8142_s8 + $0x18] sm:$0xff] %vm445_vm0, %v3546_v37 }
 0xe51   : > { %3611 = vst.msk [vmem:[%s8142_s8 + $0x10] sm:$0xff] %vm445_vm0, %v3541_v59  ;;  %v4835_v36 = vpop.f32.mrb[62].mxu1 }
 0xe52   : > { %v3556_v31 = vadd.f32 %v4835_v36, %v4014_v57  ;;  %v3550_v3 = vpop.f32.mrb[63].mxu1 }
 0xe53   : > { %v3551_v46 = vadd.f32 %v4014_v57, %v3550_v3 }
 0xe54   : > { %3614 = vst.msk [vmem:[%s8142_s8 + $0x28] sm:$0xff] %vm445_vm0, %v3556_v31 }
 0xe55   : > { %3613 = vst.msk [vmem:[%s8142_s8 + $0x20] sm:$0xff] %vm445_vm0, %v3551_v46  ;;  %v4838_v49 = vpop.f32.mrb[64].mxu1 }
 0xe56   : > { %v3566_v53 = vadd.f32 %v4838_v49, %v4014_v57  ;;  %v3560_v5 = vpop.f32.mrb[65].mxu1 }
 0xe57   : > { %v3561_v39 = vadd.f32 %v4014_v57, %v3560_v5 }
 0xe58   : > { %3616 = vst.msk [vmem:[%s8142_s8 + $0x38] sm:$0xff] %vm445_vm0, %v3566_v53 }
 0xe59   : > { %3615 = vst.msk [vmem:[%s8142_s8 + $0x30] sm:$0xff] %vm445_vm0, %v3561_v39 }
 0xe79   : > { %v4841_v33 = vpop.f32.mrb[66].mxu1 }
 0xe7a   : > { %v3576_v51 = vadd.f32 %v4841_v33, %v4014_v57  ;;  %v3570_v56 = vpop.f32.mrb[67].mxu1 }
 0xe7b   : > { %v3571_v34 = vadd.f32 %v4014_v57, %v3570_v56 }
 0xe7c   : > { %3618 = vst.msk [vmem:[%s8142_s8 + $0x48] sm:$0xff] %vm445_vm0, %v3576_v51 }
 0xe7d   : > { %3617 = vst.msk [vmem:[%s8142_s8 + $0x40] sm:$0xff] %vm445_vm0, %v3571_v34  ;;  %v4844_v18 = vpop.f32.mrb[68].mxu1 }
 0xe7e   : > { %v3586_v10 = vadd.f32 %v4844_v18, %v4014_v57  ;;  %v3580_v17 = vpop.f32.mrb[69].mxu1 }
 0xe7f   : > { %v3581_v25 = vadd.f32 %v4014_v57, %v3580_v17 }
 0xe80   : > { %3620 = vst.msk [vmem:[%s8142_s8 + $0x58] sm:$0xff] %vm445_vm0, %v3586_v10 }
 0xe81   : > { %3619 = vst.msk [vmem:[%s8142_s8 + $0x50] sm:$0xff] %vm445_vm0, %v3581_v25  ;;  %v4847_v12 = vpop.f32.mrb[70].mxu1 }
 0xe82   : > { %v3596_v43 = vadd.f32 %v4847_v12, %v4014_v57  ;;  %v3590_v2 = vpop.f32.mrb[71].mxu1 }
 0xe83   : > { %v3591_v61 = vadd.f32 %v4014_v57, %v3590_v2 }
 0xe84   : > { %3622 = vst.msk [vmem:[%s8142_s8 + $0x68] sm:$0xff] %vm445_vm0, %v3596_v43 }
 0xe85   : > { %3621 = vst.msk [vmem:[%s8142_s8 + $0x60] sm:$0xff] %vm445_vm0, %v3591_v61  ;;  %v4850_v38 = vpop.f32.mrb[72].mxu1 }
 0xe86   : > { %v3606_v19 = vadd.f32 %v4850_v38, %v4014_v57  ;;  %v3600_v0 = vpop.f32.mrb[73].mxu1 }
 0xe87   : > { %v3601_v58 = vadd.f32 %v4014_v57, %v3600_v0 }
 0xe88   : > { %3624 = vst.msk [vmem:[%s8142_s8 + $0x78] sm:$0xff] %vm445_vm0, %v3606_v19 }
 0xe89   : > { %3623 = vst.msk [vmem:[%s8142_s8 + $0x70] sm:$0xff] %vm445_vm0, %v3601_v58 }
 0xe8a   : > { %6104 = shalt.err (!%p6101_p6)
}
 0xe8b   : > { %s6105_s14 = scalar_lea.hbm %s8178_s12, 2048  ;;  %s6109_s9 = scalar_lea.hbm %s8380_s10, 8192 }
 0xe8c   : > { %p6106_p12 = scmp.ne.s32.totalorder %s8178_s12, %s6105_s14  ;;  %p6110_p13 = scmp.lt.u32.totalorder %s8178_s12, %s8380_s10 }
 0xe8d   : > { %p6111_p9 = scmp.lt.u32.totalorder %s6109_s9, %s6105_s14  ;;  %p6113_p1 = scmp.lt.u32.totalorder %s6105_s14, %s8178_s12 }
 0xe8e   : > { %p6107_p5 = pnand %p6106_p12, %p8381_p3 }
 0xe8f   : > { %p6112_p10 = por %p6111_p9, %p6110_p13 }
 0xe90   : > { %p6108_p4 = pneg %p6107_p5 }
 0xe91   : > { %p6114_p8 = por %p6113_p1, %p6112_p10 }
 0xe93   : > { %p6115_p2 = pnand %p6114_p8, %p6108_p4 }
 0xe95   : > { %6118 = shalt.err (!%p6115_p2)
}
 0xe96   : > { %s6257_s16 = smov 128  }
 0xe97   : > { %5230 = dma.vmem_to_hbm [thread:$0]  (%p8381_p3), %s8180_s30, 2048, %s8178_s12, %s3626_s24, %s6257_s16, %s6257_s16, %s6253_s11  }
 0xe98 PF: > { %s8382_s19 = sld [smem:[#allocation23_spill]]  ;;  %s8383_s18 = sld [smem:[#allocation35_spill]] }
 0xe99   : > { %p5257_p11 = scmp.ge.s32.totalorder %s6225_s7, 2 }
 0xe9e   : > { %s3657_s22 = sand.u32 1, %s8382_s19   ;;  %p8384_p7 = scmp.ne.s32.totalorder %s8383_s18, 0 }
 0xe9f   : > { %s3658_s1 = scalar_lea.sflag [#allocation4], %s3657_s22 }
 0xea0   : > { %p5246_p0 = pnand %p5257_p11, %p8384_p7 }
 0xea2   : > { %6180 = dma.done.wait (!%p5246_p0), %s3658_s1, 2048  }
 0xea3   : > { %6182 = vsyncadd (!%p5246_p0), %s3658_s1, 4294965248  ;;  %s27_s7 = sadd.s32 1, %s6225_s7   ;;  %s8385_s21 = sld [smem:[#allocation22_spill]] }
 0xea4   : > { %p24_p6 = scmp.ge.s32.totalorder %s27_s7, 6   ;;  %s8386_s20 = sld [smem:[#allocation31_spill]] }
 0xea5   : > { %s8387_s11 = sld [smem:[#allocation32_spill]]  ;;  %s8388_s28 = sld [smem:[#allocation26_spill]] }
 0xea6   : > { %s8389_s30 = sld [smem:[#allocation27_spill]]  ;;  %s8390_s12 = sld [smem:[#allocation29_spill]] }
 0xea7   : > { %s8391_s22 = smov %s6193_s23  ;;  %s8393_s24 = smov %s6201_s25 }
 0xea8   : > { %s8394_s25 = smov %s6205_s26  ;;  %s8396_s27 = smov %s6217_s29 }
 0xea9   :  { %26 = sbr.rel (!%p24_p6) target bundleno = 16 (0x10), region = 126 }
 0xeaa   : > { %s8392_s23 = smov %s8386_s20 }
 0xeab   : > { %s8395_s26 = smov %s8387_s11 }
 0xeac   : > { %s8397_s29 = smov %s8389_s30  ;;  %s8398_s30 = smov %s8390_s12 }
 0xeb0   :  { %3663 = vsyncpa [#allocation3], 1 }
 0xeb1   :  { %3665 = vsyncpa [#allocation3 + $0x1], 1 }
 0xeb2   :  { %3666 = vsyncpa [#allocation6], 1 }
 0xeb3   :  { %3667 = vsyncpa [#allocation9], 1 }
 0xeb4   :  { %3668 = vsyncpa [#allocation12], 1 }
 0xeb5   :  { %3670 = vsyncpa [#allocation12 + $0x1], 1 }
 0xeb6   :  { %3671 = vsyncpa [#allocation4], 1 }
 0xeb7   :  { %3673 = vsyncpa [#allocation4 + $0x1], 1 }

</bundles_post_ra>
